<compile_context>
chip_gen: v6e
topology: v6e:2x2x1
jax: 0.10.0
libtpu: 0.0.40
codegen_flags: <defaults>
</compile_context>

<pallas_src>
import functools
import math

import jax
import jax.numpy as jnp
from jax.experimental import pallas as pl
from jax.experimental.pallas import tpu as pltpu

_LN_EPS = 1e-5


# -----------------------------------------------------------------------------
# Tiled matmul + bias (+ optional relu)   — used for fused QKV proj and final proj
# -----------------------------------------------------------------------------
def _matmul_bias_kernel(x_ref, w_ref, b_ref, o_ref, acc_ref, *, relu):
    @pl.when(pl.program_id(2) == 0)
    def _():
        acc_ref[...] = jnp.zeros_like(acc_ref)

    acc_ref[...] += jnp.dot(x_ref[...], w_ref[...],
                            preferred_element_type=jnp.float32)

    @pl.when(pl.program_id(2) == pl.num_programs(2) - 1)
    def _():
        y = acc_ref[...] + b_ref[...]
        if relu:
            y = jnp.maximum(y, 0.0)
        o_ref[...] = y.astype(o_ref.dtype)


def _pick_tile(dim, target):
    # Use the target tile only when it evenly divides (targets are (8,128)-friendly);
    # otherwise fall back to the full dimension (always legal).
    return target if (dim > target and dim % target == 0) else dim


def matmul_bias(x, w, b, relu=False):
    """x: [M, K], w: [K, N], b: [N] -> [M, N]."""
    M, K = x.shape
    N = w.shape[1]
    tm, tn, tk = _pick_tile(M, 256), _pick_tile(N, 256), _pick_tile(K, 512)
    grid = (M // tm, N // tn, K // tk)
    return pl.pallas_call(
        functools.partial(_matmul_bias_kernel, relu=relu),
        out_shape=jax.ShapeDtypeStruct((M, N), jnp.float32),
        grid=grid,
        in_specs=[
            pl.BlockSpec((tm, tk), lambda i, j, k: (i, k)),
            pl.BlockSpec((tk, tn), lambda i, j, k: (k, j)),
            pl.BlockSpec((1, tn), lambda i, j, k: (0, j)),
        ],
        out_specs=pl.BlockSpec((tm, tn), lambda i, j, k: (i, j)),
        scratch_shapes=[pltpu.VMEM((tm, tn), jnp.float32)],
        compiler_params=pltpu.CompilerParams(
            dimension_semantics=("parallel", "parallel", "arbitrary")),
    )(x, w, b.reshape(1, N))


# -----------------------------------------------------------------------------
# Relative-position multi-head attention (windowed, per-batch, heads in-kernel)
# -----------------------------------------------------------------------------
def _rel_attn_kernel(qkv_ref, rkT_ref, rv_ref, mq_ref, mk_ref, o_ref, *,
                     n_heads, head_dim, window):
    T = o_ref.shape[1]
    H = n_heads * head_dim
    scale = 1.0 / math.sqrt(head_dim)

    qkv = qkv_ref[0]                              # [T, 3H]
    mq = mq_ref[0]                                # [T, 1]  query-side mask
    mk = mk_ref[0]                                # [1, T]  key-side mask
    valid = (mq * mk) > 0.0                       # [T, T]  == PyTorch attn_mask != 0

    row = jax.lax.broadcasted_iota(jnp.int32, (T, T), 0)
    col = jax.lax.broadcasted_iota(jnp.int32, (T, T), 1)
    rel = col - row                               # j - i

    rkT = rkT_ref[...]                            # [Dh, 2w+1]
    rv = rv_ref[...]                              # [2w+1, Dh]

    outs = []
    for h in range(n_heads):
        q = qkv[:, h * head_dim:(h + 1) * head_dim] * scale          # [T, Dh]
        k = qkv[:, H + h * head_dim:H + (h + 1) * head_dim]          # [T, Dh]
        v = qkv[:, 2 * H + h * head_dim:2 * H + (h + 1) * head_dim]  # [T, Dh]

        # content scores (MXU)
        scores = jax.lax.dot_general(q, k, (((1,), (1,)), ((), ())),
                                     preferred_element_type=jnp.float32)   # [T,T]
        # windowed relative-key scores (MXU) + diagonal-band skew (VPU selects)
        rel_logits = jnp.dot(q, rkT, preferred_element_type=jnp.float32)   # [T, 2w+1]
        for d in range(-window, window + 1):
            scores += jnp.where(rel == d,
                                rel_logits[:, d + window:d + window + 1], 0.0)

        # masked_fill + softmax (approx reciprocal on the EUP)
        scores = jnp.where(valid, scores, -1e4)
        scores = scores - jnp.max(scores, axis=-1, keepdims=True)
        e = jnp.exp(scores)
        p = e * pl.reciprocal(jnp.sum(e, axis=-1, keepdims=True), approx=True)

        # weighted values (MXU)
        out_h = jnp.dot(p, v, preferred_element_type=jnp.float32)          # [T, Dh]
        # relative-value contribution: absolute->relative band sums, then MXU matmul
        relw_cols = [jnp.sum(jnp.where(rel == d, p, 0.0), axis=-1, keepdims=True)
                     for d in range(-window, window + 1)]
        relw = jnp.concatenate(relw_cols, axis=-1)                          # [T, 2w+1]
        out_h = out_h + jnp.dot(relw, rv, preferred_element_type=jnp.float32)
        outs.append(out_h)

    # lane-dense [T, H] store (heads concatenated on the last axis)
    o_ref[0] = jnp.concatenate(outs, axis=-1).astype(o_ref.dtype)


def rel_attention(qkv, emb_rel_k, emb_rel_v, mask_bt1, mask_b1t, n_heads, window):
    """qkv: [B, T, 3H]; emb_rel_*: [1, 2w+1, Dh]; masks: [B,T,1] / [B,1,T]."""
    B, T, H3 = qkv.shape
    H = H3 // 3
    Dh = H // n_heads
    nrel = 2 * window + 1
    rkT = jnp.transpose(emb_rel_k[0], (1, 0))     # [Dh, 2w+1]
    rv = emb_rel_v[0]                             # [2w+1, Dh]
    return pl.pallas_call(
        functools.partial(_rel_attn_kernel, n_heads=n_heads, head_dim=Dh,
                          window=window),
        out_shape=jax.ShapeDtypeStruct((B, T, H), jnp.float32),
        grid=(B,),
        in_specs=[
            pl.BlockSpec((1, T, H3), lambda b: (b, 0, 0)),
            pl.BlockSpec((Dh, nrel), lambda b: (0, 0)),
            pl.BlockSpec((nrel, Dh), lambda b: (0, 0)),
            pl.BlockSpec((1, T, 1), lambda b: (b, 0, 0)),
            pl.BlockSpec((1, 1, T), lambda b: (b, 0, 0)),
        ],
        out_specs=pl.BlockSpec((1, T, H), lambda b: (b, 0, 0)),
        compiler_params=pltpu.CompilerParams(dimension_semantics=("parallel",)),
    )(qkv, rkT, rv, mask_bt1, mask_b1t)


# -----------------------------------------------------------------------------
# Fused (matmul + bias + residual + channel-LayerNorm)  — attention out-projection
# -----------------------------------------------------------------------------
def _matmul_res_ln_kernel(a_ref, w_ref, b_ref, r_ref, g_ref, be_ref, o_ref, *, eps):
    y = jnp.dot(a_ref[0], w_ref[...], preferred_element_type=jnp.float32) + b_ref[...]
    h = r_ref[0] + y
    mean = jnp.mean(h, axis=-1, keepdims=True)
    var = jnp.mean(jnp.square(h - mean), axis=-1, keepdims=True)
    o_ref[0] = ((h - mean) * jax.lax.rsqrt(var + eps)
                * g_ref[...] + be_ref[...]).astype(o_ref.dtype)


def matmul_res_ln(a_btc, w, b, res_btc, gamma, beta, eps=_LN_EPS):
    B, T, K = a_btc.shape
    N = w.shape[1]
    return pl.pallas_call(
        functools.partial(_matmul_res_ln_kernel, eps=eps),
        out_shape=jax.ShapeDtypeStruct((B, T, N), jnp.float32),
        grid=(B,),
        in_specs=[
            pl.BlockSpec((1, T, K), lambda b: (b, 0, 0)),
            pl.BlockSpec((K, N), lambda b: (0, 0)),
            pl.BlockSpec((1, N), lambda b: (0, 0)),
            pl.BlockSpec((1, T, N), lambda b: (b, 0, 0)),
            pl.BlockSpec((1, N), lambda b: (0, 0)),
            pl.BlockSpec((1, N), lambda b: (0, 0)),
        ],
        out_specs=pl.BlockSpec((1, T, N), lambda b: (b, 0, 0)),
        compiler_params=pltpu.CompilerParams(dimension_semantics=("parallel",)),
    )(a_btc, w, b.reshape(1, N), res_btc, gamma.reshape(1, N), beta.reshape(1, N))


# -----------------------------------------------------------------------------
# Fused FFN conv kernels ('same'-padded Conv1d done in-kernel via pltpu.roll)
# -----------------------------------------------------------------------------
def _shifted_taps_matmul(xm, w_ref, ksize, pad_l):
    """sum_j shift(xm, j - pad_l) @ w[j]  with zero padding outside [0, T)."""
    T = xm.shape[0]
    row = jax.lax.broadcasted_iota(jnp.int32, (T, 1), 0)
    acc = None
    for j in range(ksize):
        off = j - pad_l
        if off == 0:
            xs = xm
        else:
            xs = pltpu.roll(xm, shift=(-off) % T, axis=0)
            xs = jnp.where((row + off >= 0) & (row + off < T), xs, 0.0)
        c = jnp.dot(xs, w_ref[j], preferred_element_type=jnp.float32)
        acc = c if acc is None else acc + c
    return acc


def _conv_mask_relu_kernel(x_ref, m_ref, w_ref, b_ref, o_ref, *, ksize, pad_l):
    xm = x_ref[0] * m_ref[0]                                   # x * x_mask
    y = _shifted_taps_matmul(xm, w_ref, ksize, pad_l) + b_ref[...]
    o_ref[0] = jnp.maximum(y, 0.0).astype(o_ref.dtype)         # relu


def _conv_mask_res_ln_kernel(x_ref, m_ref, w_ref, b_ref, r_ref, g_ref, be_ref,
                             o_ref, *, ksize, pad_l, eps):
    xm = x_ref[0] * m_ref[0]                                   # x * x_mask
    y = (_shifted_taps_matmul(xm, w_ref, ksize, pad_l) + b_ref[...]) * m_ref[0]
    h = r_ref[0] + y                                           # residual
    mean = jnp.mean(h, axis=-1, keepdims=True)
    var = jnp.mean(jnp.square(h - mean), axis=-1, keepdims=True)
    o_ref[0] = ((h - mean) * jax.lax.rsqrt(var + eps)
                * g_ref[...] + be_ref[...]).astype(o_ref.dtype)


def ffn_conv_relu(x_btc, mask_bt1, w, b):
    """relu(Conv1d(x * mask)); w: [k, Cin, Cout]."""
    B, T, C = x_btc.shape
    k, _, F = w.shape
    pad_l = (k - 1) // 2
    return pl.pallas_call(
        functools.partial(_conv_mask_relu_kernel, ksize=k, pad_l=pad_l),
        out_shape=jax.ShapeDtypeStruct((B, T, F), jnp.float32),
        grid=(B,),
        in_specs=[
            pl.BlockSpec((1, T, C), lambda bb: (bb, 0, 0)),
            pl.BlockSpec((1, T, 1), lambda bb: (bb, 0, 0)),
            pl.BlockSpec((k, C, F), lambda bb: (0, 0, 0)),
            pl.BlockSpec((1, F), lambda bb: (0, 0)),
        ],
        out_specs=pl.BlockSpec((1, T, F), lambda bb: (bb, 0, 0)),
        compiler_params=pltpu.CompilerParams(dimension_semantics=("parallel",)),
    )(x_btc, mask_bt1, w, b.reshape(1, F))


def ffn_conv_res_ln(x_btc, mask_bt1, w, b, res_btc, gamma, beta, eps=_LN_EPS):
    """LayerNorm(res + mask * Conv1d(x * mask)); w: [k, Cin, Cout]."""
    B, T, C = x_btc.shape
    k, _, F = w.shape
    pad_l = (k - 1) // 2
    return pl.pallas_call(
        functools.partial(_conv_mask_res_ln_kernel, ksize=k, pad_l=pad_l, eps=eps),
        out_shape=jax.ShapeDtypeStruct((B, T, F), jnp.float32),
        grid=(B,),
        in_specs=[
            pl.BlockSpec((1, T, C), lambda bb: (bb, 0, 0)),
            pl.BlockSpec((1, T, 1), lambda bb: (bb, 0, 0)),
            pl.BlockSpec((k, C, F), lambda bb: (0, 0, 0)),
            pl.BlockSpec((1, F), lambda bb: (0, 0)),
            pl.BlockSpec((1, T, F), lambda bb: (bb, 0, 0)),
            pl.BlockSpec((1, F), lambda bb: (0, 0)),
            pl.BlockSpec((1, F), lambda bb: (0, 0)),
        ],
        out_specs=pl.BlockSpec((1, T, F), lambda bb: (bb, 0, 0)),
        compiler_params=pltpu.CompilerParams(dimension_semantics=("parallel",)),
    )(x_btc, mask_bt1, w, b.reshape(1, F), res_btc,
      gamma.reshape(1, F), beta.reshape(1, F))


# -----------------------------------------------------------------------------
# attentions.Encoder + TextEncoder forward (JAX glue around the kernels)
# -----------------------------------------------------------------------------
def encoder_forward(layers, x_btc, mask_bt1, mask_b1t, *, n_heads, window_size=4):
    B, T, H = x_btc.shape
    x = x_btc * mask_bt1
    for lp in layers:
        # fused Q/K/V projection (one [H, 3H] matmul)
        qkv = matmul_bias(x.reshape(B * T, H), lp["wqkv"], lp["bqkv"])
        qkv = qkv.reshape(B, T, 3 * H)
        # relative-position multi-head attention
        attn = rel_attention(qkv, lp["emb_rel_k"], lp["emb_rel_v"],
                             mask_bt1, mask_b1t, n_heads, window_size)     # [B,T,H]
        # output projection + residual + LayerNorm (fused)
        x = matmul_res_ln(attn, lp["wo"], lp["bo"], x, lp["ln1_g"], lp["ln1_b"])
        # FFN: conv1 + relu (mask fused), then conv2 + mask + residual + LayerNorm
        y1 = ffn_conv_relu(x, mask_bt1, lp["ffn_w1"], lp["ffn_b1"])
        x = ffn_conv_res_ln(y1, mask_bt1, lp["ffn_w2"], lp["ffn_b2"],
                            x, lp["ln2_g"], lp["ln2_b"])
    return x * mask_bt1


def text_encoder_forward(params, x, x_mask, f0, noice_scale=1, *,
                         out_channels, n_heads, window_size=4):
    """x: [B, H, T] (NCW), x_mask: [B, 1, T], f0: [B, T] int. PyTorch-layout outputs."""
    B, H, T = x.shape
    x_btc = jnp.transpose(x, (0, 2, 1))                    # [B, T, H]
    mask_bt1 = jnp.transpose(x_mask, (0, 2, 1))            # [B, T, 1]

    # x = x + f0_emb(f0).transpose(1, 2)   (embedding gather kept in glue)
    x_btc = x_btc + params["f0_emb"][f0]

    # x = enc_(x * x_mask, x_mask)
    stats_btc = encoder_forward(params["enc_layers"], x_btc, mask_bt1, x_mask,
                                n_heads=n_heads, window_size=window_size)

    # x = proj(x) * x_mask ; m, logs = split(x, out_channels, dim=1)
    y = matmul_bias(stats_btc.reshape(B * T, H), params["proj_w"], params["proj_b"])
    y = y.reshape(B, T, 2 * out_channels) * mask_bt1
    m_btc = y[..., :out_channels]
    logs_btc = y[..., out_channels:]

    stats = jnp.transpose(stats_btc, (0, 2, 1))            # [B, H, T]
    m = jnp.transpose(m_btc, (0, 2, 1))                    # [B, out, T]
    logs = jnp.transpose(logs_btc, (0, 2, 1))              # [B, out, T]
    return stats, m, logs, x_mask


# -----------------------------------------------------------------------------
# Deterministic synthetic parameter init (shapes from TextEncoder.__init__)
# -----------------------------------------------------------------------------
def init_params(key, out_channels, hidden, filter_channels, n_heads, n_layers,
                kernel_size, window_size=4):
    keys = list(jax.random.split(key, 16 * n_layers + 8))
    it = iter(keys)

    def nrm(shape, scale=0.02):
        return (scale * jax.random.normal(next(it), shape)).astype(jnp.float32)

    Dh = hidden // n_heads
    params = {
        "f0_emb": nrm((256, hidden), 1.0),
        "proj_w": nrm((hidden, 2 * out_channels)),
        "proj_b": jnp.zeros((2 * out_channels,), jnp.float32),
        "enc_layers": [],
    }
    for _ in range(n_layers):
        lp = {
            # fused Q/K/V projection weights: columns [Wq | Wk | Wv]
            "wqkv": nrm((hidden, 3 * hidden)), "bqkv": nrm((3 * hidden,)),
            "wo": nrm((hidden, hidden)), "bo": nrm((hidden,)),
            "emb_rel_k": nrm((1, 2 * window_size + 1, Dh), Dh ** -0.5),
            "emb_rel_v": nrm((1, 2 * window_size + 1, Dh), Dh ** -0.5),
            "ln1_g": jnp.ones((hidden,), jnp.float32),
            "ln1_b": jnp.zeros((hidden,), jnp.float32),
            # Conv1d weights stored as [kernel, Cin, Cout]
            "ffn_w1": nrm((kernel_size, hidden, filter_channels)),
            "ffn_b1": jnp.zeros((filter_channels,), jnp.float32),
            "ffn_w2": nrm((kernel_size, filter_channels, hidden)),
            "ffn_b2": jnp.zeros((hidden,), jnp.float32),
            "ln2_g": jnp.ones((hidden,), jnp.float32),
            "ln2_b": jnp.zeros((hidden,), jnp.float32),
        }
        params["enc_layers"].append(lp)
    return params


# -----------------------------------------------------------------------------
if __name__ == "__main__":
    key = jax.random.PRNGKey(0)
    B, T = 2, 16
    out_channels, hidden, filter_channels = 8, 64, 128
    n_heads, n_layers, kernel_size = 2, 2, 3

    kx, kf, kp = jax.random.split(key, 3)
    x = jax.random.normal(kx, (B, hidden, T), dtype=jnp.float32)        # NCW
    f0 = jax.random.randint(kf, (B, T), 0, 256)                         # [B, T] int
    lengths = jnp.array([T, T - 4])
    x_mask = (jnp.arange(T)[None, :] < lengths[:, None]
              ).astype(jnp.float32)[:, None, :]                         # [B, 1, T]

    params = init_params(kp, out_channels, hidden, filter_channels,
                         n_heads, n_layers, kernel_size)

    fwd = jax.jit(functools.partial(text_encoder_forward,
                                    out_channels=out_channels, n_heads=n_heads))
    stats, m, logs, mask_out = fwd(params, x, x_mask, f0)

    jax.block_until_ready((stats, m, logs, mask_out))
    assert stats.shape == (B, hidden, T)
    assert m.shape == (B, out_channels, T)
    assert logs.shape == (B, out_channels, T)
    assert mask_out.shape == (B, 1, T)
    print("KERNEL_OK")
</pallas_src>

<mosaic_0001>
module attributes {stable_mosaic.version = 11 : i64} {
  func.func @_conv_mask_relu_kernel(%arg0: i32, %arg1: memref<1x16x64xf32, #tpu.memory_space<vmem>>, %arg2: memref<1x16x1xf32, #tpu.memory_space<vmem>>, %arg3: memref<3x64x128xf32, #tpu.memory_space<vmem>>, %arg4: memref<1x128xf32, #tpu.memory_space<vmem>>, %arg5: memref<1x16x128xf32, #tpu.memory_space<vmem>>) attributes {dimension_semantics = [#tpu.dimension_semantics<parallel>], iteration_bounds = array<i64: 2>, scalar_prefetch = 0 : i64, scratch_operands = 0 : i64, tpu.core_type = #tpu.core_type<tc>, window_params = [{transform_indices = @transform_0, window_bounds = array<i64: 1, 16, 64>}, {transform_indices = @transform_1, window_bounds = array<i64: 1, 16, 1>}, {pipeline_mode = #tpu.pipeline_mode<synchronous>, transform_indices = @transform_2, window_bounds = array<i64: 3, 64, 128>}, {pipeline_mode = #tpu.pipeline_mode<synchronous>, transform_indices = @transform_3, window_bounds = array<i64: 1, 128>}, {transform_indices = @transform_4, window_bounds = array<i64: 1, 16, 128>}]} {
    %c0 = arith.constant 0 : index
    %c0_0 = arith.constant 0 : index
    %c0_1 = arith.constant 0 : index
    %0 = vector.load %arg1[%c0, %c0_0, %c0_1] : memref<1x16x64xf32, #tpu.memory_space<vmem>>, vector<1x16x64xf32>
    %1 = vector.shape_cast %0 : vector<1x16x64xf32> to vector<16x64xf32>
    %c0_2 = arith.constant 0 : index
    %c0_3 = arith.constant 0 : index
    %c0_4 = arith.constant 0 : index
    %2 = vector.load %arg2[%c0_2, %c0_3, %c0_4] : memref<1x16x1xf32, #tpu.memory_space<vmem>>, vector<1x16x1xf32>
    %3 = vector.shape_cast %2 : vector<1x16x1xf32> to vector<16x1xf32>
    %4 = vector.broadcast %3 : vector<16x1xf32> to vector<16x64xf32>
    %5 = arith.mulf %1, %4 : vector<16x64xf32>
    %6 = tpu.iota {dimensions = array<i32: 0>} : vector<16x1xi32>
    %c1_i32 = arith.constant 1 : i32
    %7 = tpu.dynamic_rotate %5 by %c1_i32 dim 0 : vector<16x64xf32>, i32 -> vector<16x64xf32>
    %c-1_i32 = arith.constant -1 : i32
    %8 = vector.broadcast %c-1_i32 : i32 to vector<16x1xi32>
    %9 = arith.addi %6, %8 : vector<16x1xi32>
    %c0_i32 = arith.constant 0 : i32
    %10 = vector.broadcast %c0_i32 : i32 to vector<16x1xi32>
    %11 = arith.cmpi sge, %9, %10 : vector<16x1xi32>
    %c-1_i32_5 = arith.constant -1 : i32
    %12 = vector.broadcast %c-1_i32_5 : i32 to vector<16x1xi32>
    %13 = arith.addi %6, %12 : vector<16x1xi32>
    %c16_i32 = arith.constant 16 : i32
    %14 = vector.broadcast %c16_i32 : i32 to vector<16x1xi32>
    %15 = arith.cmpi slt, %13, %14 : vector<16x1xi32>
    %16 = arith.andi %11, %15 : vector<16x1xi1>
    %cst = arith.constant 0.000000e+00 : f32
    %17 = vector.shape_cast %16 : vector<16x1xi1> to vector<16x1xi1>
    %18 = vector.broadcast %17 : vector<16x1xi1> to vector<16x64xi1>
    %19 = vector.broadcast %cst : f32 to vector<16x64xf32>
    %20 = arith.select %18, %7, %19 : vector<16x64xi1>, vector<16x64xf32>
    %c0_6 = arith.constant 0 : index
    %c0_7 = arith.constant 0 : index
    %c0_8 = arith.constant 0 : index
    %21 = vector.load %arg3[%c0_6, %c0_7, %c0_8] : memref<3x64x128xf32, #tpu.memory_space<vmem>>, vector<1x64x128xf32>
    %22 = vector.shape_cast %21 : vector<1x64x128xf32> to vector<64x128xf32>
    %cst_9 = arith.constant dense<0.000000e+00> : vector<16x128xf32>
    %23 = tpu.matmul %20, %22, %cst_9 {dimension_numbers = #tpu.dot_dimension_numbers<[1], [0], [0], [1], [0, 0, 1, 1], [], []>} : vector<16x64xf32>, vector<64x128xf32>, vector<16x128xf32> -> vector<16x128xf32>
    %c1 = arith.constant 1 : index
    %c0_10 = arith.constant 0 : index
    %c0_11 = arith.constant 0 : index
    %24 = vector.load %arg3[%c1, %c0_10, %c0_11] : memref<3x64x128xf32, #tpu.memory_space<vmem>>, vector<1x64x128xf32>
    %25 = vector.shape_cast %24 : vector<1x64x128xf32> to vector<64x128xf32>
    %cst_12 = arith.constant dense<0.000000e+00> : vector<16x128xf32>
    %26 = tpu.matmul %5, %25, %cst_12 {dimension_numbers = #tpu.dot_dimension_numbers<[1], [0], [0], [1], [0, 0, 1, 1], [], []>} : vector<16x64xf32>, vector<64x128xf32>, vector<16x128xf32> -> vector<16x128xf32>
    %27 = arith.addf %23, %26 : vector<16x128xf32>
    %c15_i32 = arith.constant 15 : i32
    %28 = tpu.dynamic_rotate %5 by %c15_i32 dim 0 : vector<16x64xf32>, i32 -> vector<16x64xf32>
    %c1_i32_13 = arith.constant 1 : i32
    %29 = vector.broadcast %c1_i32_13 : i32 to vector<16x1xi32>
    %30 = arith.addi %6, %29 : vector<16x1xi32>
    %c0_i32_14 = arith.constant 0 : i32
    %31 = vector.broadcast %c0_i32_14 : i32 to vector<16x1xi32>
    %32 = arith.cmpi sge, %30, %31 : vector<16x1xi32>
    %c1_i32_15 = arith.constant 1 : i32
    %33 = vector.broadcast %c1_i32_15 : i32 to vector<16x1xi32>
    %34 = arith.addi %6, %33 : vector<16x1xi32>
    %c16_i32_16 = arith.constant 16 : i32
    %35 = vector.broadcast %c16_i32_16 : i32 to vector<16x1xi32>
    %36 = arith.cmpi slt, %34, %35 : vector<16x1xi32>
    %37 = arith.andi %32, %36 : vector<16x1xi1>
    %cst_17 = arith.constant 0.000000e+00 : f32
    %38 = vector.shape_cast %37 : vector<16x1xi1> to vector<16x1xi1>
    %39 = vector.broadcast %38 : vector<16x1xi1> to vector<16x64xi1>
    %40 = vector.broadcast %cst_17 : f32 to vector<16x64xf32>
    %41 = arith.select %39, %28, %40 : vector<16x64xi1>, vector<16x64xf32>
    %c2 = arith.constant 2 : index
    %c0_18 = arith.constant 0 : index
    %c0_19 = arith.constant 0 : index
    %42 = vector.load %arg3[%c2, %c0_18, %c0_19] : memref<3x64x128xf32, #tpu.memory_space<vmem>>, vector<1x64x128xf32>
    %43 = vector.shape_cast %42 : vector<1x64x128xf32> to vector<64x128xf32>
    %cst_20 = arith.constant dense<0.000000e+00> : vector<16x128xf32>
    %44 = tpu.matmul %41, %43, %cst_20 {dimension_numbers = #tpu.dot_dimension_numbers<[1], [0], [0], [1], [0, 0, 1, 1], [], []>} : vector<16x64xf32>, vector<64x128xf32>, vector<16x128xf32> -> vector<16x128xf32>
    %45 = arith.addf %27, %44 : vector<16x128xf32>
    %c0_21 = arith.constant 0 : index
    %c0_22 = arith.constant 0 : index
    %46 = vector.load %arg4[%c0_21, %c0_22] : memref<1x128xf32, #tpu.memory_space<vmem>>, vector<1x128xf32>
    %47 = vector.broadcast %46 : vector<1x128xf32> to vector<16x128xf32>
    %48 = arith.addf %45, %47 : vector<16x128xf32>
    %cst_23 = arith.constant 0.000000e+00 : f32
    %49 = vector.broadcast %cst_23 : f32 to vector<16x128xf32>
    %50 = arith.maximumf %48, %49 : vector<16x128xf32>
    %c0_24 = arith.constant 0 : index
    %c0_25 = arith.constant 0 : index
    %c0_26 = arith.constant 0 : index
    %51 = vector.load %arg5[%c0_24, %c0_25, %c0_26] : memref<1x16x128xf32, #tpu.memory_space<vmem>>, vector<1x16x128xf32>
    %52 = vector.shape_cast %51 : vector<1x16x128xf32> to vector<16x128xf32>
    %53 = vector.shape_cast %50 : vector<16x128xf32> to vector<1x16x128xf32>
    tpu.vector_store %arg5[%c0_24, %c0_25, %c0_26], %53 {strides = array<i32>} : memref<1x16x128xf32, #tpu.memory_space<vmem>>, vector<1x16x128xf32>,
    return
  }
  func.func @transform_0(%arg0: i32) -> (i32, i32, i32) {
    %c0_i32 = arith.constant 0 : i32
    %c0_i32_0 = arith.constant 0 : i32
    %c0_i32_1 = arith.constant 0 : i32
    return %arg0, %c0_i32, %c0_i32_0 : i32, i32, i32
  }
  func.func @transform_1(%arg0: i32) -> (i32, i32, i32) {
    %c0_i32 = arith.constant 0 : i32
    %c0_i32_0 = arith.constant 0 : i32
    %c0_i32_1 = arith.constant 0 : i32
    return %arg0, %c0_i32, %c0_i32_0 : i32, i32, i32
  }
  func.func @transform_2(%arg0: i32) -> (i32, i32, i32) {
    %c0_i32 = arith.constant 0 : i32
    %c0_i32_0 = arith.constant 0 : i32
    %c0_i32_1 = arith.constant 0 : i32
    %c0_i32_2 = arith.constant 0 : i32
    return %c0_i32, %c0_i32_0, %c0_i32_1 : i32, i32, i32
  }
  func.func @transform_3(%arg0: i32) -> (i32, i32) {
    %c0_i32 = arith.constant 0 : i32
    %c0_i32_0 = arith.constant 0 : i32
    %c0_i32_1 = arith.constant 0 : i32
    return %c0_i32, %c0_i32_0 : i32, i32
  }
  func.func @transform_4(%arg0: i32) -> (i32, i32, i32) {
    %c0_i32 = arith.constant 0 : i32
    %c0_i32_0 = arith.constant 0 : i32
    %c0_i32_1 = arith.constant 0 : i32
    return %arg0, %c0_i32, %c0_i32_0 : i32, i32, i32
  }
}

module attributes {stable_mosaic.version = 11 : i64} {
  func.func @_matmul_bias_kernel(%arg0: i32, %arg1: i32, %arg2: i32, %arg3: memref<32x64xf32, #tpu.memory_space<vmem>>, %arg4: memref<64x192xf32, #tpu.memory_space<vmem>>, %arg5: memref<1x192xf32, #tpu.memory_space<vmem>>, %arg6: memref<32x192xf32, #tpu.memory_space<vmem>>, %arg7: memref<32x192xf32, #tpu.memory_space<vmem>>) attributes {dimension_semantics = [#tpu.dimension_semantics<parallel>, #tpu.dimension_semantics<parallel>, #tpu.dimension_semantics<arbitrary>], iteration_bounds = array<i64: 1, 1, 1>, scalar_prefetch = 0 : i64, scratch_operands = 1 : i64, tpu.core_type = #tpu.core_type<tc>, window_params = [{transform_indices = @transform_0, window_bounds = array<i64: 32, 64>}, {transform_indices = @transform_1, window_bounds = array<i64: 64, 192>}, {transform_indices = @transform_2, window_bounds = array<i64: 1, 192>}, {transform_indices = @transform_3, window_bounds = array<i64: 32, 192>}]} {
    %c0_i32 = arith.constant 0 : i32
    %0 = arith.cmpi eq, %arg2, %c0_i32 : i32
    %1 = arith.extui %0 : i1 to i32
    %c0_i32_0 = arith.constant 0 : i32
    %2 = arith.cmpi ne, %1, %c0_i32_0 : i32
    scf.if %2 {
      %cst_10 = arith.constant 0.000000e+00 : f32
      %12 = vector.broadcast %cst_10 : f32 to vector<32x192xf32>
      %c0_11 = arith.constant 0 : index
      %c0_12 = arith.constant 0 : index
      %13 = vector.load %arg7[%c0_11, %c0_12] : memref<32x192xf32, #tpu.memory_space<vmem>>, vector<32x192xf32>
      tpu.vector_store %arg7[%c0_11, %c0_12], %12 {strides = array<i32>} : memref<32x192xf32, #tpu.memory_space<vmem>>, vector<32x192xf32>,
    } else {
    }
    %c0 = arith.constant 0 : index
    %c0_1 = arith.constant 0 : index
    %3 = vector.load %arg7[%c0, %c0_1] : memref<32x192xf32, #tpu.memory_space<vmem>>, vector<32x192xf32>
    %c0_2 = arith.constant 0 : index
    %c0_3 = arith.constant 0 : index
    %4 = vector.load %arg3[%c0_2, %c0_3] : memref<32x64xf32, #tpu.memory_space<vmem>>, vector<32x64xf32>
    %c0_4 = arith.constant 0 : index
    %c0_5 = arith.constant 0 : index
    %5 = vector.load %arg4[%c0_4, %c0_5] : memref<64x192xf32, #tpu.memory_space<vmem>>, vector<64x192xf32>
    %cst = arith.constant dense<0.000000e+00> : vector<32x192xf32>
    %6 = tpu.matmul %4, %5, %cst {dimension_numbers = #tpu.dot_dimension_numbers<[1], [0], [0], [1], [0, 0, 1, 1], [], []>} : vector<32x64xf32>, vector<64x192xf32>, vector<32x192xf32> -> vector<32x192xf32>
    %7 = arith.addf %3, %6 : vector<32x192xf32>
    %c0_6 = arith.constant 0 : index
    %c0_7 = arith.constant 0 : index
    %8 = vector.load %arg7[%c0_6, %c0_7] : memref<32x192xf32, #tpu.memory_space<vmem>>, vector<32x192xf32>
    tpu.vector_store %arg7[%c0_6, %c0_7], %7 {strides = array<i32>} : memref<32x192xf32, #tpu.memory_space<vmem>>, vector<32x192xf32>,
    %c0_i32_8 = arith.constant 0 : i32
    %9 = arith.cmpi eq, %arg2, %c0_i32_8 : i32
    %10 = arith.extui %9 : i1 to i32
    %c0_i32_9 = arith.constant 0 : i32
    %11 = arith.cmpi ne, %10, %c0_i32_9 : i32
    scf.if %11 {
      %c0_10 = arith.constant 0 : index
      %c0_11 = arith.constant 0 : index
      %12 = vector.load %arg7[%c0_10, %c0_11] : memref<32x192xf32, #tpu.memory_space<vmem>>, vector<32x192xf32>
      %c0_12 = arith.constant 0 : index
      %c0_13 = arith.constant 0 : index
      %13 = vector.load %arg5[%c0_12, %c0_13] : memref<1x192xf32, #tpu.memory_space<vmem>>, vector<1x192xf32>
      %14 = vector.broadcast %13 : vector<1x192xf32> to vector<32x192xf32>
      %15 = arith.addf %12, %14 : vector<32x192xf32>
      %c0_14 = arith.constant 0 : index
      %c0_15 = arith.constant 0 : index
      %16 = vector.load %arg6[%c0_14, %c0_15] : memref<32x192xf32, #tpu.memory_space<vmem>>, vector<32x192xf32>
      tpu.vector_store %arg6[%c0_14, %c0_15], %15 {strides = array<i32>} : memref<32x192xf32, #tpu.memory_space<vmem>>, vector<32x192xf32>,
    } else {
    }
    return
  }
  func.func @transform_0(%arg0: i32, %arg1: i32, %arg2: i32) -> (i32, i32) {
    %c0_i32 = arith.constant 0 : i32
    return %arg0, %arg2 : i32, i32
  }
  func.func @transform_1(%arg0: i32, %arg1: i32, %arg2: i32) -> (i32, i32) {
    %c0_i32 = arith.constant 0 : i32
    return %arg2, %arg1 : i32, i32
  }
  func.func @transform_2(%arg0: i32, %arg1: i32, %arg2: i32) -> (i32, i32) {
    %c0_i32 = arith.constant 0 : i32
    %c0_i32_0 = arith.constant 0 : i32
    return %c0_i32, %arg1 : i32, i32
  }
  func.func @transform_3(%arg0: i32, %arg1: i32, %arg2: i32) -> (i32, i32) {
    %c0_i32 = arith.constant 0 : i32
    return %arg0, %arg1 : i32, i32
  }
}

module attributes {stable_mosaic.version = 11 : i64} {
  func.func @_matmul_res_ln_kernel(%arg0: i32, %arg1: memref<1x16x64xf32, #tpu.memory_space<vmem>>, %arg2: memref<64x64xf32, #tpu.memory_space<vmem>>, %arg3: memref<1x64xf32, #tpu.memory_space<vmem>>, %arg4: memref<1x16x64xf32, #tpu.memory_space<vmem>>, %arg5: memref<1x64xf32, #tpu.memory_space<vmem>>, %arg6: memref<1x64xf32, #tpu.memory_space<vmem>>, %arg7: memref<1x16x64xf32, #tpu.memory_space<vmem>>) attributes {dimension_semantics = [#tpu.dimension_semantics<parallel>], iteration_bounds = array<i64: 2>, scalar_prefetch = 0 : i64, scratch_operands = 0 : i64, tpu.core_type = #tpu.core_type<tc>, window_params = [{transform_indices = @transform_0, window_bounds = array<i64: 1, 16, 64>}, {pipeline_mode = #tpu.pipeline_mode<synchronous>, transform_indices = @transform_1, window_bounds = array<i64: 64, 64>}, {pipeline_mode = #tpu.pipeline_mode<synchronous>, transform_indices = @transform_2, window_bounds = array<i64: 1, 64>}, {transform_indices = @transform_3, window_bounds = array<i64: 1, 16, 64>}, {pipeline_mode = #tpu.pipeline_mode<synchronous>, transform_indices = @transform_4, window_bounds = array<i64: 1, 64>}, {pipeline_mode = #tpu.pipeline_mode<synchronous>, transform_indices = @transform_5, window_bounds = array<i64: 1, 64>}, {transform_indices = @transform_6, window_bounds = array<i64: 1, 16, 64>}]} {
    %c0 = arith.constant 0 : index
    %c0_0 = arith.constant 0 : index
    %c0_1 = arith.constant 0 : index
    %0 = vector.load %arg1[%c0, %c0_0, %c0_1] : memref<1x16x64xf32, #tpu.memory_space<vmem>>, vector<1x16x64xf32>
    %1 = vector.shape_cast %0 : vector<1x16x64xf32> to vector<16x64xf32>
    %c0_2 = arith.constant 0 : index
    %c0_3 = arith.constant 0 : index
    %2 = vector.load %arg2[%c0_2, %c0_3] : memref<64x64xf32, #tpu.memory_space<vmem>>, vector<64x64xf32>
    %cst = arith.constant dense<0.000000e+00> : vector<16x64xf32>
    %3 = tpu.matmul %1, %2, %cst {dimension_numbers = #tpu.dot_dimension_numbers<[1], [0], [0], [1], [0, 0, 1, 1], [], []>} : vector<16x64xf32>, vector<64x64xf32>, vector<16x64xf32> -> vector<16x64xf32>
    %c0_4 = arith.constant 0 : index
    %c0_5 = arith.constant 0 : index
    %4 = vector.load %arg3[%c0_4, %c0_5] : memref<1x64xf32, #tpu.memory_space<vmem>>, vector<1x64xf32>
    %5 = vector.broadcast %4 : vector<1x64xf32> to vector<16x64xf32>
    %6 = arith.addf %3, %5 : vector<16x64xf32>
    %c0_6 = arith.constant 0 : index
    %c0_7 = arith.constant 0 : index
    %c0_8 = arith.constant 0 : index
    %7 = vector.load %arg4[%c0_6, %c0_7, %c0_8] : memref<1x16x64xf32, #tpu.memory_space<vmem>>, vector<1x16x64xf32>
    %8 = vector.shape_cast %7 : vector<1x16x64xf32> to vector<16x64xf32>
    %9 = arith.addf %8, %6 : vector<16x64xf32>
    %cst_9 = arith.constant dense<0.000000e+00> : vector<16xf32>
    %10 = vector.multi_reduction <add>, %9, %cst_9 [1] : vector<16x64xf32> to vector<16xf32>
    %11 = vector.shape_cast %10 : vector<16xf32> to vector<16x1xf32>
    %cst_10 = arith.constant 6.400000e+01 : f32
    %12 = vector.broadcast %cst_10 : f32 to vector<16x1xf32>
    %13 = arith.divf %11, %12 : vector<16x1xf32>
    %14 = vector.broadcast %13 : vector<16x1xf32> to vector<16x64xf32>
    %15 = arith.subf %9, %14 : vector<16x64xf32>
    %16 = arith.mulf %15, %15 : vector<16x64xf32>
    %cst_11 = arith.constant dense<0.000000e+00> : vector<16xf32>
    %17 = vector.multi_reduction <add>, %16, %cst_11 [1] : vector<16x64xf32> to vector<16xf32>
    %18 = vector.shape_cast %17 : vector<16xf32> to vector<16x1xf32>
    %cst_12 = arith.constant 6.400000e+01 : f32
    %19 = vector.broadcast %cst_12 : f32 to vector<16x1xf32>
    %20 = arith.divf %18, %19 : vector<16x1xf32>
    %21 = vector.broadcast %13 : vector<16x1xf32> to vector<16x64xf32>
    %22 = arith.subf %9, %21 : vector<16x64xf32>
    %cst_13 = arith.constant 9.99999974E-6 : f32
    %23 = vector.broadcast %cst_13 : f32 to vector<16x1xf32>
    %24 = arith.addf %20, %23 : vector<16x1xf32>
    %25 = math.rsqrt %24 : vector<16x1xf32>
    %26 = vector.broadcast %25 : vector<16x1xf32> to vector<16x64xf32>
    %27 = arith.mulf %22, %26 : vector<16x64xf32>
    %c0_14 = arith.constant 0 : index
    %c0_15 = arith.constant 0 : index
    %28 = vector.load %arg5[%c0_14, %c0_15] : memref<1x64xf32, #tpu.memory_space<vmem>>, vector<1x64xf32>
    %29 = vector.broadcast %28 : vector<1x64xf32> to vector<16x64xf32>
    %30 = arith.mulf %27, %29 : vector<16x64xf32>
    %c0_16 = arith.constant 0 : index
    %c0_17 = arith.constant 0 : index
    %31 = vector.load %arg6[%c0_16, %c0_17] : memref<1x64xf32, #tpu.memory_space<vmem>>, vector<1x64xf32>
    %32 = vector.broadcast %31 : vector<1x64xf32> to vector<16x64xf32>
    %33 = arith.addf %30, %32 : vector<16x64xf32>
    %c0_18 = arith.constant 0 : index
    %c0_19 = arith.constant 0 : index
    %c0_20 = arith.constant 0 : index
    %34 = vector.load %arg7[%c0_18, %c0_19, %c0_20] : memref<1x16x64xf32, #tpu.memory_space<vmem>>, vector<1x16x64xf32>
    %35 = vector.shape_cast %34 : vector<1x16x64xf32> to vector<16x64xf32>
    %36 = vector.shape_cast %33 : vector<16x64xf32> to vector<1x16x64xf32>
    tpu.vector_store %arg7[%c0_18, %c0_19, %c0_20], %36 {strides = array<i32>} : memref<1x16x64xf32, #tpu.memory_space<vmem>>, vector<1x16x64xf32>,
    return
  }
  func.func @transform_0(%arg0: i32) -> (i32, i32, i32) {
    %c0_i32 = arith.constant 0 : i32
    %c0_i32_0 = arith.constant 0 : i32
    %c0_i32_1 = arith.constant 0 : i32
    return %arg0, %c0_i32, %c0_i32_0 : i32, i32, i32
  }
  func.func @transform_1(%arg0: i32) -> (i32, i32) {
    %c0_i32 = arith.constant 0 : i32
    %c0_i32_0 = arith.constant 0 : i32
    %c0_i32_1 = arith.constant 0 : i32
    return %c0_i32, %c0_i32_0 : i32, i32
  }
  func.func @transform_2(%arg0: i32) -> (i32, i32) {
    %c0_i32 = arith.constant 0 : i32
    %c0_i32_0 = arith.constant 0 : i32
    %c0_i32_1 = arith.constant 0 : i32
    return %c0_i32, %c0_i32_0 : i32, i32
  }
  func.func @transform_3(%arg0: i32) -> (i32, i32, i32) {
    %c0_i32 = arith.constant 0 : i32
    %c0_i32_0 = arith.constant 0 : i32
    %c0_i32_1 = arith.constant 0 : i32
    return %arg0, %c0_i32, %c0_i32_0 : i32, i32, i32
  }
  func.func @transform_4(%arg0: i32) -> (i32, i32) {
    %c0_i32 = arith.constant 0 : i32
    %c0_i32_0 = arith.constant 0 : i32
    %c0_i32_1 = arith.constant 0 : i32
    return %c0_i32, %c0_i32_0 : i32, i32
  }
  func.func @transform_5(%arg0: i32) -> (i32, i32) {
    %c0_i32 = arith.constant 0 : i32
    %c0_i32_0 = arith.constant 0 : i32
    %c0_i32_1 = arith.constant 0 : i32
    return %c0_i32, %c0_i32_0 : i32, i32
  }
  func.func @transform_6(%arg0: i32) -> (i32, i32, i32) {
    %c0_i32 = arith.constant 0 : i32
    %c0_i32_0 = arith.constant 0 : i32
    %c0_i32_1 = arith.constant 0 : i32
    return %arg0, %c0_i32, %c0_i32_0 : i32, i32, i32
  }
}

module attributes {stable_mosaic.version = 11 : i64} {
  func.func @_rel_attn_kernel(%arg0: i32, %arg1: memref<1x16x192xf32, #tpu.memory_space<vmem>>, %arg2: memref<32x9xf32, #tpu.memory_space<vmem>>, %arg3: memref<9x32xf32, #tpu.memory_space<vmem>>, %arg4: memref<1x16x1xf32, #tpu.memory_space<vmem>>, %arg5: memref<1x1x16xf32, #tpu.memory_space<vmem>>, %arg6: memref<1x16x64xf32, #tpu.memory_space<vmem>>) attributes {dimension_semantics = [#tpu.dimension_semantics<parallel>], iteration_bounds = array<i64: 2>, scalar_prefetch = 0 : i64, scratch_operands = 0 : i64, tpu.core_type = #tpu.core_type<tc>, window_params = [{transform_indices = @transform_0, window_bounds = array<i64: 1, 16, 192>}, {pipeline_mode = #tpu.pipeline_mode<synchronous>, transform_indices = @transform_1, window_bounds = array<i64: 32, 9>}, {pipeline_mode = #tpu.pipeline_mode<synchronous>, transform_indices = @transform_2, window_bounds = array<i64: 9, 32>}, {transform_indices = @transform_3, window_bounds = array<i64: 1, 16, 1>}, {transform_indices = @transform_4, window_bounds = array<i64: 1, 1, 16>}, {transform_indices = @transform_5, window_bounds = array<i64: 1, 16, 64>}]} {
    %c0 = arith.constant 0 : index
    %c0_0 = arith.constant 0 : index
    %c0_1 = arith.constant 0 : index
    %0 = vector.load %arg1[%c0, %c0_0, %c0_1] : memref<1x16x192xf32, #tpu.memory_space<vmem>>, vector<1x16x192xf32>
    %1 = vector.shape_cast %0 : vector<1x16x192xf32> to vector<16x192xf32>
    %c0_2 = arith.constant 0 : index
    %c0_3 = arith.constant 0 : index
    %c0_4 = arith.constant 0 : index
    %2 = vector.load %arg4[%c0_2, %c0_3, %c0_4] : memref<1x16x1xf32, #tpu.memory_space<vmem>>, vector<1x16x1xf32>
    %3 = vector.shape_cast %2 : vector<1x16x1xf32> to vector<16x1xf32>
    %c0_5 = arith.constant 0 : index
    %c0_6 = arith.constant 0 : index
    %c0_7 = arith.constant 0 : index
    %4 = vector.load %arg5[%c0_5, %c0_6, %c0_7] : memref<1x1x16xf32, #tpu.memory_space<vmem>>, vector<1x1x16xf32>
    %5 = vector.shape_cast %4 : vector<1x1x16xf32> to vector<1x16xf32>
    %6 = vector.broadcast %3 : vector<16x1xf32> to vector<16x16xf32>
    %7 = vector.broadcast %5 : vector<1x16xf32> to vector<16x16xf32>
    %8 = arith.mulf %6, %7 : vector<16x16xf32>
    %cst = arith.constant 0.000000e+00 : f32
    %9 = vector.broadcast %cst : f32 to vector<16x16xf32>
    %10 = arith.cmpf ogt, %8, %9 : vector<16x16xf32>
    %11 = tpu.iota {dimensions = array<i32: 0>} : vector<16x16xi32>
    %12 = tpu.iota {dimensions = array<i32: 1>} : vector<16x16xi32>
    %13 = arith.subi %12, %11 : vector<16x16xi32>
    %c0_8 = arith.constant 0 : index
    %c0_9 = arith.constant 0 : index
    %14 = vector.load %arg2[%c0_8, %c0_9] : memref<32x9xf32, #tpu.memory_space<vmem>>, vector<32x9xf32>
    %c0_10 = arith.constant 0 : index
    %c0_11 = arith.constant 0 : index
    %15 = vector.load %arg3[%c0_10, %c0_11] : memref<9x32xf32, #tpu.memory_space<vmem>>, vector<9x32xf32>
    %16 = vector.extract_strided_slice %1 {offsets = [0, 0], sizes = [16, 32], strides = [1, 1]} : vector<16x192xf32> to vector<16x32xf32>
    %cst_12 = arith.constant 0.176776692 : f32
    %17 = vector.broadcast %cst_12 : f32 to vector<16x32xf32>
    %18 = arith.mulf %16, %17 : vector<16x32xf32>
    %19 = vector.extract_strided_slice %1 {offsets = [0, 64], sizes = [16, 32], strides = [1, 1]} : vector<16x192xf32> to vector<16x32xf32>
    %20 = vector.extract_strided_slice %1 {offsets = [0, 128], sizes = [16, 32], strides = [1, 1]} : vector<16x192xf32> to vector<16x32xf32>
    %cst_13 = arith.constant dense<0.000000e+00> : vector<16x16xf32>
    %21 = tpu.matmul %18, %19, %cst_13 {dimension_numbers = #tpu.dot_dimension_numbers<[1], [1], [0], [0], [0, 0, 1, 0], [], []>} : vector<16x32xf32>, vector<16x32xf32>, vector<16x16xf32> -> vector<16x16xf32>
    %cst_14 = arith.constant dense<0.000000e+00> : vector<16x9xf32>
    %22 = tpu.matmul %18, %14, %cst_14 {dimension_numbers = #tpu.dot_dimension_numbers<[1], [0], [0], [1], [0, 0, 1, 1], [], []>} : vector<16x32xf32>, vector<32x9xf32>, vector<16x9xf32> -> vector<16x9xf32>
    %c-4_i32 = arith.constant -4 : i32
    %23 = vector.broadcast %c-4_i32 : i32 to vector<16x16xi32>
    %24 = arith.cmpi eq, %13, %23 : vector<16x16xi32>
    %25 = vector.extract_strided_slice %22 {offsets = [0, 0], sizes = [16, 1], strides = [1, 1]} : vector<16x9xf32> to vector<16x1xf32>
    %cst_15 = arith.constant 0.000000e+00 : f32
    %26 = vector.shape_cast %25 : vector<16x1xf32> to vector<16x1xf32>
    %27 = vector.broadcast %26 : vector<16x1xf32> to vector<16x16xf32>
    %28 = vector.broadcast %cst_15 : f32 to vector<16x16xf32>
    %29 = arith.select %24, %27, %28 : vector<16x16xi1>, vector<16x16xf32>
    %30 = arith.addf %21, %29 : vector<16x16xf32>
    %c-3_i32 = arith.constant -3 : i32
    %31 = vector.broadcast %c-3_i32 : i32 to vector<16x16xi32>
    %32 = arith.cmpi eq, %13, %31 : vector<16x16xi32>
    %33 = vector.extract_strided_slice %22 {offsets = [0, 1], sizes = [16, 1], strides = [1, 1]} : vector<16x9xf32> to vector<16x1xf32>
    %cst_16 = arith.constant 0.000000e+00 : f32
    %34 = vector.shape_cast %33 : vector<16x1xf32> to vector<16x1xf32>
    %35 = vector.broadcast %34 : vector<16x1xf32> to vector<16x16xf32>
    %36 = vector.broadcast %cst_16 : f32 to vector<16x16xf32>
    %37 = arith.select %32, %35, %36 : vector<16x16xi1>, vector<16x16xf32>
    %38 = arith.addf %30, %37 : vector<16x16xf32>
    %c-2_i32 = arith.constant -2 : i32
    %39 = vector.broadcast %c-2_i32 : i32 to vector<16x16xi32>
    %40 = arith.cmpi eq, %13, %39 : vector<16x16xi32>
    %41 = vector.extract_strided_slice %22 {offsets = [0, 2], sizes = [16, 1], strides = [1, 1]} : vector<16x9xf32> to vector<16x1xf32>
    %cst_17 = arith.constant 0.000000e+00 : f32
    %42 = vector.shape_cast %41 : vector<16x1xf32> to vector<16x1xf32>
    %43 = vector.broadcast %42 : vector<16x1xf32> to vector<16x16xf32>
    %44 = vector.broadcast %cst_17 : f32 to vector<16x16xf32>
    %45 = arith.select %40, %43, %44 : vector<16x16xi1>, vector<16x16xf32>
    %46 = arith.addf %38, %45 : vector<16x16xf32>
    %c-1_i32 = arith.constant -1 : i32
    %47 = vector.broadcast %c-1_i32 : i32 to vector<16x16xi32>
    %48 = arith.cmpi eq, %13, %47 : vector<16x16xi32>
    %49 = vector.extract_strided_slice %22 {offsets = [0, 3], sizes = [16, 1], strides = [1, 1]} : vector<16x9xf32> to vector<16x1xf32>
    %cst_18 = arith.constant 0.000000e+00 : f32
    %50 = vector.shape_cast %49 : vector<16x1xf32> to vector<16x1xf32>
    %51 = vector.broadcast %50 : vector<16x1xf32> to vector<16x16xf32>
    %52 = vector.broadcast %cst_18 : f32 to vector<16x16xf32>
    %53 = arith.select %48, %51, %52 : vector<16x16xi1>, vector<16x16xf32>
    %54 = arith.addf %46, %53 : vector<16x16xf32>
    %c0_i32 = arith.constant 0 : i32
    %55 = vector.broadcast %c0_i32 : i32 to vector<16x16xi32>
    %56 = arith.cmpi eq, %13, %55 : vector<16x16xi32>
    %57 = vector.extract_strided_slice %22 {offsets = [0, 4], sizes = [16, 1], strides = [1, 1]} : vector<16x9xf32> to vector<16x1xf32>
    %cst_19 = arith.constant 0.000000e+00 : f32
    %58 = vector.shape_cast %57 : vector<16x1xf32> to vector<16x1xf32>
    %59 = vector.broadcast %58 : vector<16x1xf32> to vector<16x16xf32>
    %60 = vector.broadcast %cst_19 : f32 to vector<16x16xf32>
    %61 = arith.select %56, %59, %60 : vector<16x16xi1>, vector<16x16xf32>
    %62 = arith.addf %54, %61 : vector<16x16xf32>
    %c1_i32 = arith.constant 1 : i32
    %63 = vector.broadcast %c1_i32 : i32 to vector<16x16xi32>
    %64 = arith.cmpi eq, %13, %63 : vector<16x16xi32>
    %65 = vector.extract_strided_slice %22 {offsets = [0, 5], sizes = [16, 1], strides = [1, 1]} : vector<16x9xf32> to vector<16x1xf32>
    %cst_20 = arith.constant 0.000000e+00 : f32
    %66 = vector.shape_cast %65 : vector<16x1xf32> to vector<16x1xf32>
    %67 = vector.broadcast %66 : vector<16x1xf32> to vector<16x16xf32>
    %68 = vector.broadcast %cst_20 : f32 to vector<16x16xf32>
    %69 = arith.select %64, %67, %68 : vector<16x16xi1>, vector<16x16xf32>
    %70 = arith.addf %62, %69 : vector<16x16xf32>
    %c2_i32 = arith.constant 2 : i32
    %71 = vector.broadcast %c2_i32 : i32 to vector<16x16xi32>
    %72 = arith.cmpi eq, %13, %71 : vector<16x16xi32>
    %73 = vector.extract_strided_slice %22 {offsets = [0, 6], sizes = [16, 1], strides = [1, 1]} : vector<16x9xf32> to vector<16x1xf32>
    %cst_21 = arith.constant 0.000000e+00 : f32
    %74 = vector.shape_cast %73 : vector<16x1xf32> to vector<16x1xf32>
    %75 = vector.broadcast %74 : vector<16x1xf32> to vector<16x16xf32>
    %76 = vector.broadcast %cst_21 : f32 to vector<16x16xf32>
    %77 = arith.select %72, %75, %76 : vector<16x16xi1>, vector<16x16xf32>
    %78 = arith.addf %70, %77 : vector<16x16xf32>
    %c3_i32 = arith.constant 3 : i32
    %79 = vector.broadcast %c3_i32 : i32 to vector<16x16xi32>
    %80 = arith.cmpi eq, %13, %79 : vector<16x16xi32>
    %81 = vector.extract_strided_slice %22 {offsets = [0, 7], sizes = [16, 1], strides = [1, 1]} : vector<16x9xf32> to vector<16x1xf32>
    %cst_22 = arith.constant 0.000000e+00 : f32
    %82 = vector.shape_cast %81 : vector<16x1xf32> to vector<16x1xf32>
    %83 = vector.broadcast %82 : vector<16x1xf32> to vector<16x16xf32>
    %84 = vector.broadcast %cst_22 : f32 to vector<16x16xf32>
    %85 = arith.select %80, %83, %84 : vector<16x16xi1>, vector<16x16xf32>
    %86 = arith.addf %78, %85 : vector<16x16xf32>
    %c4_i32 = arith.constant 4 : i32
    %87 = vector.broadcast %c4_i32 : i32 to vector<16x16xi32>
    %88 = arith.cmpi eq, %13, %87 : vector<16x16xi32>
    %89 = vector.extract_strided_slice %22 {offsets = [0, 8], sizes = [16, 1], strides = [1, 1]} : vector<16x9xf32> to vector<16x1xf32>
    %cst_23 = arith.constant 0.000000e+00 : f32
    %90 = vector.shape_cast %89 : vector<16x1xf32> to vector<16x1xf32>
    %91 = vector.broadcast %90 : vector<16x1xf32> to vector<16x16xf32>
    %92 = vector.broadcast %cst_23 : f32 to vector<16x16xf32>
    %93 = arith.select %88, %91, %92 : vector<16x16xi1>, vector<16x16xf32>
    %94 = arith.addf %86, %93 : vector<16x16xf32>
    %cst_24 = arith.constant -1.000000e+04 : f32
    %95 = vector.broadcast %cst_24 : f32 to vector<16x16xf32>
    %96 = arith.select %10, %94, %95 : vector<16x16xi1>, vector<16x16xf32>
    %cst_25 = arith.constant dense<0xFF800000> : vector<16xf32>
    %97 = vector.multi_reduction <maximumf>, %96, %cst_25 [1] : vector<16x16xf32> to vector<16xf32>
    %98 = vector.shape_cast %97 : vector<16xf32> to vector<16x1xf32>
    %99 = vector.broadcast %98 : vector<16x1xf32> to vector<16x16xf32>
    %100 = arith.subf %96, %99 : vector<16x16xf32>
    %101 = math.exp %100 : vector<16x16xf32>
    %cst_26 = arith.constant dense<0.000000e+00> : vector<16xf32>
    %102 = vector.multi_reduction <add>, %101, %cst_26 [1] : vector<16x16xf32> to vector<16xf32>
    %103 = vector.shape_cast %102 : vector<16xf32> to vector<16x1xf32>
    %104 = tpu.reciprocal %103 {approx = true} : vector<16x1xf32> -> vector<16x1xf32>
    %105 = vector.broadcast %104 : vector<16x1xf32> to vector<16x16xf32>
    %106 = arith.mulf %101, %105 : vector<16x16xf32>
    %cst_27 = arith.constant dense<0.000000e+00> : vector<16x32xf32>
    %107 = tpu.matmul %106, %20, %cst_27 {dimension_numbers = #tpu.dot_dimension_numbers<[1], [0], [0], [1], [0, 0, 1, 1], [], []>} : vector<16x16xf32>, vector<16x32xf32>, vector<16x32xf32> -> vector<16x32xf32>
    %c-4_i32_28 = arith.constant -4 : i32
    %108 = vector.broadcast %c-4_i32_28 : i32 to vector<16x16xi32>
    %109 = arith.cmpi eq, %13, %108 : vector<16x16xi32>
    %cst_29 = arith.constant 0.000000e+00 : f32
    %110 = vector.broadcast %cst_29 : f32 to vector<16x16xf32>
    %111 = arith.select %109, %106, %110 : vector<16x16xi1>, vector<16x16xf32>
    %cst_30 = arith.constant dense<0.000000e+00> : vector<16xf32>
    %112 = vector.multi_reduction <add>, %111, %cst_30 [1] : vector<16x16xf32> to vector<16xf32>
    %113 = vector.shape_cast %112 : vector<16xf32> to vector<16x1xf32>
    %c-3_i32_31 = arith.constant -3 : i32
    %114 = vector.broadcast %c-3_i32_31 : i32 to vector<16x16xi32>
    %115 = arith.cmpi eq, %13, %114 : vector<16x16xi32>
    %cst_32 = arith.constant 0.000000e+00 : f32
    %116 = vector.broadcast %cst_32 : f32 to vector<16x16xf32>
    %117 = arith.select %115, %106, %116 : vector<16x16xi1>, vector<16x16xf32>
    %cst_33 = arith.constant dense<0.000000e+00> : vector<16xf32>
    %118 = vector.multi_reduction <add>, %117, %cst_33 [1] : vector<16x16xf32> to vector<16xf32>
    %119 = vector.shape_cast %118 : vector<16xf32> to vector<16x1xf32>
    %c-2_i32_34 = arith.constant -2 : i32
    %120 = vector.broadcast %c-2_i32_34 : i32 to vector<16x16xi32>
    %121 = arith.cmpi eq, %13, %120 : vector<16x16xi32>
    %cst_35 = arith.constant 0.000000e+00 : f32
    %122 = vector.broadcast %cst_35 : f32 to vector<16x16xf32>
    %123 = arith.select %121, %106, %122 : vector<16x16xi1>, vector<16x16xf32>
    %cst_36 = arith.constant dense<0.000000e+00> : vector<16xf32>
    %124 = vector.multi_reduction <add>, %123, %cst_36 [1] : vector<16x16xf32> to vector<16xf32>
    %125 = vector.shape_cast %124 : vector<16xf32> to vector<16x1xf32>
    %c-1_i32_37 = arith.constant -1 : i32
    %126 = vector.broadcast %c-1_i32_37 : i32 to vector<16x16xi32>
    %127 = arith.cmpi eq, %13, %126 : vector<16x16xi32>
    %cst_38 = arith.constant 0.000000e+00 : f32
    %128 = vector.broadcast %cst_38 : f32 to vector<16x16xf32>
    %129 = arith.select %127, %106, %128 : vector<16x16xi1>, vector<16x16xf32>
    %cst_39 = arith.constant dense<0.000000e+00> : vector<16xf32>
    %130 = vector.multi_reduction <add>, %129, %cst_39 [1] : vector<16x16xf32> to vector<16xf32>
    %131 = vector.shape_cast %130 : vector<16xf32> to vector<16x1xf32>
    %c0_i32_40 = arith.constant 0 : i32
    %132 = vector.broadcast %c0_i32_40 : i32 to vector<16x16xi32>
    %133 = arith.cmpi eq, %13, %132 : vector<16x16xi32>
    %cst_41 = arith.constant 0.000000e+00 : f32
    %134 = vector.broadcast %cst_41 : f32 to vector<16x16xf32>
    %135 = arith.select %133, %106, %134 : vector<16x16xi1>, vector<16x16xf32>
    %cst_42 = arith.constant dense<0.000000e+00> : vector<16xf32>
    %136 = vector.multi_reduction <add>, %135, %cst_42 [1] : vector<16x16xf32> to vector<16xf32>
    %137 = vector.shape_cast %136 : vector<16xf32> to vector<16x1xf32>
    %c1_i32_43 = arith.constant 1 : i32
    %138 = vector.broadcast %c1_i32_43 : i32 to vector<16x16xi32>
    %139 = arith.cmpi eq, %13, %138 : vector<16x16xi32>
    %cst_44 = arith.constant 0.000000e+00 : f32
    %140 = vector.broadcast %cst_44 : f32 to vector<16x16xf32>
    %141 = arith.select %139, %106, %140 : vector<16x16xi1>, vector<16x16xf32>
    %cst_45 = arith.constant dense<0.000000e+00> : vector<16xf32>
    %142 = vector.multi_reduction <add>, %141, %cst_45 [1] : vector<16x16xf32> to vector<16xf32>
    %143 = vector.shape_cast %142 : vector<16xf32> to vector<16x1xf32>
    %c2_i32_46 = arith.constant 2 : i32
    %144 = vector.broadcast %c2_i32_46 : i32 to vector<16x16xi32>
    %145 = arith.cmpi eq, %13, %144 : vector<16x16xi32>
    %cst_47 = arith.constant 0.000000e+00 : f32
    %146 = vector.broadcast %cst_47 : f32 to vector<16x16xf32>
    %147 = arith.select %145, %106, %146 : vector<16x16xi1>, vector<16x16xf32>
    %cst_48 = arith.constant dense<0.000000e+00> : vector<16xf32>
    %148 = vector.multi_reduction <add>, %147, %cst_48 [1] : vector<16x16xf32> to vector<16xf32>
    %149 = vector.shape_cast %148 : vector<16xf32> to vector<16x1xf32>
    %c3_i32_49 = arith.constant 3 : i32
    %150 = vector.broadcast %c3_i32_49 : i32 to vector<16x16xi32>
    %151 = arith.cmpi eq, %13, %150 : vector<16x16xi32>
    %cst_50 = arith.constant 0.000000e+00 : f32
    %152 = vector.broadcast %cst_50 : f32 to vector<16x16xf32>
    %153 = arith.select %151, %106, %152 : vector<16x16xi1>, vector<16x16xf32>
    %cst_51 = arith.constant dense<0.000000e+00> : vector<16xf32>
    %154 = vector.multi_reduction <add>, %153, %cst_51 [1] : vector<16x16xf32> to vector<16xf32>
    %155 = vector.shape_cast %154 : vector<16xf32> to vector<16x1xf32>
    %c4_i32_52 = arith.constant 4 : i32
    %156 = vector.broadcast %c4_i32_52 : i32 to vector<16x16xi32>
    %157 = arith.cmpi eq, %13, %156 : vector<16x16xi32>
    %cst_53 = arith.constant 0.000000e+00 : f32
    %158 = vector.broadcast %cst_53 : f32 to vector<16x16xf32>
    %159 = arith.select %157, %106, %158 : vector<16x16xi1>, vector<16x16xf32>
    %cst_54 = arith.constant dense<0.000000e+00> : vector<16xf32>
    %160 = vector.multi_reduction <add>, %159, %cst_54 [1] : vector<16x16xf32> to vector<16xf32>
    %161 = vector.shape_cast %160 : vector<16xf32> to vector<16x1xf32>
    %162 = tpu.concatenate %113, %119, %125, %131, %137, %143, %149, %155, %161 in 1 : vector<16x1xf32>, vector<16x1xf32>, vector<16x1xf32>, vector<16x1xf32>, vector<16x1xf32>, vector<16x1xf32>, vector<16x1xf32>, vector<16x1xf32>, vector<16x1xf32> -> vector<16x9xf32>
    %cst_55 = arith.constant dense<0.000000e+00> : vector<16x32xf32>
    %163 = tpu.matmul %162, %15, %cst_55 {dimension_numbers = #tpu.dot_dimension_numbers<[1], [0], [0], [1], [0, 0, 1, 1], [], []>} : vector<16x9xf32>, vector<9x32xf32>, vector<16x32xf32> -> vector<16x32xf32>
    %164 = arith.addf %107, %163 : vector<16x32xf32>
    %165 = vector.extract_strided_slice %1 {offsets = [0, 32], sizes = [16, 32], strides = [1, 1]} : vector<16x192xf32> to vector<16x32xf32>
    %cst_56 = arith.constant 0.176776692 : f32
    %166 = vector.broadcast %cst_56 : f32 to vector<16x32xf32>
    %167 = arith.mulf %165, %166 : vector<16x32xf32>
    %168 = vector.extract_strided_slice %1 {offsets = [0, 96], sizes = [16, 32], strides = [1, 1]} : vector<16x192xf32> to vector<16x32xf32>
    %169 = vector.extract_strided_slice %1 {offsets = [0, 160], sizes = [16, 32], strides = [1, 1]} : vector<16x192xf32> to vector<16x32xf32>
    %cst_57 = arith.constant dense<0.000000e+00> : vector<16x16xf32>
    %170 = tpu.matmul %167, %168, %cst_57 {dimension_numbers = #tpu.dot_dimension_numbers<[1], [1], [0], [0], [0, 0, 1, 0], [], []>} : vector<16x32xf32>, vector<16x32xf32>, vector<16x16xf32> -> vector<16x16xf32>
    %cst_58 = arith.constant dense<0.000000e+00> : vector<16x9xf32>
    %171 = tpu.matmul %167, %14, %cst_58 {dimension_numbers = #tpu.dot_dimension_numbers<[1], [0], [0], [1], [0, 0, 1, 1], [], []>} : vector<16x32xf32>, vector<32x9xf32>, vector<16x9xf32> -> vector<16x9xf32>
    %c-4_i32_59 = arith.constant -4 : i32
    %172 = vector.broadcast %c-4_i32_59 : i32 to vector<16x16xi32>
    %173 = arith.cmpi eq, %13, %172 : vector<16x16xi32>
    %174 = vector.extract_strided_slice %171 {offsets = [0, 0], sizes = [16, 1], strides = [1, 1]} : vector<16x9xf32> to vector<16x1xf32>
    %cst_60 = arith.constant 0.000000e+00 : f32
    %175 = vector.shape_cast %174 : vector<16x1xf32> to vector<16x1xf32>
    %176 = vector.broadcast %175 : vector<16x1xf32> to vector<16x16xf32>
    %177 = vector.broadcast %cst_60 : f32 to vector<16x16xf32>
    %178 = arith.select %173, %176, %177 : vector<16x16xi1>, vector<16x16xf32>
    %179 = arith.addf %170, %178 : vector<16x16xf32>
    %c-3_i32_61 = arith.constant -3 : i32
    %180 = vector.broadcast %c-3_i32_61 : i32 to vector<16x16xi32>
    %181 = arith.cmpi eq, %13, %180 : vector<16x16xi32>
    %182 = vector.extract_strided_slice %171 {offsets = [0, 1], sizes = [16, 1], strides = [1, 1]} : vector<16x9xf32> to vector<16x1xf32>
    %cst_62 = arith.constant 0.000000e+00 : f32
    %183 = vector.shape_cast %182 : vector<16x1xf32> to vector<16x1xf32>
    %184 = vector.broadcast %183 : vector<16x1xf32> to vector<16x16xf32>
    %185 = vector.broadcast %cst_62 : f32 to vector<16x16xf32>
    %186 = arith.select %181, %184, %185 : vector<16x16xi1>, vector<16x16xf32>
    %187 = arith.addf %179, %186 : vector<16x16xf32>
    %c-2_i32_63 = arith.constant -2 : i32
    %188 = vector.broadcast %c-2_i32_63 : i32 to vector<16x16xi32>
    %189 = arith.cmpi eq, %13, %188 : vector<16x16xi32>
    %190 = vector.extract_strided_slice %171 {offsets = [0, 2], sizes = [16, 1], strides = [1, 1]} : vector<16x9xf32> to vector<16x1xf32>
    %cst_64 = arith.constant 0.000000e+00 : f32
    %191 = vector.shape_cast %190 : vector<16x1xf32> to vector<16x1xf32>
    %192 = vector.broadcast %191 : vector<16x1xf32> to vector<16x16xf32>
    %193 = vector.broadcast %cst_64 : f32 to vector<16x16xf32>
    %194 = arith.select %189, %192, %193 : vector<16x16xi1>, vector<16x16xf32>
    %195 = arith.addf %187, %194 : vector<16x16xf32>
    %c-1_i32_65 = arith.constant -1 : i32
    %196 = vector.broadcast %c-1_i32_65 : i32 to vector<16x16xi32>
    %197 = arith.cmpi eq, %13, %196 : vector<16x16xi32>
    %198 = vector.extract_strided_slice %171 {offsets = [0, 3], sizes = [16, 1], strides = [1, 1]} : vector<16x9xf32> to vector<16x1xf32>
    %cst_66 = arith.constant 0.000000e+00 : f32
    %199 = vector.shape_cast %198 : vector<16x1xf32> to vector<16x1xf32>
    %200 = vector.broadcast %199 : vector<16x1xf32> to vector<16x16xf32>
    %201 = vector.broadcast %cst_66 : f32 to vector<16x16xf32>
    %202 = arith.select %197, %200, %201 : vector<16x16xi1>, vector<16x16xf32>
    %203 = arith.addf %195, %202 : vector<16x16xf32>
    %c0_i32_67 = arith.constant 0 : i32
    %204 = vector.broadcast %c0_i32_67 : i32 to vector<16x16xi32>
    %205 = arith.cmpi eq, %13, %204 : vector<16x16xi32>
    %206 = vector.extract_strided_slice %171 {offsets = [0, 4], sizes = [16, 1], strides = [1, 1]} : vector<16x9xf32> to vector<16x1xf32>
    %cst_68 = arith.constant 0.000000e+00 : f32
    %207 = vector.shape_cast %206 : vector<16x1xf32> to vector<16x1xf32>
    %208 = vector.broadcast %207 : vector<16x1xf32> to vector<16x16xf32>
    %209 = vector.broadcast %cst_68 : f32 to vector<16x16xf32>
    %210 = arith.select %205, %208, %209 : vector<16x16xi1>, vector<16x16xf32>
    %211 = arith.addf %203, %210 : vector<16x16xf32>
    %c1_i32_69 = arith.constant 1 : i32
    %212 = vector.broadcast %c1_i32_69 : i32 to vector<16x16xi32>
    %213 = arith.cmpi eq, %13, %212 : vector<16x16xi32>
    %214 = vector.extract_strided_slice %171 {offsets = [0, 5], sizes = [16, 1], strides = [1, 1]} : vector<16x9xf32> to vector<16x1xf32>
    %cst_70 = arith.constant 0.000000e+00 : f32
    %215 = vector.shape_cast %214 : vector<16x1xf32> to vector<16x1xf32>
    %216 = vector.broadcast %215 : vector<16x1xf32> to vector<16x16xf32>
    %217 = vector.broadcast %cst_70 : f32 to vector<16x16xf32>
    %218 = arith.select %213, %216, %217 : vector<16x16xi1>, vector<16x16xf32>
    %219 = arith.addf %211, %218 : vector<16x16xf32>
    %c2_i32_71 = arith.constant 2 : i32
    %220 = vector.broadcast %c2_i32_71 : i32 to vector<16x16xi32>
    %221 = arith.cmpi eq, %13, %220 : vector<16x16xi32>
    %222 = vector.extract_strided_slice %171 {offsets = [0, 6], sizes = [16, 1], strides = [1, 1]} : vector<16x9xf32> to vector<16x1xf32>
    %cst_72 = arith.constant 0.000000e+00 : f32
    %223 = vector.shape_cast %222 : vector<16x1xf32> to vector<16x1xf32>
    %224 = vector.broadcast %223 : vector<16x1xf32> to vector<16x16xf32>
    %225 = vector.broadcast %cst_72 : f32 to vector<16x16xf32>
    %226 = arith.select %221, %224, %225 : vector<16x16xi1>, vector<16x16xf32>
    %227 = arith.addf %219, %226 : vector<16x16xf32>
    %c3_i32_73 = arith.constant 3 : i32
    %228 = vector.broadcast %c3_i32_73 : i32 to vector<16x16xi32>
    %229 = arith.cmpi eq, %13, %228 : vector<16x16xi32>
    %230 = vector.extract_strided_slice %171 {offsets = [0, 7], sizes = [16, 1], strides = [1, 1]} : vector<16x9xf32> to vector<16x1xf32>
    %cst_74 = arith.constant 0.000000e+00 : f32
    %231 = vector.shape_cast %230 : vector<16x1xf32> to vector<16x1xf32>
    %232 = vector.broadcast %231 : vector<16x1xf32> to vector<16x16xf32>
    %233 = vector.broadcast %cst_74 : f32 to vector<16x16xf32>
    %234 = arith.select %229, %232, %233 : vector<16x16xi1>, vector<16x16xf32>
    %235 = arith.addf %227, %234 : vector<16x16xf32>
    %c4_i32_75 = arith.constant 4 : i32
    %236 = vector.broadcast %c4_i32_75 : i32 to vector<16x16xi32>
    %237 = arith.cmpi eq, %13, %236 : vector<16x16xi32>
    %238 = vector.extract_strided_slice %171 {offsets = [0, 8], sizes = [16, 1], strides = [1, 1]} : vector<16x9xf32> to vector<16x1xf32>
    %cst_76 = arith.constant 0.000000e+00 : f32
    %239 = vector.shape_cast %238 : vector<16x1xf32> to vector<16x1xf32>
    %240 = vector.broadcast %239 : vector<16x1xf32> to vector<16x16xf32>
    %241 = vector.broadcast %cst_76 : f32 to vector<16x16xf32>
    %242 = arith.select %237, %240, %241 : vector<16x16xi1>, vector<16x16xf32>
    %243 = arith.addf %235, %242 : vector<16x16xf32>
    %cst_77 = arith.constant -1.000000e+04 : f32
    %244 = vector.broadcast %cst_77 : f32 to vector<16x16xf32>
    %245 = arith.select %10, %243, %244 : vector<16x16xi1>, vector<16x16xf32>
    %cst_78 = arith.constant dense<0xFF800000> : vector<16xf32>
    %246 = vector.multi_reduction <maximumf>, %245, %cst_78 [1] : vector<16x16xf32> to vector<16xf32>
    %247 = vector.shape_cast %246 : vector<16xf32> to vector<16x1xf32>
    %248 = vector.broadcast %247 : vector<16x1xf32> to vector<16x16xf32>
    %249 = arith.subf %245, %248 : vector<16x16xf32>
    %250 = math.exp %249 : vector<16x16xf32>
    %cst_79 = arith.constant dense<0.000000e+00> : vector<16xf32>
    %251 = vector.multi_reduction <add>, %250, %cst_79 [1] : vector<16x16xf32> to vector<16xf32>
    %252 = vector.shape_cast %251 : vector<16xf32> to vector<16x1xf32>
    %253 = tpu.reciprocal %252 {approx = true} : vector<16x1xf32> -> vector<16x1xf32>
    %254 = vector.broadcast %253 : vector<16x1xf32> to vector<16x16xf32>
    %255 = arith.mulf %250, %254 : vector<16x16xf32>
    %cst_80 = arith.constant dense<0.000000e+00> : vector<16x32xf32>
    %256 = tpu.matmul %255, %169, %cst_80 {dimension_numbers = #tpu.dot_dimension_numbers<[1], [0], [0], [1], [0, 0, 1, 1], [], []>} : vector<16x16xf32>, vector<16x32xf32>, vector<16x32xf32> -> vector<16x32xf32>
    %c-4_i32_81 = arith.constant -4 : i32
    %257 = vector.broadcast %c-4_i32_81 : i32 to vector<16x16xi32>
    %258 = arith.cmpi eq, %13, %257 : vector<16x16xi32>
    %cst_82 = arith.constant 0.000000e+00 : f32
    %259 = vector.broadcast %cst_82 : f32 to vector<16x16xf32>
    %260 = arith.select %258, %255, %259 : vector<16x16xi1>, vector<16x16xf32>
    %cst_83 = arith.constant dense<0.000000e+00> : vector<16xf32>
    %261 = vector.multi_reduction <add>, %260, %cst_83 [1] : vector<16x16xf32> to vector<16xf32>
    %262 = vector.shape_cast %261 : vector<16xf32> to vector<16x1xf32>
    %c-3_i32_84 = arith.constant -3 : i32
    %263 = vector.broadcast %c-3_i32_84 : i32 to vector<16x16xi32>
    %264 = arith.cmpi eq, %13, %263 : vector<16x16xi32>
    %cst_85 = arith.constant 0.000000e+00 : f32
    %265 = vector.broadcast %cst_85 : f32 to vector<16x16xf32>
    %266 = arith.select %264, %255, %265 : vector<16x16xi1>, vector<16x16xf32>
    %cst_86 = arith.constant dense<0.000000e+00> : vector<16xf32>
    %267 = vector.multi_reduction <add>, %266, %cst_86 [1] : vector<16x16xf32> to vector<16xf32>
    %268 = vector.shape_cast %267 : vector<16xf32> to vector<16x1xf32>
    %c-2_i32_87 = arith.constant -2 : i32
    %269 = vector.broadcast %c-2_i32_87 : i32 to vector<16x16xi32>
    %270 = arith.cmpi eq, %13, %269 : vector<16x16xi32>
    %cst_88 = arith.constant 0.000000e+00 : f32
    %271 = vector.broadcast %cst_88 : f32 to vector<16x16xf32>
    %272 = arith.select %270, %255, %271 : vector<16x16xi1>, vector<16x16xf32>
    %cst_89 = arith.constant dense<0.000000e+00> : vector<16xf32>
    %273 = vector.multi_reduction <add>, %272, %cst_89 [1] : vector<16x16xf32> to vector<16xf32>
    %274 = vector.shape_cast %273 : vector<16xf32> to vector<16x1xf32>
    %c-1_i32_90 = arith.constant -1 : i32
    %275 = vector.broadcast %c-1_i32_90 : i32 to vector<16x16xi32>
    %276 = arith.cmpi eq, %13, %275 : vector<16x16xi32>
    %cst_91 = arith.constant 0.000000e+00 : f32
    %277 = vector.broadcast %cst_91 : f32 to vector<16x16xf32>
    %278 = arith.select %276, %255, %277 : vector<16x16xi1>, vector<16x16xf32>
    %cst_92 = arith.constant dense<0.000000e+00> : vector<16xf32>
    %279 = vector.multi_reduction <add>, %278, %cst_92 [1] : vector<16x16xf32> to vector<16xf32>
    %280 = vector.shape_cast %279 : vector<16xf32> to vector<16x1xf32>
    %c0_i32_93 = arith.constant 0 : i32
    %281 = vector.broadcast %c0_i32_93 : i32 to vector<16x16xi32>
    %282 = arith.cmpi eq, %13, %281 : vector<16x16xi32>
    %cst_94 = arith.constant 0.000000e+00 : f32
    %283 = vector.broadcast %cst_94 : f32 to vector<16x16xf32>
    %284 = arith.select %282, %255, %283 : vector<16x16xi1>, vector<16x16xf32>
    %cst_95 = arith.constant dense<0.000000e+00> : vector<16xf32>
    %285 = vector.multi_reduction <add>, %284, %cst_95 [1] : vector<16x16xf32> to vector<16xf32>
    %286 = vector.shape_cast %285 : vector<16xf32> to vector<16x1xf32>
    %c1_i32_96 = arith.constant 1 : i32
    %287 = vector.broadcast %c1_i32_96 : i32 to vector<16x16xi32>
    %288 = arith.cmpi eq, %13, %287 : vector<16x16xi32>
    %cst_97 = arith.constant 0.000000e+00 : f32
    %289 = vector.broadcast %cst_97 : f32 to vector<16x16xf32>
    %290 = arith.select %288, %255, %289 : vector<16x16xi1>, vector<16x16xf32>
    %cst_98 = arith.constant dense<0.000000e+00> : vector<16xf32>
    %291 = vector.multi_reduction <add>, %290, %cst_98 [1] : vector<16x16xf32> to vector<16xf32>
    %292 = vector.shape_cast %291 : vector<16xf32> to vector<16x1xf32>
    %c2_i32_99 = arith.constant 2 : i32
    %293 = vector.broadcast %c2_i32_99 : i32 to vector<16x16xi32>
    %294 = arith.cmpi eq, %13, %293 : vector<16x16xi32>
    %cst_100 = arith.constant 0.000000e+00 : f32
    %295 = vector.broadcast %cst_100 : f32 to vector<16x16xf32>
    %296 = arith.select %294, %255, %295 : vector<16x16xi1>, vector<16x16xf32>
    %cst_101 = arith.constant dense<0.000000e+00> : vector<16xf32>
    %297 = vector.multi_reduction <add>, %296, %cst_101 [1] : vector<16x16xf32> to vector<16xf32>
    %298 = vector.shape_cast %297 : vector<16xf32> to vector<16x1xf32>
    %c3_i32_102 = arith.constant 3 : i32
    %299 = vector.broadcast %c3_i32_102 : i32 to vector<16x16xi32>
    %300 = arith.cmpi eq, %13, %299 : vector<16x16xi32>
    %cst_103 = arith.constant 0.000000e+00 : f32
    %301 = vector.broadcast %cst_103 : f32 to vector<16x16xf32>
    %302 = arith.select %300, %255, %301 : vector<16x16xi1>, vector<16x16xf32>
    %cst_104 = arith.constant dense<0.000000e+00> : vector<16xf32>
    %303 = vector.multi_reduction <add>, %302, %cst_104 [1] : vector<16x16xf32> to vector<16xf32>
    %304 = vector.shape_cast %303 : vector<16xf32> to vector<16x1xf32>
    %c4_i32_105 = arith.constant 4 : i32
    %305 = vector.broadcast %c4_i32_105 : i32 to vector<16x16xi32>
    %306 = arith.cmpi eq, %13, %305 : vector<16x16xi32>
    %cst_106 = arith.constant 0.000000e+00 : f32
    %307 = vector.broadcast %cst_106 : f32 to vector<16x16xf32>
    %308 = arith.select %306, %255, %307 : vector<16x16xi1>, vector<16x16xf32>
    %cst_107 = arith.constant dense<0.000000e+00> : vector<16xf32>
    %309 = vector.multi_reduction <add>, %308, %cst_107 [1] : vector<16x16xf32> to vector<16xf32>
    %310 = vector.shape_cast %309 : vector<16xf32> to vector<16x1xf32>
    %311 = tpu.concatenate %262, %268, %274, %280, %286, %292, %298, %304, %310 in 1 : vector<16x1xf32>, vector<16x1xf32>, vector<16x1xf32>, vector<16x1xf32>, vector<16x1xf32>, vector<16x1xf32>, vector<16x1xf32>, vector<16x1xf32>, vector<16x1xf32> -> vector<16x9xf32>
    %cst_108 = arith.constant dense<0.000000e+00> : vector<16x32xf32>
    %312 = tpu.matmul %311, %15, %cst_108 {dimension_numbers = #tpu.dot_dimension_numbers<[1], [0], [0], [1], [0, 0, 1, 1], [], []>} : vector<16x9xf32>, vector<9x32xf32>, vector<16x32xf32> -> vector<16x32xf32>
    %313 = arith.addf %256, %312 : vector<16x32xf32>
    %314 = tpu.concatenate %164, %313 in 1 : vector<16x32xf32>, vector<16x32xf32> -> vector<16x64xf32>
    %c0_109 = arith.constant 0 : index
    %c0_110 = arith.constant 0 : index
    %c0_111 = arith.constant 0 : index
    %315 = vector.load %arg6[%c0_109, %c0_110, %c0_111] : memref<1x16x64xf32, #tpu.memory_space<vmem>>, vector<1x16x64xf32>
    %316 = vector.shape_cast %315 : vector<1x16x64xf32> to vector<16x64xf32>
    %317 = vector.shape_cast %314 : vector<16x64xf32> to vector<1x16x64xf32>
    tpu.vector_store %arg6[%c0_109, %c0_110, %c0_111], %317 {strides = array<i32>} : memref<1x16x64xf32, #tpu.memory_space<vmem>>, vector<1x16x64xf32>,
    return
  }
  func.func @transform_0(%arg0: i32) -> (i32, i32, i32) {
    %c0_i32 = arith.constant 0 : i32
    %c0_i32_0 = arith.constant 0 : i32
    %c0_i32_1 = arith.constant 0 : i32
    return %arg0, %c0_i32, %c0_i32_0 : i32, i32, i32
  }
  func.func @transform_1(%arg0: i32) -> (i32, i32) {
    %c0_i32 = arith.constant 0 : i32
    %c0_i32_0 = arith.constant 0 : i32
    %c0_i32_1 = arith.constant 0 : i32
    return %c0_i32, %c0_i32_0 : i32, i32
  }
  func.func @transform_2(%arg0: i32) -> (i32, i32) {
    %c0_i32 = arith.constant 0 : i32
    %c0_i32_0 = arith.constant 0 : i32
    %c0_i32_1 = arith.constant 0 : i32
    return %c0_i32, %c0_i32_0 : i32, i32
  }
  func.func @transform_3(%arg0: i32) -> (i32, i32, i32) {
    %c0_i32 = arith.constant 0 : i32
    %c0_i32_0 = arith.constant 0 : i32
    %c0_i32_1 = arith.constant 0 : i32
    return %arg0, %c0_i32, %c0_i32_0 : i32, i32, i32
  }
  func.func @transform_4(%arg0: i32) -> (i32, i32, i32) {
    %c0_i32 = arith.constant 0 : i32
    %c0_i32_0 = arith.constant 0 : i32
    %c0_i32_1 = arith.constant 0 : i32
    return %arg0, %c0_i32, %c0_i32_0 : i32, i32, i32
  }
  func.func @transform_5(%arg0: i32) -> (i32, i32, i32) {
    %c0_i32 = arith.constant 0 : i32
    %c0_i32_0 = arith.constant 0 : i32
    %c0_i32_1 = arith.constant 0 : i32
    return %arg0, %c0_i32, %c0_i32_0 : i32, i32, i32
  }
}

module attributes {stable_mosaic.version = 11 : i64} {
  func.func @_matmul_bias_kernel(%arg0: i32, %arg1: i32, %arg2: i32, %arg3: memref<32x64xf32, #tpu.memory_space<vmem>>, %arg4: memref<64x16xf32, #tpu.memory_space<vmem>>, %arg5: memref<1x16xf32, #tpu.memory_space<vmem>>, %arg6: memref<32x16xf32, #tpu.memory_space<vmem>>, %arg7: memref<32x16xf32, #tpu.memory_space<vmem>>) attributes {dimension_semantics = [#tpu.dimension_semantics<parallel>, #tpu.dimension_semantics<parallel>, #tpu.dimension_semantics<arbitrary>], iteration_bounds = array<i64: 1, 1, 1>, scalar_prefetch = 0 : i64, scratch_operands = 1 : i64, tpu.core_type = #tpu.core_type<tc>, window_params = [{transform_indices = @transform_0, window_bounds = array<i64: 32, 64>}, {transform_indices = @transform_1, window_bounds = array<i64: 64, 16>}, {transform_indices = @transform_2, window_bounds = array<i64: 1, 16>}, {transform_indices = @transform_3, window_bounds = array<i64: 32, 16>}]} {
    %c0_i32 = arith.constant 0 : i32
    %0 = arith.cmpi eq, %arg2, %c0_i32 : i32
    %1 = arith.extui %0 : i1 to i32
    %c0_i32_0 = arith.constant 0 : i32
    %2 = arith.cmpi ne, %1, %c0_i32_0 : i32
    scf.if %2 {
      %cst_10 = arith.constant 0.000000e+00 : f32
      %12 = vector.broadcast %cst_10 : f32 to vector<32x16xf32>
      %c0_11 = arith.constant 0 : index
      %c0_12 = arith.constant 0 : index
      %13 = vector.load %arg7[%c0_11, %c0_12] : memref<32x16xf32, #tpu.memory_space<vmem>>, vector<32x16xf32>
      tpu.vector_store %arg7[%c0_11, %c0_12], %12 {strides = array<i32>} : memref<32x16xf32, #tpu.memory_space<vmem>>, vector<32x16xf32>,
    } else {
    }
    %c0 = arith.constant 0 : index
    %c0_1 = arith.constant 0 : index
    %3 = vector.load %arg7[%c0, %c0_1] : memref<32x16xf32, #tpu.memory_space<vmem>>, vector<32x16xf32>
    %c0_2 = arith.constant 0 : index
    %c0_3 = arith.constant 0 : index
    %4 = vector.load %arg3[%c0_2, %c0_3] : memref<32x64xf32, #tpu.memory_space<vmem>>, vector<32x64xf32>
    %c0_4 = arith.constant 0 : index
    %c0_5 = arith.constant 0 : index
    %5 = vector.load %arg4[%c0_4, %c0_5] : memref<64x16xf32, #tpu.memory_space<vmem>>, vector<64x16xf32>
    %cst = arith.constant dense<0.000000e+00> : vector<32x16xf32>
    %6 = tpu.matmul %4, %5, %cst {dimension_numbers = #tpu.dot_dimension_numbers<[1], [0], [0], [1], [0, 0, 1, 1], [], []>} : vector<32x64xf32>, vector<64x16xf32>, vector<32x16xf32> -> vector<32x16xf32>
    %7 = arith.addf %3, %6 : vector<32x16xf32>
    %c0_6 = arith.constant 0 : index
    %c0_7 = arith.constant 0 : index
    %8 = vector.load %arg7[%c0_6, %c0_7] : memref<32x16xf32, #tpu.memory_space<vmem>>, vector<32x16xf32>
    tpu.vector_store %arg7[%c0_6, %c0_7], %7 {strides = array<i32>} : memref<32x16xf32, #tpu.memory_space<vmem>>, vector<32x16xf32>,
    %c0_i32_8 = arith.constant 0 : i32
    %9 = arith.cmpi eq, %arg2, %c0_i32_8 : i32
    %10 = arith.extui %9 : i1 to i32
    %c0_i32_9 = arith.constant 0 : i32
    %11 = arith.cmpi ne, %10, %c0_i32_9 : i32
    scf.if %11 {
      %c0_10 = arith.constant 0 : index
      %c0_11 = arith.constant 0 : index
      %12 = vector.load %arg7[%c0_10, %c0_11] : memref<32x16xf32, #tpu.memory_space<vmem>>, vector<32x16xf32>
      %c0_12 = arith.constant 0 : index
      %c0_13 = arith.constant 0 : index
      %13 = vector.load %arg5[%c0_12, %c0_13] : memref<1x16xf32, #tpu.memory_space<vmem>>, vector<1x16xf32>
      %14 = vector.broadcast %13 : vector<1x16xf32> to vector<32x16xf32>
      %15 = arith.addf %12, %14 : vector<32x16xf32>
      %c0_14 = arith.constant 0 : index
      %c0_15 = arith.constant 0 : index
      %16 = vector.load %arg6[%c0_14, %c0_15] : memref<32x16xf32, #tpu.memory_space<vmem>>, vector<32x16xf32>
      tpu.vector_store %arg6[%c0_14, %c0_15], %15 {strides = array<i32>} : memref<32x16xf32, #tpu.memory_space<vmem>>, vector<32x16xf32>,
    } else {
    }
    return
  }
  func.func @transform_0(%arg0: i32, %arg1: i32, %arg2: i32) -> (i32, i32) {
    %c0_i32 = arith.constant 0 : i32
    return %arg0, %arg2 : i32, i32
  }
  func.func @transform_1(%arg0: i32, %arg1: i32, %arg2: i32) -> (i32, i32) {
    %c0_i32 = arith.constant 0 : i32
    return %arg2, %arg1 : i32, i32
  }
  func.func @transform_2(%arg0: i32, %arg1: i32, %arg2: i32) -> (i32, i32) {
    %c0_i32 = arith.constant 0 : i32
    %c0_i32_0 = arith.constant 0 : i32
    return %c0_i32, %arg1 : i32, i32
  }
  func.func @transform_3(%arg0: i32, %arg1: i32, %arg2: i32) -> (i32, i32) {
    %c0_i32 = arith.constant 0 : i32
    return %arg0, %arg1 : i32, i32
  }
}

module attributes {stable_mosaic.version = 11 : i64} {
  func.func @_conv_mask_res_ln_kernel(%arg0: i32, %arg1: memref<1x16x128xf32, #tpu.memory_space<vmem>>, %arg2: memref<1x16x1xf32, #tpu.memory_space<vmem>>, %arg3: memref<3x128x64xf32, #tpu.memory_space<vmem>>, %arg4: memref<1x64xf32, #tpu.memory_space<vmem>>, %arg5: memref<1x16x64xf32, #tpu.memory_space<vmem>>, %arg6: memref<1x64xf32, #tpu.memory_space<vmem>>, %arg7: memref<1x64xf32, #tpu.memory_space<vmem>>, %arg8: memref<1x16x64xf32, #tpu.memory_space<vmem>>) attributes {dimension_semantics = [#tpu.dimension_semantics<parallel>], iteration_bounds = array<i64: 2>, scalar_prefetch = 0 : i64, scratch_operands = 0 : i64, tpu.core_type = #tpu.core_type<tc>, window_params = [{transform_indices = @transform_0, window_bounds = array<i64: 1, 16, 128>}, {transform_indices = @transform_1, window_bounds = array<i64: 1, 16, 1>}, {pipeline_mode = #tpu.pipeline_mode<synchronous>, transform_indices = @transform_2, window_bounds = array<i64: 3, 128, 64>}, {pipeline_mode = #tpu.pipeline_mode<synchronous>, transform_indices = @transform_3, window_bounds = array<i64: 1, 64>}, {transform_indices = @transform_4, window_bounds = array<i64: 1, 16, 64>}, {pipeline_mode = #tpu.pipeline_mode<synchronous>, transform_indices = @transform_5, window_bounds = array<i64: 1, 64>}, {pipeline_mode = #tpu.pipeline_mode<synchronous>, transform_indices = @transform_6, window_bounds = array<i64: 1, 64>}, {transform_indices = @transform_7, window_bounds = array<i64: 1, 16, 64>}]} {
    %c0 = arith.constant 0 : index
    %c0_0 = arith.constant 0 : index
    %c0_1 = arith.constant 0 : index
    %0 = vector.load %arg1[%c0, %c0_0, %c0_1] : memref<1x16x128xf32, #tpu.memory_space<vmem>>, vector<1x16x128xf32>
    %1 = vector.shape_cast %0 : vector<1x16x128xf32> to vector<16x128xf32>
    %c0_2 = arith.constant 0 : index
    %c0_3 = arith.constant 0 : index
    %c0_4 = arith.constant 0 : index
    %2 = vector.load %arg2[%c0_2, %c0_3, %c0_4] : memref<1x16x1xf32, #tpu.memory_space<vmem>>, vector<1x16x1xf32>
    %3 = vector.shape_cast %2 : vector<1x16x1xf32> to vector<16x1xf32>
    %4 = vector.broadcast %3 : vector<16x1xf32> to vector<16x128xf32>
    %5 = arith.mulf %1, %4 : vector<16x128xf32>
    %6 = tpu.iota {dimensions = array<i32: 0>} : vector<16x1xi32>
    %c1_i32 = arith.constant 1 : i32
    %7 = tpu.dynamic_rotate %5 by %c1_i32 dim 0 : vector<16x128xf32>, i32 -> vector<16x128xf32>
    %c-1_i32 = arith.constant -1 : i32
    %8 = vector.broadcast %c-1_i32 : i32 to vector<16x1xi32>
    %9 = arith.addi %6, %8 : vector<16x1xi32>
    %c0_i32 = arith.constant 0 : i32
    %10 = vector.broadcast %c0_i32 : i32 to vector<16x1xi32>
    %11 = arith.cmpi sge, %9, %10 : vector<16x1xi32>
    %c-1_i32_5 = arith.constant -1 : i32
    %12 = vector.broadcast %c-1_i32_5 : i32 to vector<16x1xi32>
    %13 = arith.addi %6, %12 : vector<16x1xi32>
    %c16_i32 = arith.constant 16 : i32
    %14 = vector.broadcast %c16_i32 : i32 to vector<16x1xi32>
    %15 = arith.cmpi slt, %13, %14 : vector<16x1xi32>
    %16 = arith.andi %11, %15 : vector<16x1xi1>
    %cst = arith.constant 0.000000e+00 : f32
    %17 = vector.shape_cast %16 : vector<16x1xi1> to vector<16x1xi1>
    %18 = vector.broadcast %17 : vector<16x1xi1> to vector<16x128xi1>
    %19 = vector.broadcast %cst : f32 to vector<16x128xf32>
    %20 = arith.select %18, %7, %19 : vector<16x128xi1>, vector<16x128xf32>
    %c0_6 = arith.constant 0 : index
    %c0_7 = arith.constant 0 : index
    %c0_8 = arith.constant 0 : index
    %21 = vector.load %arg3[%c0_6, %c0_7, %c0_8] : memref<3x128x64xf32, #tpu.memory_space<vmem>>, vector<1x128x64xf32>
    %22 = vector.shape_cast %21 : vector<1x128x64xf32> to vector<128x64xf32>
    %cst_9 = arith.constant dense<0.000000e+00> : vector<16x64xf32>
    %23 = tpu.matmul %20, %22, %cst_9 {dimension_numbers = #tpu.dot_dimension_numbers<[1], [0], [0], [1], [0, 0, 1, 1], [], []>} : vector<16x128xf32>, vector<128x64xf32>, vector<16x64xf32> -> vector<16x64xf32>
    %c1 = arith.constant 1 : index
    %c0_10 = arith.constant 0 : index
    %c0_11 = arith.constant 0 : index
    %24 = vector.load %arg3[%c1, %c0_10, %c0_11] : memref<3x128x64xf32, #tpu.memory_space<vmem>>, vector<1x128x64xf32>
    %25 = vector.shape_cast %24 : vector<1x128x64xf32> to vector<128x64xf32>
    %cst_12 = arith.constant dense<0.000000e+00> : vector<16x64xf32>
    %26 = tpu.matmul %5, %25, %cst_12 {dimension_numbers = #tpu.dot_dimension_numbers<[1], [0], [0], [1], [0, 0, 1, 1], [], []>} : vector<16x128xf32>, vector<128x64xf32>, vector<16x64xf32> -> vector<16x64xf32>
    %27 = arith.addf %23, %26 : vector<16x64xf32>
    %c15_i32 = arith.constant 15 : i32
    %28 = tpu.dynamic_rotate %5 by %c15_i32 dim 0 : vector<16x128xf32>, i32 -> vector<16x128xf32>
    %c1_i32_13 = arith.constant 1 : i32
    %29 = vector.broadcast %c1_i32_13 : i32 to vector<16x1xi32>
    %30 = arith.addi %6, %29 : vector<16x1xi32>
    %c0_i32_14 = arith.constant 0 : i32
    %31 = vector.broadcast %c0_i32_14 : i32 to vector<16x1xi32>
    %32 = arith.cmpi sge, %30, %31 : vector<16x1xi32>
    %c1_i32_15 = arith.constant 1 : i32
    %33 = vector.broadcast %c1_i32_15 : i32 to vector<16x1xi32>
    %34 = arith.addi %6, %33 : vector<16x1xi32>
    %c16_i32_16 = arith.constant 16 : i32
    %35 = vector.broadcast %c16_i32_16 : i32 to vector<16x1xi32>
    %36 = arith.cmpi slt, %34, %35 : vector<16x1xi32>
    %37 = arith.andi %32, %36 : vector<16x1xi1>
    %cst_17 = arith.constant 0.000000e+00 : f32
    %38 = vector.shape_cast %37 : vector<16x1xi1> to vector<16x1xi1>
    %39 = vector.broadcast %38 : vector<16x1xi1> to vector<16x128xi1>
    %40 = vector.broadcast %cst_17 : f32 to vector<16x128xf32>
    %41 = arith.select %39, %28, %40 : vector<16x128xi1>, vector<16x128xf32>
    %c2 = arith.constant 2 : index
    %c0_18 = arith.constant 0 : index
    %c0_19 = arith.constant 0 : index
    %42 = vector.load %arg3[%c2, %c0_18, %c0_19] : memref<3x128x64xf32, #tpu.memory_space<vmem>>, vector<1x128x64xf32>
    %43 = vector.shape_cast %42 : vector<1x128x64xf32> to vector<128x64xf32>
    %cst_20 = arith.constant dense<0.000000e+00> : vector<16x64xf32>
    %44 = tpu.matmul %41, %43, %cst_20 {dimension_numbers = #tpu.dot_dimension_numbers<[1], [0], [0], [1], [0, 0, 1, 1], [], []>} : vector<16x128xf32>, vector<128x64xf32>, vector<16x64xf32> -> vector<16x64xf32>
    %45 = arith.addf %27, %44 : vector<16x64xf32>
    %c0_21 = arith.constant 0 : index
    %c0_22 = arith.constant 0 : index
    %46 = vector.load %arg4[%c0_21, %c0_22] : memref<1x64xf32, #tpu.memory_space<vmem>>, vector<1x64xf32>
    %47 = vector.broadcast %46 : vector<1x64xf32> to vector<16x64xf32>
    %48 = arith.addf %45, %47 : vector<16x64xf32>
    %c0_23 = arith.constant 0 : index
    %c0_24 = arith.constant 0 : index
    %c0_25 = arith.constant 0 : index
    %49 = vector.load %arg2[%c0_23, %c0_24, %c0_25] : memref<1x16x1xf32, #tpu.memory_space<vmem>>, vector<1x16x1xf32>
    %50 = vector.shape_cast %49 : vector<1x16x1xf32> to vector<16x1xf32>
    %51 = vector.broadcast %50 : vector<16x1xf32> to vector<16x64xf32>
    %52 = arith.mulf %48, %51 : vector<16x64xf32>
    %c0_26 = arith.constant 0 : index
    %c0_27 = arith.constant 0 : index
    %c0_28 = arith.constant 0 : index
    %53 = vector.load %arg5[%c0_26, %c0_27, %c0_28] : memref<1x16x64xf32, #tpu.memory_space<vmem>>, vector<1x16x64xf32>
    %54 = vector.shape_cast %53 : vector<1x16x64xf32> to vector<16x64xf32>
    %55 = arith.addf %54, %52 : vector<16x64xf32>
    %cst_29 = arith.constant dense<0.000000e+00> : vector<16xf32>
    %56 = vector.multi_reduction <add>, %55, %cst_29 [1] : vector<16x64xf32> to vector<16xf32>
    %57 = vector.shape_cast %56 : vector<16xf32> to vector<16x1xf32>
    %cst_30 = arith.constant 6.400000e+01 : f32
    %58 = vector.broadcast %cst_30 : f32 to vector<16x1xf32>
    %59 = arith.divf %57, %58 : vector<16x1xf32>
    %60 = vector.broadcast %59 : vector<16x1xf32> to vector<16x64xf32>
    %61 = arith.subf %55, %60 : vector<16x64xf32>
    %62 = arith.mulf %61, %61 : vector<16x64xf32>
    %cst_31 = arith.constant dense<0.000000e+00> : vector<16xf32>
    %63 = vector.multi_reduction <add>, %62, %cst_31 [1] : vector<16x64xf32> to vector<16xf32>
    %64 = vector.shape_cast %63 : vector<16xf32> to vector<16x1xf32>
    %cst_32 = arith.constant 6.400000e+01 : f32
    %65 = vector.broadcast %cst_32 : f32 to vector<16x1xf32>
    %66 = arith.divf %64, %65 : vector<16x1xf32>
    %67 = vector.broadcast %59 : vector<16x1xf32> to vector<16x64xf32>
    %68 = arith.subf %55, %67 : vector<16x64xf32>
    %cst_33 = arith.constant 9.99999974E-6 : f32
    %69 = vector.broadcast %cst_33 : f32 to vector<16x1xf32>
    %70 = arith.addf %66, %69 : vector<16x1xf32>
    %71 = math.rsqrt %70 : vector<16x1xf32>
    %72 = vector.broadcast %71 : vector<16x1xf32> to vector<16x64xf32>
    %73 = arith.mulf %68, %72 : vector<16x64xf32>
    %c0_34 = arith.constant 0 : index
    %c0_35 = arith.constant 0 : index
    %74 = vector.load %arg6[%c0_34, %c0_35] : memref<1x64xf32, #tpu.memory_space<vmem>>, vector<1x64xf32>
    %75 = vector.broadcast %74 : vector<1x64xf32> to vector<16x64xf32>
    %76 = arith.mulf %73, %75 : vector<16x64xf32>
    %c0_36 = arith.constant 0 : index
    %c0_37 = arith.constant 0 : index
    %77 = vector.load %arg7[%c0_36, %c0_37] : memref<1x64xf32, #tpu.memory_space<vmem>>, vector<1x64xf32>
    %78 = vector.broadcast %77 : vector<1x64xf32> to vector<16x64xf32>
    %79 = arith.addf %76, %78 : vector<16x64xf32>
    %c0_38 = arith.constant 0 : index
    %c0_39 = arith.constant 0 : index
    %c0_40 = arith.constant 0 : index
    %80 = vector.load %arg8[%c0_38, %c0_39, %c0_40] : memref<1x16x64xf32, #tpu.memory_space<vmem>>, vector<1x16x64xf32>
    %81 = vector.shape_cast %80 : vector<1x16x64xf32> to vector<16x64xf32>
    %82 = vector.shape_cast %79 : vector<16x64xf32> to vector<1x16x64xf32>
    tpu.vector_store %arg8[%c0_38, %c0_39, %c0_40], %82 {strides = array<i32>} : memref<1x16x64xf32, #tpu.memory_space<vmem>>, vector<1x16x64xf32>,
    return
  }
  func.func @transform_0(%arg0: i32) -> (i32, i32, i32) {
    %c0_i32 = arith.constant 0 : i32
    %c0_i32_0 = arith.constant 0 : i32
    %c0_i32_1 = arith.constant 0 : i32
    return %arg0, %c0_i32, %c0_i32_0 : i32, i32, i32
  }
  func.func @transform_1(%arg0: i32) -> (i32, i32, i32) {
    %c0_i32 = arith.constant 0 : i32
    %c0_i32_0 = arith.constant 0 : i32
    %c0_i32_1 = arith.constant 0 : i32
    return %arg0, %c0_i32, %c0_i32_0 : i32, i32, i32
  }
  func.func @transform_2(%arg0: i32) -> (i32, i32, i32) {
    %c0_i32 = arith.constant 0 : i32
    %c0_i32_0 = arith.constant 0 : i32
    %c0_i32_1 = arith.constant 0 : i32
    %c0_i32_2 = arith.constant 0 : i32
    return %c0_i32, %c0_i32_0, %c0_i32_1 : i32, i32, i32
  }
  func.func @transform_3(%arg0: i32) -> (i32, i32) {
    %c0_i32 = arith.constant 0 : i32
    %c0_i32_0 = arith.constant 0 : i32
    %c0_i32_1 = arith.constant 0 : i32
    return %c0_i32, %c0_i32_0 : i32, i32
  }
  func.func @transform_4(%arg0: i32) -> (i32, i32, i32) {
    %c0_i32 = arith.constant 0 : i32
    %c0_i32_0 = arith.constant 0 : i32
    %c0_i32_1 = arith.constant 0 : i32
    return %arg0, %c0_i32, %c0_i32_0 : i32, i32, i32
  }
  func.func @transform_5(%arg0: i32) -> (i32, i32) {
    %c0_i32 = arith.constant 0 : i32
    %c0_i32_0 = arith.constant 0 : i32
    %c0_i32_1 = arith.constant 0 : i32
    return %c0_i32, %c0_i32_0 : i32, i32
  }
  func.func @transform_6(%arg0: i32) -> (i32, i32) {
    %c0_i32 = arith.constant 0 : i32
    %c0_i32_0 = arith.constant 0 : i32
    %c0_i32_1 = arith.constant 0 : i32
    return %c0_i32, %c0_i32_0 : i32, i32
  }
  func.func @transform_7(%arg0: i32) -> (i32, i32, i32) {
    %c0_i32 = arith.constant 0 : i32
    %c0_i32_0 = arith.constant 0 : i32
    %c0_i32_1 = arith.constant 0 : i32
    return %arg0, %c0_i32, %c0_i32_0 : i32, i32, i32
  }
}

</mosaic_0001>

<bundles_post_ra>
// kernel: text_encoder_forward.14
= control target key start
LH: loop header
LB: loop body
LE: loop exit
PB: predicated region body
PF: predicated region fallthrough
CT: control target
= control target key end

     0   :  { %s797_s15 = smov 0   ;;  %s907_s0 = inlined_call_operand.vmem [shape: f32[2,16,64], index: 0, kind: input, shape index: {}]   ;;  %s908_s1 = inlined_call_operand.vmem [shape: f32[2,16,1], index: 1, kind: input, shape index: {}]   ;;  %s909_s2 = inlined_call_operand.vmem [shape: f32[3,64,128], index: 2, kind: input, shape index: {}]   ;;  %s910_s3 = inlined_call_operand.vmem [shape: f32[1,128], index: 3, kind: input, shape index: {}]   ;;  %s911_s4 = inlined_call_operand.vmem [shape: f32[2,16,128], index: 4, kind: output, shape index: {}]  }
   0x1 LB: > { %s627_s16 = sadd.s32 4294967295, %s769_s15   ;;  %p631_p0 = scmp.ge.s32.totalorder %s769_s15, 1  ;;  %s769_s15 = sphi %s797_s15, %s14_s15  }
   0x2   : > { %p172_p1 = scmp.lt.s32.totalorder %s769_s15, 3 }
   0x4   : > { %p173_p2 = pnand %p631_p0, %p172_p1 }
   0x5   : > { %p203_p3 = scmp.lt.s32.totalorder (!%p173_p2), %s627_s16, 1 }
   0x6   : > { %176 = sbr.rel (%p173_p2) target bundleno = 366 (0x16e), region = 36 }
   0xb   : > { %v645_v0 = vld [vmem:[%s909_s2 + $0x78] sm:$0xff]  ;;  %v644_v1 = vld [vmem:[%s909_s2 + $0x70] sm:$0xff]  ;;  %v771_v2 = vmov 0   ;;  %s913_s16 = smov (!%p203_p3, %s627_s16), 1  ;;  %v643_v4 = vld [vmem:[%s909_s2 + $0x68] sm:$0xff]  ;;  %v234_v20 = vlaneseq  ;;  %vm273_vm0 = vcmask 523264  }
   0xc   : > { %762 = vset.pattern.permute.xlu0 %v771_v2  ;;  %696 = vmatprep.subr.mxu0 %v645_v0  ;;  %v263_v3 = vld [vmem:[%s909_s2 + $0x38] sm:$0xff]  ;;  %v262_v5 = vld [vmem:[%s909_s2 + $0x30] sm:$0xff]  ;;  %v261_v6 = vld [vmem:[%s909_s2 + $0x28] sm:$0xff]  ;;  %s823_s29 = sshll.u32 %s913_s16, 4 }
   0xd   : > { %697 = vmatpush3.msra.mxu0 %v645_v0  ;;  %715 = vmatprep.subr.mxu1 %v263_v3  ;;  %v642_v7 = vld [vmem:[%s909_s2 + $0x60] sm:$0xff]  ;;  %s212_s8 = scalar_lea.vmem %s908_s1, %s823_s29  ;;  %v641_v9 = vld [vmem:[%s909_s2 + $0x58] sm:$0xff]  ;;  %v640_v12 = vld [vmem:[%s909_s2 + $0x50] sm:$0xff]  ;;  %s207_s7 = scalar_lea.vmem %s907_s0, %s823_s29  ;;  %v235_v23 = vshrl.u32 %v234_v20, 7 }
   0xe   : > { %698 = vmatprep.subr.mxu0 %v644_v1  ;;  %716 = vmatpush3.msra.mxu1 %v263_v3  ;;  %v220_v8 = vld [vmem:[%s212_s8] sm:$0xff]  ;;  %v221_v11 = vld [vmem:[%s212_s8 + $0x8] sm:$0xff]  ;;  %v259_v13 = vld [vmem:[%s909_s2 + $0x18] sm:$0xff]  ;;  %s217_s27 = scalar_lea.vmem %s911_s4, %s823_s29 }
   0xf   : > { %699 = vmatpush3.msra.mxu0 %v644_v1  ;;  %717 = vmatprep.subr.mxu1 %v262_v5  ;;  %v260_v10 = vld [vmem:[%s909_s2 + $0x20] sm:$0xff]  ;;  %v639_v14 = vld [vmem:[%s909_s2 + $0x48] sm:$0xff]  ;;  %v258_v15 = vld [vmem:[%s909_s2 + $0x10] sm:$0xff]  ;;  %v242_v26 = vadd.s32 4294967295, %v235_v23  ;;  %vm438_vm1 = vcmp.lt.s32.totalorder %v235_v23, 7  ;;  %vm239_vm2 = vcmp.lt.s32.totalorder %v235_v23, 1 }
  0x10   : > { %700 = vmatprep.subr.mxu0 %v643_v4  ;;  %718 = vmatpush3.msra.mxu1 %v262_v5  ;;  %v638_v16 = vld [vmem:[%s909_s2 + $0x40] sm:$0xff]  ;;  %v257_v17 = vld [vmem:[%s909_s2 + $0x8] sm:$0xff]  ;;  %v657_v18 = vld [vmem:[%s909_s2 + $0xb8] sm:$0xff]  ;;  %v236_v40 = vadd.s32 8, %v235_v23 }
  0x11   : > { %701 = vmatpush3.msra.mxu0 %v643_v4  ;;  %719 = vmatprep.subr.mxu1 %v261_v6  ;;  %v256_v19 = vld [vmem:[%s909_s2] sm:$0xff]  ;;  %v219_v25 = vld [vmem:[%s207_s7 + $0x8] sm:$0xff]  ;;  %v656_v29 = vld [vmem:[%s909_s2 + $0xb0] sm:$0xff]  ;;  %vm244_vm3 = vcmp.ge.s32.totalorder %v242_v26, 0 }
  0x12   : > { %224 = vperm.xlu0 %762, %v220_v8   ;;  %702 = vmatprep.subr.mxu0 %v642_v7  ;;  %v218_v21 = vld [vmem:[%s207_s7] sm:$0xff]  ;;  %v655_v34 = vld [vmem:[%s909_s2 + $0xa8] sm:$0xff]  ;;  %v653_v41 = vld [vmem:[%s909_s2 + $0x98] sm:$0xff]  ;;  %v442_v43 = vadd.s32 1, %v236_v40 }
  0x13   : > { %703 = vmatpush3.msra.mxu0 %v642_v7  ;;  %720 = vmatpush3.msra.mxu1 %v261_v6  ;;  %v654_v38 = vld [vmem:[%s909_s2 + $0xa0] sm:$0xff]  ;;  %v652_v42 = vld [vmem:[%s909_s2 + $0x90] sm:$0xff]  ;;  %v651_v44 = vld [vmem:[%s909_s2 + $0x88] sm:$0xff] }
  0x14   : > { %704 = vmatprep.subr.mxu0 %v641_v9  ;;  %721 = vmatprep.subr.mxu1 %v260_v10  ;;  %v650_v45 = vld [vmem:[%s909_s2 + $0x80] sm:$0xff]  ;;  %vm446_vm4 = vcmp.lt.s32.totalorder %v442_v43, 16 }
  0x15   : > { %705 = vmatpush3.msra.mxu0 %v641_v9  ;;  %722 = vmatpush3.msra.mxu1 %v260_v10  ;;  %v660_v54 = vld [vmem:[%s910_s3] ss:$0 sm:$0xff] }
  0x16   : > { %229 = vperm.xlu0 %762, %v221_v11   ;;  %706 = vmatprep.subr.mxu0 %v640_v12 }
  0x17   : > { %707 = vmatpush3.msra.mxu0 %v640_v12  ;;  %723 = vmatprep.subr.mxu1 %v259_v13 }
  0x18   : > { %708 = vmatprep.subr.mxu0 %v639_v14  ;;  %724 = vmatpush3.msra.mxu1 %v259_v13 }
  0x19   : > { %709 = vmatpush3.msra.mxu0 %v639_v14  ;;  %725 = vmatprep.subr.mxu1 %v258_v15 }
  0x1a   : > { %710 = vmatprep.subr.mxu0 %v638_v16  ;;  %726 = vmatpush3.msra.mxu1 %v258_v15 }
  0x1b   : > { %711 = vmatpush3.msra.mxu0 %v638_v16  ;;  %727 = vmatprep.subr.mxu1 %v257_v17 }
  0x1c   : > { %734 = vmatprep.subr.mxu0 %v657_v18  ;;  %728 = vmatpush3.msra.mxu1 %v257_v17 }
  0x1d   : > { %729 = vmatprep.subr.mxu1 %v256_v19 }
  0x1e   : > { %730 = vmatpush3.msra.mxu1 %v256_v19 }
  0x8d   : > { %v225_v22 = vpop.permute.xlu0 %224 }
  0x8e   : > { %v232_v24 = vmul.f32 %v225_v22, %v218_v21 }
  0x90   : > { %712 = vmatprep.mubr.msk.f32.mxu0 %vm273_vm0, %v232_v24  ;;  %v237_v30 = vrot.slane %v232_v24, 7  ;;  %v436_v31 = vrot.slane %v232_v24, 1 }
  0x91   : > { %v230_v27 = vpop.permute.xlu0 %229 }
  0x92   : > { %v233_v28 = vmul.f32 %v230_v27, %v219_v25 }
  0x94   : > { %v238_v32 = vrot.slane %v233_v28, 7  ;;  %v437_v33 = vrot.slane %v233_v28, 1  ;;  %713 = vmatmul.mubr.msk.f32.vlgmr.msra.gmra.mxu0 %vm273_vm0, %v233_v28 }
  0x95   : > { %735 = vmatpush3.msra.mxu0 %v657_v18 }
  0x96   : > { %736 = vmatprep.subr.mxu0 %v656_v29  ;;  %v439_v35 = vsel %vm438_vm1, %v436_v31, %v437_v33  ;;  %v241_v36 = vsel %vm239_vm2, %v238_v32, %v237_v30  ;;  %v240_v39 = vsel %vm239_vm2, %v237_v30, %v238_v32  ;;  %v440_v46 = vsel %vm438_vm1, %v437_v33, %v436_v31 }
  0x97   : > { %737 = vmatpush3.msra.mxu0 %v656_v29  ;;  %750 = vmatprep.mubr.msk.f32.mxu0 %vm273_vm0, %v439_v35  ;;  %v254_v37 = vsel %vm244_vm3, %v241_v36, 0.0  ;;  %v454_v47 = vsel %vm446_vm4, %v440_v46, 0.0 }
  0x98   : > { %738 = vmatprep.subr.mxu0 %v655_v34  ;;  %731 = vmatprep.mubr.msk.f32.mxu1 %vm273_vm0, %v254_v37 }
  0x99   : > { %739 = vmatpush3.msra.mxu0 %v655_v34  ;;  %732 = vmatmul.mubr.msk.f32.vlgmr.msra.gmra.mxu1 %vm273_vm0, %v240_v39 }
  0x9a   : > { %740 = vmatprep.subr.mxu0 %v654_v38 }
  0x9b   : > { %741 = vmatpush3.msra.mxu0 %v654_v38 }
  0x9c   : > { %742 = vmatprep.subr.mxu0 %v653_v41 }
  0x9d   : > { %743 = vmatpush3.msra.mxu0 %v653_v41 }
  0x9e   : > { %744 = vmatprep.subr.mxu0 %v652_v42 }
  0x9f   : > { %745 = vmatpush3.msra.mxu0 %v652_v42 }
  0xa0   : > { %746 = vmatprep.subr.mxu0 %v651_v44 }
  0xa1   : > { %747 = vmatpush3.msra.mxu0 %v651_v44 }
  0xa2   : > { %748 = vmatprep.subr.mxu0 %v650_v45 }
  0xa3   : > { %749 = vmatpush3.msra.mxu0 %v650_v45 }
  0xa4   : > { %751 = vmatmul.mubr.msk.f32.vlgmr.msra.gmra.mxu0 %vm273_vm0, %v454_v47 }
 0x154   : > { %v714_v48 = vpop.f32.mrf.mxu0 }
 0x156   : > { %v346_v50 = vpop.f32.mrf.mxu0 }
 0x159   : > { %v733_v49 = vpop.f32.mrf.mxu1 }
 0x15a   : > { %v433_v52 = vadd.f32 %v733_v49, %v714_v48 }
 0x15b   : > { %v427_v51 = vpop.f32.mrf.mxu1 }
 0x15c   : > { %v428_v55 = vadd.f32 %v427_v51, %v346_v50 }
 0x164   : > { %v752_v53 = vpop.f32.mrf.mxu0 }
 0x165   : > { %v546_v56 = vadd.f32 %v752_v53, %v433_v52 }
 0x166   : > { %v536_v57 = vpop.f32.mrf.mxu0 }
 0x167   : > { %v555_v58 = vadd.f32 %v660_v54, %v546_v56  ;;  %v545_v59 = vadd.f32 %v536_v57, %v428_v55 }
 0x169   : > { %v557_v60 = vmax.f32 %v555_v58, 0.0  ;;  %v554_v61 = vadd.f32 %v660_v54, %v545_v59 }
 0x16b   : > { %559 = vst [vmem:[%s217_s27 + $0x8] sm:$0xff] %v557_v60  ;;  %v556_v62 = vmax.f32 %v554_v61, 0.0 }
 0x16d   : > { %558 = vst [vmem:[%s217_s27] sm:$0xff] %v556_v62 }
 0x16e PF: > { %s14_s15 = sadd.s32 1, %s769_s15  }
 0x16f   : > { %p11_p4 = scmp.ge.s32.totalorder %s14_s15, 4  }
 0x171   :  { %13 = sbr.rel (!%p11_p4) target bundleno = 1 (0x1), region = 71 }

// kernel: text_encoder_forward.11
= control target key start
LH: loop header
LB: loop body
LE: loop exit
PB: predicated region body
PF: predicated region fallthrough
CT: control target
= control target key end

     0   :  { %vm19_vm0 = vcmask 523264   ;;  %v237_v3 = vmov 0.0   ;;  %v186_v21 = vlaneseq  ;;  %s361_s1 = inlined_call_operand.vmem [shape: f32[64,192], index: 1, kind: input, shape index: {}]   ;;  %s362_s0 = inlined_call_operand.vmem [shape: f32[32,64], index: 0, kind: input, shape index: {}]   ;;  %s363_s2 = inlined_call_operand.vmem [shape: f32[1,192], index: 2, kind: input, shape index: {}]   ;;  %s364_s3 = inlined_call_operand.vmem [shape: f32[32,192], index: 3, kind: output, shape index: {}]  }
   0x1   :  { %v54_v0 = vld [vmem:[%s361_s1 + $0x78] sm:$0xff]  ;;  %v53_v1 = vld [vmem:[%s361_s1 + $0x70] sm:$0xff]  ;;  %v52_v2 = vld [vmem:[%s361_s1 + $0x68] sm:$0xff]  ;;  %132 = vmatprep.mubr.f32.mxu0 %v237_v3  ;;  %144 = vmatprep.mubr.f32.mxu1 %v237_v3  ;;  %20 = vst.msk [vmem:[#allocation2 + $0x8] sm:$0xff] %vm19_vm0, %v237_v3 }
   0x2   :  { %22 = vst.msk [vmem:[#allocation2 + $0x18] sm:$0xff] %vm19_vm0, %v237_v3  ;;  %24 = vst.msk [vmem:[#allocation2 + $0x28] sm:$0xff] %vm19_vm0, %v237_v3  ;;  %84 = vmatprep.subr.mxu0 %v54_v0  ;;  %220 = vmatprep.subr.mxu1 %v54_v0  ;;  %v51_v4 = vld [vmem:[%s361_s1 + $0x60] sm:$0xff]  ;;  %v50_v5 = vld [vmem:[%s361_s1 + $0x58] sm:$0xff]  ;;  %v187_v22 = vshrl.u32 %v186_v21, 7 }
   0x3   :  { %26 = vst.msk [vmem:[#allocation2 + $0x38] sm:$0xff] %vm19_vm0, %v237_v3  ;;  %85 = vmatpush1.msra.mxu0 %v53_v1  ;;  %228 = vmatpush1.msra.mxu1 %v53_v1  ;;  %v49_v6 = vld [vmem:[%s361_s1 + $0x50] sm:$0xff]  ;;  %v48_v7 = vld [vmem:[%s361_s1 + $0x48] sm:$0xff]  ;;  %v47_v8 = vld [vmem:[%s361_s1 + $0x40] sm:$0xff] }
   0x4   :  { %86 = vmatprep.subr.mxu0 %v52_v2  ;;  %221 = vmatprep.subr.mxu1 %v52_v2  ;;  %v46_v9 = vld [vmem:[%s361_s1 + $0x38] sm:$0xff]  ;;  %v45_v10 = vld [vmem:[%s361_s1 + $0x30] sm:$0xff]  ;;  %v44_v11 = vld [vmem:[%s361_s1 + $0x28] sm:$0xff]  ;;  %v188_v23 = vsub.s32 0, %v187_v22  ;;  %v192_v40 = vsub.s32 1, %v187_v22 }
   0x5   :  { %87 = vmatpush1.msra.mxu0 %v51_v4  ;;  %229 = vmatpush1.msra.mxu1 %v51_v4  ;;  %v43_v12 = vld [vmem:[%s361_s1 + $0x20] sm:$0xff]  ;;  %v42_v13 = vld [vmem:[%s361_s1 + $0x18] sm:$0xff]  ;;  %v41_v14 = vld [vmem:[%s361_s1 + $0x10] sm:$0xff] }
   0x6   :  { %88 = vmatprep.subr.mxu0 %v50_v5  ;;  %222 = vmatprep.subr.mxu1 %v50_v5  ;;  %v40_v15 = vld [vmem:[%s361_s1 + $0x8] sm:$0xff]  ;;  %v39_v16 = vld [vmem:[%s361_s1] sm:$0xff]  ;;  %v37_v18 = vld [vmem:[%s362_s0 + $0x10] sm:$0xff] }
   0x7   :  { %89 = vmatpush1.msra.mxu0 %v49_v6  ;;  %230 = vmatpush1.msra.mxu1 %v49_v6  ;;  %v35_v17 = vld [vmem:[%s362_s0] sm:$0xff]  ;;  %v36_v19 = vld [vmem:[%s362_s0 + $0x8] sm:$0xff]  ;;  %v38_v20 = vld [vmem:[%s362_s0 + $0x18] sm:$0xff] }
   0x8   :  { %90 = vmatprep.subr.mxu0 %v48_v7  ;;  %223 = vmatprep.subr.mxu1 %v48_v7  ;;  %v184_v24 = vld [vmem:[%s363_s2] sm:$0x3]  ;;  %v28_v28 = vld [vmem:[#allocation2 + $0x8] sm:$0xff] }
   0x9   :  { %91 = vmatpush1.msra.mxu0 %v47_v8  ;;  %231 = vmatpush1.msra.mxu1 %v47_v8  ;;  %v189_v25 = vrot.slane %v184_v24, %v188_v23  ;;  %v32_v29 = vld [vmem:[#allocation2 + $0x28] sm:$0xff]  ;;  %v30_v38 = vld [vmem:[#allocation2 + $0x18] sm:$0xff]  ;;  %v193_v47 = vrot.slane %v184_v24, %v192_v40 }
   0xa   :  { %92 = vmatprep.subr.mxu0 %v46_v9  ;;  %224 = vmatprep.subr.mxu1 %v46_v9  ;;  %v34_v39 = vld [vmem:[#allocation2 + $0x38] sm:$0xff] }
   0xb   :  { %93 = vmatpush1.msra.mxu0 %v45_v10  ;;  %232 = vmatpush1.msra.mxu1 %v45_v10 }
   0xc   :  { %94 = vmatprep.subr.mxu0 %v44_v11  ;;  %225 = vmatprep.subr.mxu1 %v44_v11 }
   0xd   :  { %95 = vmatpush1.msra.mxu0 %v43_v12  ;;  %233 = vmatpush1.msra.mxu1 %v43_v12 }
   0xe   :  { %96 = vmatprep.subr.mxu0 %v42_v13  ;;  %226 = vmatprep.subr.mxu1 %v42_v13 }
   0xf   :  { %97 = vmatpush1.msra.mxu0 %v41_v14  ;;  %234 = vmatpush1.msra.mxu1 %v41_v14 }
  0x10   :  { %98 = vmatprep.subr.mxu0 %v40_v15  ;;  %227 = vmatprep.subr.mxu1 %v40_v15 }
  0x11   :  { %99 = vmatpush1.msra.mxu0 %v39_v16  ;;  %235 = vmatpush1.msra.mxu1 %v39_v16 }
  0x12   :  { %216 = vmatmul.mubr.msk.f32.vlgmr.msra.gmra.mxu0 %vm19_vm0, %v35_v17  ;;  %218 = vmatmul.mubr.msk.f32.vlgmr.msra.gmra.mxu1 %vm19_vm0, %v37_v18 }
  0x13   :  { %138 = vmatprep.mubr.f32.mxu0 %v237_v3  ;;  %150 = vmatprep.mubr.f32.mxu1 %v237_v3 }
  0x16   :  { %217 = vmatmul.mubr.msk.f32.gmra.mxu0 %vm19_vm0, %v36_v19  ;;  %219 = vmatmul.mubr.msk.f32.gmra.mxu1 %vm19_vm0, %v38_v20 }
  0xd2   :  { %v134_v26 = vpop.f32.mrf.mxu0  ;;  %v146_v27 = vpop.f32.mrf.mxu1 }
  0xd3   :  { %v196_v32 = vadd.f32 %v189_v25, %v134_v26  ;;  %v200_v33 = vadd.f32 %v189_v25, %v146_v27 }
  0xd4   :  { %v136_v30 = vpop.f32.mrf.mxu0  ;;  %v148_v31 = vpop.f32.mrf.mxu1 }
  0xd5   :  { %v158_v34 = vadd.f32 %v136_v30, %v28_v28  ;;  %v162_v35 = vadd.f32 %v148_v31, %v32_v29  ;;  %204 = vst [vmem:[%s364_s3] sm:$0xff] %v196_v32  ;;  %208 = vst [vmem:[%s364_s3 + $0x20] sm:$0xff] %v200_v33 }
  0xd6   :  { %v140_v36 = vpop.f32.mrf.mxu0  ;;  %v152_v37 = vpop.f32.mrf.mxu1 }
  0xd7   :  { %166 = vst.msk [vmem:[#allocation2 + $0x8] sm:$0xff] %vm19_vm0, %v158_v34  ;;  %170 = vst.msk [vmem:[#allocation2 + $0x28] sm:$0xff] %vm19_vm0, %v162_v35  ;;  %v198_v43 = vadd.f32 %v189_v25, %v140_v36  ;;  %v202_v44 = vadd.f32 %v189_v25, %v152_v37 }
  0xd8   :  { %v142_v41 = vpop.f32.mrf.mxu0  ;;  %v154_v42 = vpop.f32.mrf.mxu1 }
  0xd9   :  { %v160_v45 = vadd.f32 %v142_v41, %v30_v38  ;;  %v164_v46 = vadd.f32 %v154_v42, %v34_v39  ;;  %206 = vst [vmem:[%s364_s3 + $0x10] sm:$0xff] %v198_v43  ;;  %210 = vst [vmem:[%s364_s3 + $0x30] sm:$0xff] %v202_v44 }
  0xdb   :  { %168 = vst.msk [vmem:[#allocation2 + $0x18] sm:$0xff] %vm19_vm0, %v160_v45  ;;  %172 = vst.msk [vmem:[#allocation2 + $0x38] sm:$0xff] %vm19_vm0, %v164_v46 }
  0xde   :  { %v177_v48 = vld [vmem:[#allocation2 + $0x8] sm:$0xff] }
  0xdf   :  { %v181_v49 = vld [vmem:[#allocation2 + $0x28] sm:$0xff]  ;;  %v197_v50 = vadd.f32 %v193_v47, %v177_v48 }
  0xe0   :  { %v201_v51 = vadd.f32 %v193_v47, %v181_v49 }
  0xe1   :  { %205 = vst.msk [vmem:[%s364_s3 + $0x8] sm:$0xff] %vm19_vm0, %v197_v50 }
  0xe2   :  { %209 = vst.msk [vmem:[%s364_s3 + $0x28] sm:$0xff] %vm19_vm0, %v201_v51  ;;  %v179_v52 = vld [vmem:[#allocation2 + $0x18] sm:$0xff] }
  0xe3   :  { %v183_v53 = vld [vmem:[#allocation2 + $0x38] sm:$0xff]  ;;  %v199_v54 = vadd.f32 %v193_v47, %v179_v52 }
  0xe4   :  { %v203_v55 = vadd.f32 %v193_v47, %v183_v53 }
  0xe5   :  { %207 = vst.msk [vmem:[%s364_s3 + $0x18] sm:$0xff] %vm19_vm0, %v199_v54 }
  0xe6   :  { %211 = vst.msk [vmem:[%s364_s3 + $0x38] sm:$0xff] %vm19_vm0, %v203_v55 }

// kernel: text_encoder_forward.13
= control target key start
LH: loop header
LB: loop body
LE: loop exit
PB: predicated region body
PF: predicated region fallthrough
CT: control target
= control target key end

     0   :  { %s594_s21 = smov 0   ;;  %s660_s0 = inlined_call_operand.vmem [shape: f32[2,16,64], index: 0, kind: input, shape index: {}]   ;;  %s661_s1 = inlined_call_operand.vmem [shape: f32[64,64], index: 1, kind: input, shape index: {}]   ;;  %s662_s2 = inlined_call_operand.vmem [shape: f32[1,64], index: 2, kind: input, shape index: {}]   ;;  %s663_s3 = inlined_call_operand.vmem [shape: f32[2,16,64], index: 3, kind: input, shape index: {}]   ;;  %s664_s4 = inlined_call_operand.vmem [shape: f32[1,64], index: 4, kind: input, shape index: {}]   ;;  %s665_s5 = inlined_call_operand.vmem [shape: f32[1,64], index: 5, kind: input, shape index: {}]   ;;  %s666_s6 = inlined_call_operand.vmem [shape: f32[2,16,64], index: 6, kind: output, shape index: {}]  }
   0x1 LB: > { %s489_s22 = sadd.s32 4294967295, %s557_s21   ;;  %p493_p0 = scmp.ge.s32.totalorder %s557_s21, 1  ;;  %s557_s21 = sphi %s594_s21, %s16_s21  }
   0x2   : > { %p222_p1 = scmp.lt.s32.totalorder %s557_s21, 3 }
   0x4   : > { %p223_p2 = pnand %p493_p0, %p222_p1 }
   0x5   : > { %p257_p3 = scmp.lt.s32.totalorder (!%p223_p2), %s489_s22, 1 }
   0x6   : > { %226 = sbr.rel (%p223_p2) target bundleno = 540 (0x21c), region = 44 }
   0xb   : > { %v281_v0 = vld [vmem:[%s661_s1 + $0x38] sm:$0xff]  ;;  %v280_v1 = vld [vmem:[%s661_s1 + $0x30] sm:$0xff]  ;;  %v279_v2 = vld [vmem:[%s661_s1 + $0x28] sm:$0xff]  ;;  %s668_s22 = smov (!%p257_p3, %s489_s22), 1  ;;  %vm289_vm0 = vcmask 523264  }
   0xc   : > { %520 = vmatprep.subr.mxu0 %v281_v0  ;;  %v278_v3 = vld [vmem:[%s661_s1 + $0x20] sm:$0xff]  ;;  %s614_s7 = sshll.u32 %s668_s22, 4  ;;  %v277_v4 = vld [vmem:[%s661_s1 + $0x18] sm:$0xff]  ;;  %v276_v6 = vld [vmem:[%s661_s1 + $0x10] sm:$0xff] }
   0xd   : > { %521 = vmatpush3.msra.mxu0 %v281_v0  ;;  %s261_s10 = scalar_lea.vmem %s660_s0, %s614_s7  ;;  %v275_v7 = vld [vmem:[%s661_s1 + $0x8] sm:$0xff]  ;;  %v274_v8 = vld [vmem:[%s661_s1] sm:$0xff]  ;;  %s266_s24 = scalar_lea.vmem %s663_s3, %s614_s7 }
   0xe   : > { %522 = vmatprep.subr.mxu0 %v280_v1  ;;  %v272_v5 = vld [vmem:[%s261_s10] sm:$0xff]  ;;  %v273_v9 = vld [vmem:[%s261_s10 + $0x8] sm:$0xff]  ;;  %s271_s8 = scalar_lea.vmem %s666_s6, %s614_s7 }
   0xf   : > { %523 = vmatpush3.msra.mxu0 %v280_v1  ;;  %536 = vmatprep.mubr.msk.f32.mxu0 %vm289_vm0, %v272_v5  ;;  %v500_v11 = vld [vmem:[%s662_s2] ss:$0 sm:$0xff]  ;;  %v372_v16 = vld [vmem:[%s266_s24 + $0x8] sm:$0xff] }
  0x10   : > { %524 = vmatprep.subr.mxu0 %v279_v2  ;;  %v371_v13 = vld [vmem:[%s266_s24] sm:$0xff] }
  0x11   : > { %525 = vmatpush3.msra.mxu0 %v279_v2  ;;  %v503_v38 = vld [vmem:[%s664_s4] ss:$0 sm:$0xff] }
  0x12   : > { %526 = vmatprep.subr.mxu0 %v278_v3  ;;  %v504_v40 = vld [vmem:[%s665_s5] ss:$0 sm:$0xff] }
  0x13   : > { %527 = vmatpush3.msra.mxu0 %v278_v3 }
  0x14   : > { %528 = vmatprep.subr.mxu0 %v277_v4 }
  0x15   : > { %529 = vmatpush3.msra.mxu0 %v277_v4 }
  0x16   : > { %530 = vmatprep.subr.mxu0 %v276_v6 }
  0x17   : > { %531 = vmatpush3.msra.mxu0 %v276_v6 }
  0x18   : > { %532 = vmatprep.subr.mxu0 %v275_v7 }
  0x19   : > { %533 = vmatpush3.msra.mxu0 %v275_v7 }
  0x1a   : > { %534 = vmatprep.subr.mxu0 %v274_v8 }
  0x1b   : > { %535 = vmatpush3.msra.mxu0 %v274_v8 }
  0x1c   : > { %537 = vmatmul.mubr.msk.f32.vlgmr.msra.gmra.mxu0 %vm289_vm0, %v273_v9 }
  0xdc   : > { %v538_v10 = vpop.f32.mrf.mxu0 }
  0xdd   : > { %v368_v14 = vadd.f32 %v538_v10, %v500_v11 }
  0xde   : > { %v362_v12 = vpop.f32.mrf.mxu0 }
  0xdf   : > { %v363_v15 = vadd.f32 %v500_v11, %v362_v12  ;;  %v374_v19 = vadd.f32 %v372_v16, %v368_v14 }
  0xe1   : > { %v373_v17 = vadd.f32 %v371_v13, %v363_v15  ;;  %v378_v20 = vsel %vm289_vm0, %v374_v19, 0.0 }
  0xe3   : > { %v375_v18 = vsel %vm289_vm0, %v373_v17, 0.0 }
  0xe4   : > { %376 = vadd.xlane.f32.xlu0 %v375_v18 }
  0xe8   : > { %379 = vadd.xlane.f32.xlu0 %v378_v20 }
 0x16d   : > { %v377_v21 = vpop.xlane.xlu0 %376 }
 0x16e   : > { %v382_v22 = vmul.f32 0.015625, %v377_v21 }
 0x170   : > { %v384_v23 = vsub.f32 %v373_v17, %v382_v22 }
 0x171   : > { %v380_v24 = vpop.xlane.xlu0 %379 }
 0x172   : > { %v383_v25 = vmul.f32 0.015625, %v380_v24  ;;  %v386_v26 = vmul.f32 %v384_v23, %v384_v23 }
 0x174   : > { %v385_v27 = vsub.f32 %v374_v19, %v383_v25  ;;  %v388_v28 = vsel %vm289_vm0, %v386_v26, 0.0 }
 0x175   : > { %389 = vadd.xlane.f32.xlu1 %v388_v28 }
 0x176   : > { %v387_v29 = vmul.f32 %v385_v27, %v385_v27 }
 0x178   : > { %v391_v30 = vsel %vm289_vm0, %v387_v29, 0.0 }
 0x179   : > { %392 = vadd.xlane.f32.xlu1 %v391_v30 }
 0x1fe   : > { %v390_v31 = vpop.xlane.xlu1 %389 }
 0x1ff   : > { %v394_v32 = vmul.f32 0.015625, %v390_v31 }
 0x201   : > { %v396_v33 = vadd.f32 1e-05, %v394_v32 }
 0x202   : > { %v393_v34 = vpop.xlane.xlu1 %392 }
 0x203   : > { %547 = vrsqrt.f32 %v396_v33  ;;  %v395_v35 = vmul.f32 0.015625, %v393_v34 }
 0x205   : > { %v397_v36 = vadd.f32 1e-05, %v395_v35 }
 0x207   : > { %549 = vrsqrt.f32 %v397_v36 }
 0x210   : > { %v548_v37 = vpop.eup %547 }
 0x211   : > { %v400_v39 = vmul.f32 %v548_v37, %v384_v23 }
 0x213   : > { %v409_v41 = vmul.f32 %v503_v38, %v400_v39 }
 0x214   : > { %v550_v42 = vpop.eup %549 }
 0x215   : > { %v418_v43 = vadd.f32 %v504_v40, %v409_v41  ;;  %v401_v44 = vmul.f32 %v550_v42, %v385_v27 }
 0x217   : > { %420 = vst.msk [vmem:[%s271_s8] sm:$0xff] %vm289_vm0, %v418_v43  ;;  %v410_v45 = vmul.f32 %v503_v38, %v401_v44 }
 0x219   : > { %v419_v46 = vadd.f32 %v504_v40, %v410_v45 }
 0x21b   : > { %421 = vst.msk [vmem:[%s271_s8 + $0x8] sm:$0xff] %vm289_vm0, %v419_v46 }
 0x21c PF: > { %s16_s21 = sadd.s32 1, %s557_s21  }
 0x21d   : > { %p13_p4 = scmp.ge.s32.totalorder %s16_s21, 4  }
 0x21f   :  { %15 = sbr.rel (!%p13_p4) target bundleno = 1 (0x1), region = 77 }

// kernel: text_encoder_forward.21
= control target key start
LH: loop header
LB: loop body
LE: loop exit
PB: predicated region body
PF: predicated region fallthrough
CT: control target
= control target key end

     0   :  { %vm18_vm0 = vcmask 130048   ;;  %v228_v2 = vmov 0.0   ;;  %vm39_vm1 = vcmask 523264   ;;  %s312_s1 = inlined_call_operand.vmem [shape: f32[64,16], index: 1, kind: input, shape index: {}]   ;;  %s313_s0 = inlined_call_operand.vmem [shape: f32[32,64], index: 0, kind: input, shape index: {}]   ;;  %s314_s2 = inlined_call_operand.vmem [shape: f32[1,16], index: 2, kind: input, shape index: {}]   ;;  %s315_s3 = inlined_call_operand.vmem [shape: f32[32,16], index: 3, kind: output, shape index: {}]  }
   0x1   :  { %v38_v0 = vld [vmem:[%s312_s1 + $0x38] sm:$0xff]  ;;  %v37_v1 = vld [vmem:[%s312_s1 + $0x30] sm:$0xff]  ;;  %20 = vst.msk [vmem:[#allocation2 + $0x8] sm:$0xff] %vm18_vm0, %v228_v2  ;;  %19 = vst.msk [vmem:[#allocation2] sm:$0xff] %vm18_vm0, %v228_v2 }
   0x2   :  { %21 = vst.msk [vmem:[#allocation2 + $0x10] sm:$0xff] %vm18_vm0, %v228_v2  ;;  %22 = vst.msk [vmem:[#allocation2 + $0x18] sm:$0xff] %vm18_vm0, %v228_v2  ;;  %189 = vmatprep.subr.mxu0 %v38_v0  ;;  %211 = vmatprep.subr.mxu1 %v38_v0  ;;  %v36_v3 = vld [vmem:[%s312_s1 + $0x28] sm:$0xff]  ;;  %v35_v4 = vld [vmem:[%s312_s1 + $0x20] sm:$0xff] }
   0x3   :  { %190 = vmatpush3.msra.mxu0 %v38_v0  ;;  %219 = vmatpush3.msra.mxu1 %v38_v0  ;;  %v34_v5 = vld [vmem:[%s312_s1 + $0x18] sm:$0xff]  ;;  %v33_v6 = vld [vmem:[%s312_s1 + $0x10] sm:$0xff]  ;;  %v32_v7 = vld [vmem:[%s312_s1 + $0x8] sm:$0xff] }
   0x4   :  { %191 = vmatprep.subr.mxu0 %v37_v1  ;;  %212 = vmatprep.subr.mxu1 %v37_v1  ;;  %v31_v8 = vld [vmem:[%s312_s1] sm:$0xff]  ;;  %v29_v10 = vld [vmem:[%s313_s0 + $0x10] sm:$0xff]  ;;  %v28_v11 = vld [vmem:[%s313_s0 + $0x8] sm:$0xff] }
   0x5   :  { %192 = vmatpush3.msra.mxu0 %v37_v1  ;;  %220 = vmatpush3.msra.mxu1 %v37_v1  ;;  %v27_v9 = vld [vmem:[%s313_s0] sm:$0xff]  ;;  %v30_v12 = vld [vmem:[%s313_s0 + $0x18] sm:$0xff] }
   0x6   :  { %193 = vmatprep.subr.mxu0 %v36_v3  ;;  %213 = vmatprep.subr.mxu1 %v36_v3  ;;  %v176_v25 = vld [vmem:[%s314_s2] ss:$0 sm:$0xff] }
   0x7   :  { %194 = vmatpush3.msra.mxu0 %v36_v3  ;;  %221 = vmatpush3.msra.mxu1 %v36_v3 }
   0x8   :  { %195 = vmatprep.subr.mxu0 %v35_v4  ;;  %214 = vmatprep.subr.mxu1 %v35_v4  ;;  %v24_v13 = vld [vmem:[#allocation2 + $0x8] sm:$0xff]  ;;  %v23_v17 = vld [vmem:[#allocation2] sm:$0xff] }
   0x9   :  { %196 = vmatpush3.msra.mxu0 %v35_v4  ;;  %222 = vmatpush3.msra.mxu1 %v35_v4  ;;  %v26_v14 = vld [vmem:[#allocation2 + $0x18] sm:$0xff]  ;;  %v25_v18 = vld [vmem:[#allocation2 + $0x10] sm:$0xff] }
   0xa   :  { %197 = vmatprep.subr.mxu0 %v34_v5  ;;  %215 = vmatprep.subr.mxu1 %v34_v5 }
   0xb   :  { %198 = vmatpush3.msra.mxu0 %v34_v5  ;;  %223 = vmatpush3.msra.mxu1 %v34_v5 }
   0xc   :  { %199 = vmatprep.subr.mxu0 %v33_v6  ;;  %216 = vmatprep.subr.mxu1 %v33_v6 }
   0xd   :  { %200 = vmatpush3.msra.mxu0 %v33_v6  ;;  %224 = vmatpush3.msra.mxu1 %v33_v6 }
   0xe   :  { %201 = vmatprep.subr.mxu0 %v32_v7  ;;  %217 = vmatprep.subr.mxu1 %v32_v7 }
   0xf   :  { %202 = vmatpush3.msra.mxu0 %v32_v7  ;;  %225 = vmatpush3.msra.mxu1 %v32_v7 }
  0x10   :  { %203 = vmatprep.subr.mxu0 %v31_v8  ;;  %218 = vmatprep.subr.mxu1 %v31_v8 }
  0x11   :  { %204 = vmatpush3.msra.mxu0 %v31_v8  ;;  %226 = vmatpush3.msra.mxu1 %v31_v8 }
  0x12   :  { %205 = vmatprep.mubr.msk.f32.mxu0 %vm39_vm1, %v27_v9  ;;  %208 = vmatprep.mubr.msk.f32.mxu1 %vm39_vm1, %v29_v10 }
  0x13   :  { %206 = vmatmul.mubr.msk.f32.vlgmr.msra.gmra.mxu0 %vm39_vm1, %v28_v11  ;;  %209 = vmatmul.mubr.msk.f32.vlgmr.msra.gmra.mxu1 %vm39_vm1, %v30_v12 }
  0xd3   :  { %v207_v15 = vpop.f32.mrf.mxu0  ;;  %v210_v16 = vpop.f32.mrf.mxu1 }
  0xd4   :  { %v138_v19 = vadd.f32 %v207_v15, %v24_v13  ;;  %v140_v20 = vadd.f32 %v210_v16, %v26_v14 }
  0xd5   :  { %v118_v21 = vpop.f32.mrf.mxu0  ;;  %v128_v22 = vpop.f32.mrf.mxu1 }
  0xd6   :  { %143 = vst.msk [vmem:[#allocation2 + $0x8] sm:$0xff] %vm18_vm0, %v138_v19  ;;  %145 = vst.msk [vmem:[#allocation2 + $0x18] sm:$0xff] %vm18_vm0, %v140_v20  ;;  %v137_v23 = vadd.f32 %v118_v21, %v23_v17  ;;  %v139_v24 = vadd.f32 %v128_v22, %v25_v18 }
  0xd8   :  { %142 = vst.msk [vmem:[#allocation2] sm:$0xff] %vm18_vm0, %v137_v23  ;;  %144 = vst.msk [vmem:[#allocation2 + $0x10] sm:$0xff] %vm18_vm0, %v139_v24 }
  0xdd   :  { %v150_v26 = vld [vmem:[#allocation2 + $0x8] sm:$0xff]  ;;  %v152_v27 = vld [vmem:[#allocation2 + $0x18] sm:$0xff] }
  0xde   :  { %v161_v28 = vadd.f32 %v176_v25, %v150_v26  ;;  %v163_v29 = vadd.f32 %v176_v25, %v152_v27 }
  0xdf   :  { %v149_v30 = vld [vmem:[#allocation2] sm:$0xff]  ;;  %v151_v31 = vld [vmem:[#allocation2 + $0x10] sm:$0xff] }
  0xe0   :  { %165 = vst.msk [vmem:[%s315_s3 + $0x8] sm:$0xff] %vm18_vm0, %v161_v28  ;;  %167 = vst.msk [vmem:[%s315_s3 + $0x18] sm:$0xff] %vm18_vm0, %v163_v29  ;;  %v160_v32 = vadd.f32 %v176_v25, %v149_v30  ;;  %v162_v33 = vadd.f32 %v176_v25, %v151_v31 }
  0xe2   :  { %164 = vst.msk [vmem:[%s315_s3] sm:$0xff] %vm18_vm0, %v160_v32  ;;  %166 = vst.msk [vmem:[%s315_s3 + $0x10] sm:$0xff] %vm18_vm0, %v162_v33 }

// kernel: text_encoder_forward.12
= control target key start
LH: loop header
LB: loop body
LE: loop exit
PB: predicated region body
PF: predicated region fallthrough
CT: control target
= control target key end

     0   :  { %s1789_s18 = smov 0   ;;  %s2276_s0 = inlined_call_operand.vmem [shape: f32[2,16,192], index: 0, kind: input, shape index: {}]   ;;  %s2277_s1 = inlined_call_operand.vmem [shape: f32[32,9], index: 1, kind: input, shape index: {}]   ;;  %s2278_s2 = inlined_call_operand.vmem [shape: f32[9,32], index: 2, kind: input, shape index: {}]   ;;  %s2279_s3 = inlined_call_operand.vmem [shape: f32[2,16,1], index: 3, kind: input, shape index: {}]   ;;  %s2280_s4 = inlined_call_operand.vmem [shape: f32[2,1,16], index: 4, kind: input, shape index: {}]   ;;  %s2281_s5 = inlined_call_operand.vmem [shape: f32[2,16,64], index: 5, kind: output, shape index: {}]  }
   0x1 LB: > { %s1527_s19 = sadd.s32 4294967295, %s1745_s18   ;;  %p1531_p0 = scmp.ge.s32.totalorder %s1745_s18, 1  ;;  %s1745_s18 = sphi %s1789_s18, %s15_s18  }
   0x2   : > { %p205_p1 = scmp.lt.s32.totalorder %s1745_s18, 3 }
   0x4   : > { %p206_p2 = pnand %p1531_p0, %p205_p1 }
   0x5   : > { %p241_p3 = scmp.lt.s32.totalorder (!%p206_p2), %s1527_s19, 1  ;;  %s1749_s11 = smov (!%p206_p2), 64  }
   0x6   : > { %209 = sbr.rel (%p206_p2) target bundleno = 2088 (0x828), region = 40  ;;  %s1757_s15 = smov (!%p206_p2), 96  }
   0x7   : > { %s1758_s22 = smov (!%p206_p2), 32  }
   0xb   : > { %v1800_v0 = vld [vmem:[%s2277_s1 + $0x18] sm:$0xff]  ;;  %v1805_v1 = vld [vmem:[%s2277_s1 + $0x10] sm:$0xff]  ;;  %v1812_v2 = vld [vmem:[%s2277_s1 + $0x8] sm:$0xff]  ;;  %s2377_s19 = smov (!%p241_p3, %s1527_s19), 1  ;;  %v1747_v3 = vmov 0   ;;  %v1748_v5 = vmov 2   ;;  %v286_v28 = vlaneseq }
   0xc   : > { %1602 = vmatprep.subr.mxu0 %v1800_v0  ;;  %1686 = vset.pattern.permute.xlu1 %v1747_v3  ;;  %v1822_v4 = vld [vmem:[%s2277_s1] sm:$0xff]  ;;  %s1563_s28 = sshll.u32 %s2377_s19, 5  ;;  %s1564_s29 = sshll.u32 %s2377_s19, 4  ;;  %vm2282_vm0 = vcmask 261120   ;;  %v1750_v14 = vmov 5   ;;  %v1751_v15 = vmov 1  }
   0xd   : > { %1603 = vmatpush3.msra.mxu0 %v1800_v0  ;;  %1688 = vset.pattern.permute.xlu0 %v1748_v5  ;;  %s1831_s7 = scalar_lea.vmem %s2276_s0, %s1563_s28  ;;  %s1838_s10 = scalar_lea.vmem %s2279_s3, %s1564_s29  ;;  %v1752_v17 = vmov 3   ;;  %v1753_v18 = vmov 4   ;;  %v1754_v19 = vmov 6   ;;  %v1755_v20 = vmov 7  }
   0xe   : > { %1604 = vmatprep.subr.mxu0 %v1805_v1  ;;  %v1842_v6 = vld [vmem:[%s1831_s7] sm:$0xff]  ;;  %v1845_v7 = vld [vmem:[%s1831_s7 + $0x10] sm:$0xff]  ;;  %v1756_v21 = vmov 8   ;;  %v264_v22 = vld [vmem:[%s1838_s10 + $0x8] sm:$0xff]  ;;  %v287_v29 = vshrl.u32 %v286_v28, 7  ;;  %v290_v33 = vand.u32 127, %v286_v28  ;;  %s253_s14 = scalar_lea.vmem %s2280_s4, %s2377_s19  ;;  %s258_s25 = scalar_lea.vmem %s2281_s5, %s1564_s29 }
   0xf   : > { %1605 = vmatpush3.msra.mxu0 %v1805_v1  ;;  %v263_v8 = vld [vmem:[%s1838_s10] sm:$0xff]  ;;  %v1850_v9 = vmul.f32 0.17677669, %v1842_v6  ;;  %v1853_v10 = vmul.f32 0.17677669, %v1845_v7  ;;  %401 = vrot.lane.b32.xlu0 %v1845_v7, %s1749_s11 }
  0x10   : > { %1606 = vmatprep.subr.mxu0 %v1812_v2  ;;  %268 = vperm.xlu1 %1686, %v263_v8   ;;  %v288_v32 = vadd.s32 8, %v287_v29  ;;  %v1896_v36 = vsub.s32 %v290_v33, %v287_v29 }
  0x11   : > { %1607 = vmatpush3.msra.mxu0 %v1812_v2  ;;  %1610 = vmatprep.mubr.msk.f32.mxu0 %vm2282_vm0, %v1850_v9 }
  0x12   : > { %1608 = vmatprep.subr.mxu0 %v1822_v4  ;;  %1617 = vmatprep.mubr.msk.f32.mxu1 %vm2282_vm0, %v1850_v9  ;;  %v1898_v38 = vsub.s32 %v290_v33, %v288_v32  ;;  %vm383_vm1 = vcmp.eq.s32.totalorder %v1896_v36, 4294967292  ;;  %vm2283_vm3 = vcmp.eq.s32.totalorder %v1896_v36, 4294967293  ;;  %vm496_vm5 = vcmp.eq.s32.totalorder %v1896_v36, 4294967294 }
  0x13   : > { %1609 = vmatpush3.msra.mxu0 %v1822_v4  ;;  %399 = vrot.lane.b32.xlu0 %v1842_v6, %s1749_s11  ;;  %vm510_vm6 = vcmp.eq.s32.totalorder %v1896_v36, 4294967295  ;;  %vm524_vm9 = vcmp.eq.s32.totalorder %v1896_v36, 0  ;;  %vm2286_vm11 = vcmp.eq.s32.totalorder %v1896_v36, 1  ;;  %vm2284_vm12 = vcmp.eq.s32.totalorder %v1896_v36, 2 }
  0x14   : > { %1611 = vmatmul.mubr.msk.f32.vlgmr.msra.gmra.mxu0 %vm2282_vm0, %v1853_v10  ;;  %vm384_vm2 = vcmp.eq.s32.totalorder %v1898_v38, 4294967292  ;;  %vm483_vm4 = vcmp.eq.s32.totalorder %v1898_v38, 4294967293  ;;  %vm497_vm7 = vcmp.eq.s32.totalorder %v1898_v38, 4294967294  ;;  %vm2297_vm8 = vcmp.eq.s32.totalorder %v1898_v38, 4294967295 }
  0x15   : > { %vm2295_vm10 = vcmp.eq.s32.totalorder %v1898_v38, 0  ;;  %vm2294_vm13 = vcmp.eq.s32.totalorder %v1898_v38, 1  ;;  %vm2285_vm14 = vcmp.eq.s32.totalorder %v1896_v36, 3  ;;  %vm2293_vm15 = vcmp.eq.s32.totalorder %v1898_v38, 2 }
  0x81   : > { %v402_v11 = vpop.permute.xlu0 %401 }
  0x82   : > { %1613 = vmatprep.subr.msk.mxu1 %vm2282_vm0, %v402_v11 }
  0x83   : > { %1614 = vmatpush3.xpose.msk.msra.mxu1 %vm2282_vm0, %v402_v11 }
  0x85   : > { %v400_v12 = vpop.permute.xlu0 %399 }
  0x86   : > { %1615 = vmatprep.subr.msk.mxu1 %vm2282_vm0, %v400_v12 }
  0x87   : > { %1616 = vmatpush3.xpose.msk.msra.mxu1 %vm2282_vm0, %v400_v12 }
  0x8a   : > { %1618 = vmatmul.mubr.msk.f32.vlgmr.msra.gmra.mxu1 %vm2282_vm0, %v1853_v10  ;;  %vm2287_vm0 = vcmp.eq.s32.totalorder %v1896_v36, 4 }
  0x8b   : > { %v1890_v23 = vpop.permute.xlu1 %268 }
  0xd4   : > { %v1612_v13 = vpop.f32.mrf.mxu0 }
  0xd5   : > { %503 = vperm.xlu0 %1688, %v1612_v13   ;;  %392 = vperm.xlu1 %1686, %v1612_v13  }
  0xd6   : > { %v374_v16 = vpop.f32.mrf.mxu0 }
  0xd9   : > { %1691 = vset.pattern.permute.xlu0 %v1750_v14  ;;  %1687 = vset.pattern.permute.xlu1 %v1751_v15 }
  0xda   : > { %545 = vperm.xlu0 %1691, %v1612_v13   ;;  %489 = vperm.xlu1 %1687, %v1612_v13  }
  0xde   : > { %1695 = vset.pattern.permute.xlu0 %v1751_v15  ;;  %1689 = vset.pattern.permute.xlu1 %v1752_v17 }
  0xdf   : > { %517 = vperm.xlu1 %1689, %v1612_v13   ;;  %485 = vperm.xlu0 %1695, %v374_v16  }
  0xe3   : > { %1690 = vset.pattern.permute.xlu1 %v1753_v18  ;;  %1698 = vset.pattern.permute.xlu0 %v1753_v18 }
  0xe4   : > { %531 = vperm.xlu1 %1690, %v1612_v13   ;;  %527 = vperm.xlu0 %1698, %v374_v16  }
  0xe8   : > { %1692 = vset.pattern.permute.xlu1 %v1754_v19  ;;  %1701 = vset.pattern.permute.xlu0 %v1755_v20 }
  0xe9   : > { %559 = vperm.xlu1 %1692, %v1612_v13   ;;  %569 = vperm.xlu0 %1701, %v374_v16  }
  0xed   : > { %1693 = vset.pattern.permute.xlu1 %v1755_v20  ;;  %1702 = vset.pattern.permute.xlu0 %v1756_v21 }
  0xee   : > { %573 = vperm.xlu1 %1693, %v1612_v13   ;;  %583 = vperm.xlu0 %1702, %v374_v16  }
  0xf2   : > { %1694 = vset.pattern.permute.xlu1 %v1747_v3  ;;  %1706 = vset.pattern.permute.xlu0 %v1751_v15 }
  0xf3   : > { %387 = vperm.xlu1 %1694, %v374_v16  }
  0xf7   : > { %1696 = vset.pattern.permute.xlu1 %v1748_v5 }
  0xf8   : > { %499 = vperm.xlu1 %1696, %v374_v16  }
  0xfc   : > { %1697 = vset.pattern.permute.xlu1 %v1752_v17 }
  0xfd   : > { %513 = vperm.xlu1 %1697, %v374_v16  }
 0x101   : > { %1699 = vset.pattern.permute.xlu1 %v1750_v14 }
 0x102   : > { %541 = vperm.xlu1 %1699, %v374_v16  }
 0x106   : > { %1700 = vset.pattern.permute.xlu1 %v1754_v19 }
 0x107   : > { %555 = vperm.xlu1 %1700, %v374_v16  }
 0x10b   : > { %1703 = vset.pattern.permute.xlu1 %v1747_v3 }
 0x10c   : > { %273 = vperm.xlu1 %1703, %v264_v22  }
 0x110   : > { %1704 = vset.pattern.permute.xlu1 %v1756_v21 }
 0x111   : > { %587 = vperm.xlu1 %1704, %v1612_v13  }
 0x115   : > { %1705 = vset.pattern.permute.xlu1 %v1747_v3 }
 0x14a   : > { %v1619_v37 = vpop.f32.mrf.mxu1 }
 0x14c   : > { %v473_v39 = vpop.f32.mrf.mxu1 }
 0x150   : > { %v393_v24 = vpop.permute.xlu1 %392  ;;  %v504_v30 = vpop.permute.xlu0 %503 }
 0x151   : > { %v396_v44 = vsel %vm384_vm2, %v393_v24, 0.0  ;;  %v507_v57 = vsel %vm497_vm7, %v504_v30, 0.0  ;;  %v1538_v24 = vld [vmem:[%s253_s14] ss:$0 sm:$0xff] }
 0x152   : > { %v479_v50 = vadd.f32 %v1619_v37, %v396_v44  ;;  %v1949_v30 = vmul.f32 %v1538_v24, %v1890_v23 }
 0x155   : > { %v490_v25 = vpop.permute.xlu1 %489  ;;  %v546_v35 = vpop.permute.xlu0 %545 }
 0x156   : > { %v493_v48 = vsel %vm483_vm4, %v490_v25, 0.0  ;;  %v549_v28 = vsel %vm2294_vm13, %v546_v35, 0.0 }
 0x157   : > { %v495_v51 = vadd.f32 %v493_v48, %v479_v50 }
 0x159   : > { %v509_v58 = vadd.f32 %v507_v57, %v495_v51 }
 0x15a   : > { %v518_v26 = vpop.permute.xlu1 %517  ;;  %v486_v42 = vpop.permute.xlu0 %485 }
 0x15b   : > { %v492_v45 = vsel %vm2283_vm3, %v486_v42, 0.0  ;;  %v521_v59 = vsel %vm2297_vm8, %v518_v26, 0.0  ;;  %vm2290_vm3 = vcmp.eq.s32.totalorder %v1898_v38, 3 }
 0x15c   : > { %v523_v12 = vadd.f32 %v521_v59, %v509_v58  ;;  %v1976_v59 = vld [vmem:[%s1831_s7 + $0x18] sm:$0xff] }
 0x15d   : > { %1627 = vmatprep.subr.mxu1 %v1976_v59 }
 0x15e   : > { %1628 = vmatpush3.msra.mxu1 %v1976_v59 }
 0x15f   : > { %v532_v27 = vpop.permute.xlu1 %531  ;;  %v528_v52 = vpop.permute.xlu0 %527 }
 0x160   : > { %v534_v60 = vsel %vm524_vm9, %v528_v52, 0.0  ;;  %v535_v8 = vsel %vm2295_vm10, %v532_v27, 0.0 }
 0x161   : > { %v537_v13 = vadd.f32 %v535_v8, %v523_v12 }
 0x163   : > { %v551_v32 = vadd.f32 %v549_v28, %v537_v13 }
 0x164   : > { %v1892_v31 = vpop.permute.xlu1 %559  ;;  %v570_v62 = vpop.permute.xlu0 %569 }
 0x165   : > { %v576_v29 = vsel %vm2285_vm14, %v570_v62, 0.0  ;;  %v563_v37 = vsel %vm2293_vm15, %v1892_v31, 0.0  ;;  %vm2289_vm14 = vcmp.gt.f32.partialorder %v1949_v30, 0.0 }
 0x166   : > { %v565_v23 = vadd.f32 %v563_v37, %v551_v32 }
 0x169   : > { %v1894_v34 = vpop.permute.xlu1 %573  ;;  %v584_v26 = vpop.permute.xlu0 %583 }
 0x16a   : > { %v577_v35 = vsel %vm2290_vm3, %v1894_v34, 0.0 }
 0x16b   : > { %v579_v44 = vadd.f32 %v577_v35, %v565_v23 }
 0x16e   : > { %v388_v40 = vpop.permute.xlu1 %387 }
 0x16f   : > { %v395_v41 = vsel %vm383_vm1, %v388_v40, 0.0 }
 0x170   : > { %v474_v43 = vadd.f32 %v473_v39, %v395_v41  ;;  %v590_v39 = vsel %vm2287_vm0, %v584_v26, 0.0 }
 0x172   : > { %v494_v47 = vadd.f32 %v492_v45, %v474_v43 }
 0x173   : > { %v500_v46 = vpop.permute.xlu1 %499 }
 0x174   : > { %v506_v49 = vsel %vm496_vm5, %v500_v46, 0.0 }
 0x175   : > { %v508_v53 = vadd.f32 %v506_v49, %v494_v47 }
 0x178   : > { %v514_v54 = vpop.permute.xlu1 %513 }
 0x179   : > { %v520_v55 = vsel %vm510_vm6, %v514_v54, 0.0 }
 0x17a   : > { %v522_v56 = vadd.f32 %v520_v55, %v508_v53 }
 0x17c   : > { %v536_v63 = vadd.f32 %v534_v60, %v522_v56  ;;  %v1981_v60 = vld [vmem:[%s1831_s7 + $0x8] sm:$0xff] }
 0x17d   : > { %v542_v61 = vpop.permute.xlu1 %541  ;;  %1629 = vmatprep.subr.mxu1 %v1981_v60 }
 0x17e   : > { %v548_v11 = vsel %vm2286_vm11, %v542_v61, 0.0  ;;  %vm2292_vm11 = vcmp.eq.s32.totalorder %v1898_v38, 4  ;;  %1630 = vmatpush3.msra.mxu1 %v1981_v60 }
 0x17f   : > { %v550_v16 = vadd.f32 %v548_v11, %v536_v63 }
 0x182   : > { %v556_v22 = vpop.permute.xlu1 %555 }
 0x183   : > { %v562_v25 = vsel %vm2284_vm12, %v556_v22, 0.0  ;;  %vm2291_vm12 = vcmask 130048  }
 0x184   : > { %v564_v27 = vadd.f32 %v562_v25, %v550_v16 }
 0x186   : > { %v578_v33 = vadd.f32 %v576_v29, %v564_v27 }
 0x187   : > { %v274_v40 = vpop.permute.xlu1 %273 }
 0x188   : > { %v592_v41 = vadd.f32 %v590_v39, %v578_v33  ;;  %v1964_v43 = vmul.f32 %v1538_v24, %v274_v40 }
 0x18a   : > { %v594_v42 = vsel %vm2289_vm14, %v592_v41, -10000.0  ;;  %vm2288_vm0 = vcmp.gt.f32.partialorder %v1964_v43, 0.0  ;;  %vm2304_vm14 = vcmp.eq.s32.totalorder %v1896_v36, 2 }
 0x18b   : > { %v597_v31 = vsel %vm2291_vm12, %v594_v42, -inf }
 0x18c   : > { %598 = vmax.xlane.f32.xlu0 %v597_v31  ;;  %v588_v45 = vpop.permute.xlu1 %587 }
 0x18d   : > { %v591_v46 = vsel %vm2292_vm11, %v588_v45, 0.0 }
 0x18e   : > { %v593_v47 = vadd.f32 %v591_v46, %v579_v44 }
 0x190   : > { %v595_v34 = vsel %vm2288_vm0, %v593_v47, -10000.0  ;;  %vm2303_vm0 = vcmp.eq.s32.totalorder %v1896_v36, 1 }
 0x191   : > { %v600_v48 = vsel %vm2291_vm12, %v595_v34, -inf }
 0x192   : > { %601 = vmax.xlane.f32.xlu1 %v600_v48 }
 0x215   : > { %v599_v49 = vpop.xlane.xlu0 %598 }
 0x216   : > { %v603_v50 = vsub.f32 %v594_v42, %v599_v49 }
 0x218   : > { %v605_v51 = vmul.f32 1.442695, %v603_v50 }
 0x21a   : > { %1723 = vpow2.f32 %v605_v51 }
 0x21b   : > { %v602_v52 = vpop.xlane.xlu1 %601 }
 0x21c   : > { %v604_v53 = vsub.f32 %v595_v34, %v602_v52 }
 0x21e   : > { %v607_v54 = vmul.f32 1.442695, %v604_v53 }
 0x220   : > { %1725 = vpow2.f32 %v607_v54 }
 0x227   : > { %v1724_v55 = vpop.eup %1723 }
 0x228   : > { %v609_v56 = vsel %vm2291_vm12, %v1724_v55, 0.0 }
 0x229   : > { %610 = vadd.xlane.f32.xlu0 %v609_v56 }
 0x22d   : > { %v1726_v57 = vpop.eup %1725 }
 0x22e   : > { %v612_v58 = vsel %vm2291_vm12, %v1726_v57, 0.0 }
 0x22f   : > { %613 = vadd.xlane.f32.xlu0 %v612_v58 }
 0x2b2   : > { %v611_v61 = vpop.xlane.xlu0 %610 }
 0x2b3   : > { %1727 = vrcp.f32 %v611_v61 }
 0x2b8   : > { %v614_v62 = vpop.xlane.xlu0 %613 }
 0x2b9   : > { %1729 = vrcp.f32 %v614_v62  ;;  %v2046_v62 = vld [vmem:[%s2278_s2 + $0x8] sm:$0x1] }
 0x2c0   : > { %v1728_v63 = vpop.eup %1727 }
 0x2c1   : > { %v617_v8 = vmul.f32 %v1728_v63, %v1724_v55  ;;  %v2051_v63 = vld [vmem:[%s2278_s2] sm:$0xff] }
 0x2c3   : > { %1631 = vmatprep.mubr.msk.f32.mxu1 %vm2291_vm12, %v617_v8  ;;  %v619_v26 = vsel %vm383_vm1, %v617_v8, 0.0  ;;  %v635_v32 = vsel %vm496_vm5, %v617_v8, 0.0  ;;  %v643_v40 = vsel %vm510_vm6, %v617_v8, 0.0  ;;  %v651_v42 = vsel %vm524_vm9, %v617_v8, 0.0 }
 0x2c4   : > { %v621_v28 = vsel %vm2291_vm12, %v619_v26, 0.0  ;;  %v637_v37 = vsel %vm2291_vm12, %v635_v32, 0.0  ;;  %v645_v35 = vsel %vm2291_vm12, %v643_v40, 0.0  ;;  %v653_v44 = vsel %vm2291_vm12, %v651_v42, 0.0 }
 0x2c5   : > { %v659_v46 = vsel %vm2303_vm0, %v617_v8, 0.0  ;;  %v667_v49 = vsel %vm2304_vm14, %v617_v8, 0.0  ;;  %vm2305_vm0 = vcmp.eq.s32.totalorder %v1896_v36, 3  ;;  %vm2306_vm14 = vcmp.eq.s32.totalorder %v1896_v36, 4294967293 }
 0x2c6   : > { %v1730_v11 = vpop.eup %1729  ;;  %v661_v34 = vsel %vm2291_vm12, %v659_v46, 0.0  ;;  %v669_v51 = vsel %vm2291_vm12, %v667_v49, 0.0  ;;  %v675_v53 = vsel %vm2305_vm0, %v617_v8, 0.0  ;;  %v627_v56 = vsel %vm2306_vm14, %v617_v8, 0.0 }
 0x2c7   : > { %v618_v12 = vmul.f32 %v1730_v11, %v1726_v57  ;;  %v677_v55 = vsel %vm2291_vm12, %v675_v53, 0.0  ;;  %v629_v58 = vsel %vm2291_vm12, %v627_v56, 0.0  ;;  %vm722_vm0 = vcmask 1040384  }
 0x2c8   : > { %1620 = vmatprep.subr.msk.mxu0 %vm722_vm0, %v2046_v62  ;;  %vm2298_vm14 = vcmask 15360  }
 0x2c9   : > { %1632 = vmatmul.mubr.msk.f32.vlgmr.msra.gmra.mxu1 %vm2291_vm12, %v618_v12  ;;  %v628_v13 = vsel %vm483_vm4, %v618_v12, 0.0  ;;  %v620_v16 = vsel %vm384_vm2, %v618_v12, 0.0  ;;  %v636_v25 = vsel %vm497_vm7, %v618_v12, 0.0  ;;  %v644_v29 = vsel %vm2297_vm8, %v618_v12, 0.0  ;;  %1621 = vmatpush3.msk.msra.mxu0 %vm722_vm0, %v2046_v62 }
 0x2ca   : > { %v632_v22 = vsel %vm2291_vm12, %v628_v13, 0.0  ;;  %v624_v24 = vsel %vm2291_vm12, %v620_v16, 0.0  ;;  %v640_v27 = vsel %vm2291_vm12, %v636_v25, 0.0  ;;  %v648_v33 = vsel %vm2291_vm12, %v644_v29, 0.0  ;;  %1622 = vmatprep.subr.mxu0 %v2051_v63 }
 0x2cb   : > { %633 = vadd.xlane.f32.xlu0 %v632_v22  ;;  %625 = vadd.xlane.f32.xlu1 %v624_v24  ;;  %v652_v39 = vsel %vm2295_vm10, %v618_v12, 0.0  ;;  %v660_v23 = vsel %vm2294_vm13, %v618_v12, 0.0  ;;  %v668_v45 = vsel %vm2293_vm15, %v618_v12, 0.0  ;;  %v676_v48 = vsel %vm2290_vm3, %v618_v12, 0.0 }
 0x2cc   : > { %v656_v41 = vsel %vm2291_vm12, %v652_v39, 0.0  ;;  %v664_v31 = vsel %vm2291_vm12, %v660_v23, 0.0  ;;  %v672_v47 = vsel %vm2291_vm12, %v668_v45, 0.0  ;;  %v680_v50 = vsel %vm2291_vm12, %v676_v48, 0.0  ;;  %1623 = vmatpush3.msra.mxu0 %v2051_v63 }
 0x2cd   : > { %v684_v52 = vsel %vm2292_vm11, %v618_v12, 0.0  ;;  %vm2307_vm3 = vcmp.eq.s32.totalorder %v1896_v36, 4  ;;  %1634 = vmatprep.subr.mxu0 %v1800_v0  ;;  %vm700_vm11 = vcmask 31744   ;;  %vm2299_vm15 = vcmask 39936  }
 0x2ce   : > { %v688_v54 = vsel %vm2291_vm12, %v684_v52, 0.0  ;;  %v683_v57 = vsel %vm2307_vm3, %v617_v8, 0.0  ;;  %vm2296_vm3 = vcmask 7168   ;;  %vm2300_vm13 = vcmask 48128  }
 0x2cf   : > { %641 = vadd.xlane.f32.xlu0 %v640_v27  ;;  %622 = vadd.xlane.f32.xlu1 %v621_v28  ;;  %v685_v61 = vsel %vm2291_vm12, %v683_v57, 0.0  ;;  %vm697_vm12 = vcmask 23552   ;;  %vm2301_vm10 = vcmask 56320   ;;  %vm2302_vm8 = vcmask 64512  }
 0x2d3   : > { %649 = vadd.xlane.f32.xlu0 %v648_v33  ;;  %638 = vadd.xlane.f32.xlu1 %v637_v37 }
 0x2d7   : > { %657 = vadd.xlane.f32.xlu0 %v656_v41  ;;  %646 = vadd.xlane.f32.xlu1 %v645_v35 }
 0x2db   : > { %665 = vadd.xlane.f32.xlu0 %v664_v31  ;;  %654 = vadd.xlane.f32.xlu1 %v653_v44 }
 0x2df   : > { %673 = vadd.xlane.f32.xlu0 %v672_v47  ;;  %662 = vadd.xlane.f32.xlu1 %v661_v34 }
 0x2e3   : > { %681 = vadd.xlane.f32.xlu0 %v680_v50  ;;  %670 = vadd.xlane.f32.xlu1 %v669_v51 }
 0x2e7   : > { %689 = vadd.xlane.f32.xlu0 %v688_v54  ;;  %678 = vadd.xlane.f32.xlu1 %v677_v55 }
 0x2eb   : > { %630 = vadd.xlane.f32.xlu0 %v629_v58  ;;  %686 = vadd.xlane.f32.xlu1 %v685_v61 }
 0x2fc   : > { %882 = vrot.lane.b32.xlu1 %v1850_v9, %s1757_s15 }
 0x300   : > { %979 = vrot.lane.b32.xlu1 %v1845_v7, %s1758_s22 }
 0x301   : > { %884 = vrot.lane.b32.xlu0 %v1853_v10, %s1757_s15 }
 0x304   : > { %977 = vrot.lane.b32.xlu1 %v1842_v6, %s1758_s22 }
 0x354   : > { %v634_v9 = vpop.xlane.xlu0 %633  ;;  %v626_v8 = vpop.xlane.xlu1 %625 }
 0x355   : > { %v693_v39 = vsel %vm2296_vm3, %v626_v8, %v634_v9 }
 0x358   : > { %v642_v11 = vpop.xlane.xlu0 %641  ;;  %v623_v12 = vpop.xlane.xlu1 %622 }
 0x359   : > { %v696_v41 = vsel %vm2298_vm14, %v693_v39, %v642_v11 }
 0x35c   : > { %v650_v13 = vpop.xlane.xlu0 %649  ;;  %v639_v16 = vpop.xlane.xlu1 %638 }
 0x35d   : > { %v699_v23 = vsel %vm697_vm12, %v696_v41, %v650_v13 }
 0x360   : > { %v658_v22 = vpop.xlane.xlu0 %657  ;;  %v647_v24 = vpop.xlane.xlu1 %646 }
 0x361   : > { %v702_v44 = vsel %vm700_vm11, %v699_v23, %v658_v22 }
 0x364   : > { %v666_v25 = vpop.xlane.xlu0 %665  ;;  %v655_v7 = vpop.xlane.xlu1 %654 }
 0x365   : > { %v705_v46 = vsel %vm2299_vm15, %v702_v44, %v666_v25 }
 0x368   : > { %v674_v26 = vpop.xlane.xlu0 %673  ;;  %v663_v27 = vpop.xlane.xlu1 %662 }
 0x369   : > { %v708_v34 = vsel %vm2300_vm13, %v705_v46, %v674_v26 }
 0x36c   : > { %v682_v28 = vpop.xlane.xlu0 %681  ;;  %v671_v29 = vpop.xlane.xlu1 %670 }
 0x36d   : > { %v711_v49 = vsel %vm2301_vm10, %v708_v34, %v682_v28 }
 0x370   : > { %v690_v10 = vpop.xlane.xlu0 %689  ;;  %v679_v32 = vpop.xlane.xlu1 %678 }
 0x371   : > { %v714_v52 = vsel %vm2302_vm8, %v711_v49, %v690_v10 }
 0x374   : > { %v631_v33 = vpop.xlane.xlu0 %630  ;;  %v687_v6 = vpop.xlane.xlu1 %686 }
 0x375   : > { %v692_v37 = vsel %vm2296_vm3, %v623_v12, %v631_v33  ;;  %vm2308_vm3 = vcmask 261120  }
 0x376   : > { %v695_v40 = vsel %vm2298_vm14, %v692_v37, %v639_v16  ;;  %vm715_vm14 = vcmask 72704  }
 0x377   : > { %v698_v35 = vsel %vm697_vm12, %v695_v40, %v647_v24 }
 0x378   : > { %v701_v42 = vsel %vm700_vm11, %v698_v35, %v655_v7  ;;  %v883_v31 = vpop.permute.xlu1 %882  ;;  %v885_v54 = vpop.permute.xlu0 %884 }
 0x379   : > { %v704_v45 = vsel %vm2299_vm15, %v701_v42, %v663_v27  ;;  %1649 = vmatprep.mubr.msk.f32.mxu1 %vm2308_vm3, %v883_v31  ;;  %vm2309_vm15 = vmmov %vm2308_vm3 }
 0x37a   : > { %v707_v47 = vsel %vm2300_vm13, %v704_v45, %v671_v29  ;;  %vm2310_vm13 = vmmov %vm2308_vm3 }
 0x37b   : > { %v710_v48 = vsel %vm2301_vm10, %v707_v47, %v679_v32  ;;  %vm2311_vm10 = vmmov %vm2308_vm3 }
 0x37c   : > { %v713_v50 = vsel %vm2302_vm8, %v710_v48, %v687_v6  ;;  %v980_v51 = vpop.permute.xlu1 %979  ;;  %vm2312_vm8 = vmmov %vm2308_vm3 }
 0x37d   : > { %1624 = vmatprep.mubr.msk.f32.mxu0 %vm715_vm14, %v713_v50  ;;  %1645 = vmatprep.subr.msk.mxu1 %vm2308_vm3, %v980_v51 }
 0x37e   : > { %1625 = vmatmul.mubr.msk.f32.vlgmr.msra.gmra.mxu0 %vm715_vm14, %v714_v52  ;;  %1646 = vmatpush3.xpose.msk.msra.mxu1 %vm2309_vm15, %v980_v51  ;;  %vm2313_vm15 = vmmov %vm2308_vm3 }
 0x37f   : > { %1635 = vmatpush3.msra.mxu0 %v1800_v0  ;;  %1642 = vmatprep.mubr.msk.f32.mxu0 %vm2310_vm13, %v883_v31  ;;  %vm2314_vm13 = vmmov %vm2308_vm3  ;;  %vm2318_vm3 = vcmp.eq.s32.totalorder %v1898_v38, 0 }
 0x380   : > { %1636 = vmatprep.subr.mxu0 %v1805_v1  ;;  %v978_v53 = vpop.permute.xlu1 %977 }
 0x381   : > { %1637 = vmatpush3.msra.mxu0 %v1805_v1  ;;  %1647 = vmatprep.subr.msk.mxu1 %vm2311_vm10, %v978_v53  ;;  %vm2316_vm10 = vcmp.eq.s32.totalorder %v1898_v38, 4294967295 }
 0x382   : > { %1638 = vmatprep.subr.mxu0 %v1812_v2  ;;  %1648 = vmatpush3.xpose.msk.msra.mxu1 %vm2312_vm8, %v978_v53  ;;  %vm2315_vm8 = vcmp.eq.s32.totalorder %v1896_v36, 4294967293 }
 0x383   : > { %1639 = vmatpush3.msra.mxu0 %v1812_v2 }
 0x384   : > { %1640 = vmatprep.subr.mxu0 %v1822_v4 }
 0x385   : > { %1641 = vmatpush3.msra.mxu0 %v1822_v4  ;;  %1650 = vmatmul.mubr.msk.f32.vlgmr.msra.gmra.mxu1 %vm2313_vm15, %v885_v54  ;;  %vm2319_vm15 = vcmp.eq.s32.totalorder %v1896_v36, 2 }
 0x386   : > { %1643 = vmatmul.mubr.msk.f32.vlgmr.msra.gmra.mxu0 %vm2314_vm13, %v885_v54  ;;  %1652 = vmatprep.subr.msk.mxu0 %vm722_vm0, %v2046_v62  ;;  %vm2320_vm13 = vcmp.eq.s32.totalorder %v1898_v38, 1 }
 0x387   : > { %1653 = vmatpush3.msk.msra.mxu0 %vm722_vm0, %v2046_v62  ;;  %vm2317_vm0 = vcmp.eq.s32.totalorder %v1896_v36, 1 }
 0x388   : > { %1654 = vmatprep.subr.mxu0 %v2051_v63 }
 0x389   : > { %1655 = vmatpush3.msra.mxu0 %v2051_v63  ;;  %v2105_v0 = vpop.f32.mrf.mxu1 }
 0x38b   : > { %v873_v2 = vpop.f32.mrf.mxu1 }
 0x43e   : > { %v2107_v1 = vpop.f32.mrf.mxu0 }
 0x440   : > { %v792_v4 = vpop.f32.mrf.mxu0 }
 0x441   : > { %v2109_v55 = vadd.f32 %v873_v2, %v792_v4 }
 0x446   : > { %v1644_v56 = vpop.f32.mrf.mxu0 }
 0x447   : > { %1065 = vperm.xlu0 %1706, %v1644_v56   ;;  %972 = vperm.xlu1 %1705, %v1644_v56  }
 0x448   : > { %v956_v57 = vpop.f32.mrf.mxu0 }
 0x44b   : > { %1709 = vset.pattern.permute.xlu0 %v1753_v18  ;;  %1707 = vset.pattern.permute.xlu1 %v1748_v5 }
 0x44c   : > { %1101 = vperm.xlu0 %1709, %v1644_v56   ;;  %1077 = vperm.xlu1 %1707, %v1644_v56  }
 0x450   : > { %1712 = vset.pattern.permute.xlu0 %v1747_v3  ;;  %1708 = vset.pattern.permute.xlu1 %v1752_v17 }
 0x451   : > { %1089 = vperm.xlu1 %1708, %v1644_v56   ;;  %967 = vperm.xlu0 %1712, %v956_v57  }
 0x455   : > { %1710 = vset.pattern.permute.xlu1 %v1750_v14  ;;  %1715 = vset.pattern.permute.xlu0 %v1752_v17 }
 0x456   : > { %1113 = vperm.xlu1 %1710, %v1644_v56   ;;  %1085 = vperm.xlu0 %1715, %v956_v57  }
 0x45a   : > { %1711 = vset.pattern.permute.xlu1 %v1754_v19  ;;  %1718 = vset.pattern.permute.xlu0 %v1754_v19 }
 0x45b   : > { %1125 = vperm.xlu1 %1711, %v1644_v56   ;;  %1121 = vperm.xlu0 %1718, %v956_v57  }
 0x45f   : > { %1713 = vset.pattern.permute.xlu1 %v1751_v15  ;;  %1719 = vset.pattern.permute.xlu0 %v1755_v20 }
 0x460   : > { %1061 = vperm.xlu1 %1713, %v956_v57   ;;  %1137 = vperm.xlu0 %1719, %v1644_v56  }
 0x464   : > { %1714 = vset.pattern.permute.xlu1 %v1748_v5  ;;  %1722 = vset.pattern.permute.xlu0 %v1756_v21 }
 0x465   : > { %1073 = vperm.xlu1 %1714, %v956_v57  }
 0x469   : > { %1716 = vset.pattern.permute.xlu1 %v1753_v18  ;;  %v1651_v18 = vpop.f32.mrf.mxu1 }
 0x46a   : > { %1097 = vperm.xlu1 %1716, %v956_v57  }
 0x46b   : > { %v1051_v9 = vpop.f32.mrf.mxu1 }
 0x46e   : > { %1717 = vset.pattern.permute.xlu1 %v1750_v14 }
 0x46f   : > { %1109 = vperm.xlu1 %1717, %v956_v57  }
 0x473   : > { %1720 = vset.pattern.permute.xlu1 %v1755_v20 }
 0x474   : > { %1133 = vperm.xlu1 %1720, %v956_v57  }
 0x478   : > { %1721 = vset.pattern.permute.xlu1 %v1756_v21 }
 0x479   : > { %1145 = vperm.xlu1 %1721, %v956_v57  }
 0x47d   : > { %1149 = vperm.xlu1 %1721, %v1644_v56  }
 0x4c2   : > { %v973_v3 = vpop.permute.xlu1 %972  ;;  %v1066_v17 = vpop.permute.xlu0 %1065 }
 0x4c3   : > { %v976_v8 = vsel %vm384_vm2, %v973_v3, 0.0  ;;  %v1069_v25 = vsel %vm483_vm4, %v1066_v17, 0.0 }
 0x4c4   : > { %v1057_v16 = vadd.f32 %v1651_v18, %v976_v8 }
 0x4c6   : > { %v1071_v27 = vadd.f32 %v1069_v25, %v1057_v16 }
 0x4c7   : > { %v1078_v15 = vpop.permute.xlu1 %1077  ;;  %v1102_v58 = vpop.permute.xlu0 %1101 }
 0x4c8   : > { %v1081_v29 = vsel %vm497_vm7, %v1078_v15, 0.0  ;;  %v1105_v23 = vsel %vm2318_vm3, %v1102_v58, 0.0  ;;  %vm2324_vm3 = vcmp.eq.s32.totalorder %v1896_v36, 4 }
 0x4c9   : > { %v1083_v33 = vadd.f32 %v1081_v29, %v1071_v27 }
 0x4cc   : > { %v1090_v5 = vpop.permute.xlu1 %1089  ;;  %v968_v62 = vpop.permute.xlu0 %967 }
 0x4cd   : > { %v975_v14 = vsel %vm383_vm1, %v968_v62, 0.0  ;;  %v1093_v32 = vsel %vm2316_vm10, %v1090_v5, 0.0  ;;  %vm2322_vm10 = vcmp.eq.s32.totalorder %v1898_v38, 2 }
 0x4ce   : > { %v1052_v21 = vadd.f32 %v1051_v9, %v975_v14  ;;  %v1095_v40 = vadd.f32 %v1093_v32, %v1083_v33 }
 0x4d0   : > { %v1107_v44 = vadd.f32 %v1105_v23, %v1095_v40 }
 0x4d1   : > { %v1114_v19 = vpop.permute.xlu1 %1113  ;;  %v1086_v22 = vpop.permute.xlu0 %1085 }
 0x4d2   : > { %v1092_v7 = vsel %vm510_vm6, %v1086_v22, 0.0  ;;  %v1117_v46 = vsel %vm2320_vm13, %v1114_v19, 0.0  ;;  %vm2326_vm13 = vcmp.eq.s32.totalorder %v1898_v38, 4 }
 0x4d3   : > { %v1119_v49 = vadd.f32 %v1117_v46, %v1107_v44 }
 0x4d6   : > { %v1126_v61 = vpop.permute.xlu1 %1125  ;;  %v1122_v41 = vpop.permute.xlu0 %1121 }
 0x4d7   : > { %v1128_v42 = vsel %vm2319_vm15, %v1122_v41, 0.0  ;;  %v1129_v48 = vsel %vm2322_vm10, %v1126_v61, 0.0  ;;  %vm2325_vm15 = vcmp.gt.f32.partialorder %v1949_v30, 0.0  ;;  %vm2328_vm10 = vcmp.gt.f32.partialorder %v1964_v43, 0.0 }
 0x4d8   : > { %v1131_v54 = vadd.f32 %v1129_v48, %v1119_v49 }
 0x4db   : > { %v1062_v63 = vpop.permute.xlu1 %1061  ;;  %v1138_v34 = vpop.permute.xlu0 %1137 }
 0x4dc   : > { %v1068_v20 = vsel %vm2315_vm8, %v1062_v63, 0.0  ;;  %vm2321_vm8 = vcmp.eq.s32.totalorder %v1896_v36, 3 }
 0x4dd   : > { %v1070_v11 = vadd.f32 %v1068_v20, %v1052_v21 }
 0x4e0   : > { %v1074_v12 = vpop.permute.xlu1 %1073 }
 0x4e1   : > { %v1080_v13 = vsel %vm496_vm5, %v1074_v12, 0.0 }
 0x4e2   : > { %v1082_v24 = vadd.f32 %v1080_v13, %v1070_v11 }
 0x4e4   : > { %v1094_v28 = vadd.f32 %v1092_v7, %v1082_v24 }
 0x4e5   : > { %v1098_v26 = vpop.permute.xlu1 %1097 }
 0x4e6   : > { %v1104_v10 = vsel %vm524_vm9, %v1098_v26, 0.0 }
 0x4e7   : > { %v1106_v6 = vadd.f32 %v1104_v10, %v1094_v28 }
 0x4ea   : > { %v1110_v37 = vpop.permute.xlu1 %1109 }
 0x4eb   : > { %v1116_v39 = vsel %vm2317_vm0, %v1110_v37, 0.0  ;;  %vm2323_vm0 = vcmp.eq.s32.totalorder %v1898_v38, 3 }
 0x4ec   : > { %v1118_v35 = vadd.f32 %v1116_v39, %v1106_v6  ;;  %v1141_v52 = vsel %vm2323_vm0, %v1138_v34, 0.0 }
 0x4ed   : > { %v1143_v4 = vadd.f32 %v1141_v52, %v1131_v54 }
 0x4ee   : > { %v1130_v45 = vadd.f32 %v1128_v42, %v1118_v35 }
 0x4ef   : > { %v1134_v31 = vpop.permute.xlu1 %1133 }
 0x4f0   : > { %v1140_v47 = vsel %vm2321_vm8, %v1134_v31, 0.0  ;;  %vm2327_vm8 = vcmask 130048  }
 0x4f1   : > { %v1142_v50 = vadd.f32 %v1140_v47, %v1130_v45  ;;  %vm2329_vm0 = vmmov %vm2327_vm8 }
 0x4f4   : > { %v1146_v51 = vpop.permute.xlu1 %1145 }
 0x4f5   : > { %v1152_v53 = vsel %vm2324_vm3, %v1146_v51, 0.0  ;;  %vm2330_vm3 = vmmov %vm2329_vm0 }
 0x4f6   : > { %v1154_v2 = vadd.f32 %v1152_v53, %v1142_v50 }
 0x4f8   : > { %v1150_v56 = vpop.permute.xlu1 %1149  ;;  %v1156_v57 = vsel %vm2325_vm15, %v1154_v2, -10000.0  ;;  %vm2331_vm15 = vmmov %vm2329_vm0 }
 0x4f9   : > { %v1153_v3 = vsel %vm2326_vm13, %v1150_v56, 0.0  ;;  %v1158_v15 = vsel %vm2327_vm8, %v1156_v57, -inf  ;;  %vm2332_vm13 = vmmov %vm2329_vm0 }
 0x4fa   : > { %v1155_v17 = vadd.f32 %v1153_v3, %v1143_v4  ;;  %1159 = vmax.xlane.f32.xlu0 %v1158_v15  ;;  %vm2333_vm8 = vmmov %vm2329_vm0 }
 0x4fc   : > { %v1157_v5 = vsel %vm2328_vm10, %v1155_v17, -10000.0  ;;  %vm2334_vm10 = vmmov %vm2329_vm0 }
 0x4fd   : > { %v1161_v19 = vsel %vm2329_vm0, %v1157_v5, -inf }
 0x4fe   : > { %1162 = vmax.xlane.f32.xlu1 %v1161_v19 }
 0x583   : > { %v1160_v58 = vpop.xlane.xlu0 %1159 }
 0x584   : > { %v1164_v61 = vsub.f32 %v1156_v57, %v1160_v58 }
 0x586   : > { %v1166_v62 = vmul.f32 1.442695, %v1164_v61 }
 0x587   : > { %v1163_v18 = vpop.xlane.xlu1 %1162 }
 0x588   : > { %1731 = vpow2.f32 %v1166_v62  ;;  %v1165_v30 = vsub.f32 %v1157_v5, %v1163_v18 }
 0x58a   : > { %v1168_v14 = vmul.f32 1.442695, %v1165_v30 }
 0x58c   : > { %1733 = vpow2.f32 %v1168_v14 }
 0x595   : > { %v1732_v63 = vpop.eup %1731 }
 0x596   : > { %v1170_v9 = vsel %vm2330_vm3, %v1732_v63, 0.0  ;;  %vm2337_vm3 = vmmov %vm2329_vm0 }
 0x597   : > { %1171 = vadd.xlane.f32.xlu0 %v1170_v9 }
 0x599   : > { %v1734_v20 = vpop.eup %1733 }
 0x59a   : > { %v1173_v21 = vsel %vm2331_vm15, %v1734_v20, 0.0  ;;  %vm2338_vm15 = vmmov %vm2329_vm0 }
 0x59b   : > { %1174 = vadd.xlane.f32.xlu0 %v1173_v21 }
 0x620   : > { %v1172_v43 = vpop.xlane.xlu0 %1171 }
 0x621   : > { %1735 = vrcp.f32 %v1172_v43 }
 0x624   : > { %v1175_v8 = vpop.xlane.xlu0 %1174 }
 0x625   : > { %1737 = vrcp.f32 %v1175_v8 }
 0x62e   : > { %v1736_v11 = vpop.eup %1735 }
 0x62f   : > { %v1178_v12 = vmul.f32 %v1736_v11, %v1732_v63 }
 0x631   : > { %1663 = vmatprep.mubr.msk.f32.mxu1 %vm2332_vm13, %v1178_v12  ;;  %v1180_v27 = vsel %vm383_vm1, %v1178_v12, 0.0  ;;  %v1196_v32 = vsel %vm496_vm5, %v1178_v12, 0.0  ;;  %vm2339_vm1 = vcmp.eq.s32.totalorder %v1898_v38, 0  ;;  %v1204_v39 = vsel %vm510_vm6, %v1178_v12, 0.0  ;;  %vm2341_vm13 = vmmov %vm2329_vm0 }
 0x632   : > { %v1738_v13 = vpop.eup %1737  ;;  %v1198_v6 = vsel %vm2338_vm15, %v1196_v32, 0.0  ;;  %v1206_v41 = vsel %vm2341_vm13, %v1204_v39, 0.0  ;;  %vm2342_vm5 = vcmp.eq.s32.totalorder %v1898_v38, 1  ;;  %v1212_v23 = vsel %vm524_vm9, %v1178_v12, 0.0 }
 0x633   : > { %v2172_v16 = vmul.f32 %v1738_v13, %v1734_v20  ;;  %vm2345_vm6 = vcmp.eq.s32.totalorder %v1898_v38, 2  ;;  %vm2349_vm9 = vcmp.eq.s32.totalorder %v1898_v38, 3  ;;  %vm2354_vm13 = vcmp.eq.s32.totalorder %v1896_v36, 3 }
 0x634   : > { %v1236_v52 = vsel %vm2354_vm13, %v1178_v12, 0.0  ;;  %vm2367_vm13 = vcmask 48128  }
 0x635   : > { %v1189_v22 = vsel %vm483_vm4, %v2172_v16, 0.0  ;;  %v1181_v24 = vsel %vm384_vm2, %v2172_v16, 0.0  ;;  %v1197_v26 = vsel %vm497_vm7, %v2172_v16, 0.0  ;;  %vm2335_vm4 = vmmov %vm2329_vm0  ;;  %vm2336_vm2 = vcmp.eq.s32.totalorder %v1898_v38, 4294967295 }
 0x636   : > { %v1193_v25 = vsel %vm2333_vm8, %v1189_v22, 0.0  ;;  %v1185_v7 = vsel %vm2334_vm10, %v1181_v24, 0.0  ;;  %v1201_v28 = vsel %vm2329_vm0, %v1197_v26, 0.0  ;;  %v1182_v29 = vsel %vm2335_vm4, %v1180_v27, 0.0  ;;  %vm2340_vm7 = vmmov %vm2329_vm0 }
 0x637   : > { %1194 = vadd.xlane.f32.xlu0 %v1193_v25  ;;  %1186 = vadd.xlane.f32.xlu1 %v1185_v7  ;;  %v1205_v10 = vsel %vm2336_vm2, %v2172_v16, 0.0  ;;  %v1213_v37 = vsel %vm2339_vm1, %v2172_v16, 0.0  ;;  %v1221_v35 = vsel %vm2342_vm5, %v2172_v16, 0.0  ;;  %vm2343_vm8 = vmmov %vm2329_vm0  ;;  %v1229_v44 = vsel %vm2345_vm6, %v2172_v16, 0.0 }
 0x638   : > { %v1209_v33 = vsel %vm2337_vm3, %v1205_v10, 0.0  ;;  %v1217_v40 = vsel %vm2340_vm7, %v1213_v37, 0.0  ;;  %v1225_v42 = vsel %vm2343_vm8, %v1221_v35, 0.0  ;;  %vm2344_vm10 = vmmov %vm2329_vm0  ;;  %vm2346_vm0 = vcmp.eq.s32.totalorder %v1896_v36, 1 }
 0x639   : > { %v1214_v31 = vsel %vm2344_vm10, %v1212_v23, 0.0  ;;  %v1220_v45 = vsel %vm2346_vm0, %v1178_v12, 0.0  ;;  %vm2347_vm4 = vmmov %vm2337_vm3  ;;  %v1237_v34 = vsel %vm2349_vm9, %v2172_v16, 0.0  ;;  %vm2353_vm7 = vcmp.eq.s32.totalorder %v1898_v38, 4 }
 0x63a   : > { %v1233_v46 = vsel %vm2347_vm4, %v1229_v44, 0.0  ;;  %vm2348_vm2 = vmmov %vm2337_vm3  ;;  %vm2350_vm3 = vcmp.eq.s32.totalorder %v1896_v36, 2  ;;  %v1245_v51 = vsel %vm2353_vm7, %v2172_v16, 0.0  ;;  %vm2357_vm10 = vcmp.eq.s32.totalorder %v1896_v36, 4294967293 }
 0x63b   : > { %1202 = vadd.xlane.f32.xlu0 %v1201_v28  ;;  %1183 = vadd.xlane.f32.xlu1 %v1182_v29  ;;  %v1222_v47 = vsel %vm2348_vm2, %v1220_v45, 0.0  ;;  %v1228_v48 = vsel %vm2350_vm3, %v1178_v12, 0.0  ;;  %vm2351_vm15 = vmmov %vm2348_vm2  ;;  %v1188_v2 = vsel %vm2357_vm10, %v1178_v12, 0.0  ;;  %vm2358_vm6 = vcmp.eq.s32.totalorder %v1896_v36, 4 }
 0x63c   : > { %v1241_v49 = vsel %vm2351_vm15, %v1237_v34, 0.0  ;;  %vm2352_vm1 = vmmov %vm2348_vm2  ;;  %v1244_v4 = vsel %vm2358_vm6, %v1178_v12, 0.0  ;;  %vm2361_vm2 = vcmask 7168   ;;  %vm2363_vm3 = vcmask 15360  }
 0x63d   : > { %v1230_v50 = vsel %vm2352_vm1, %v1228_v48, 0.0  ;;  %vm2355_vm5 = vmmov %vm2352_vm1  ;;  %vm2371_vm10 = vcmask 64512  }
 0x63e   : > { %v1249_v53 = vsel %vm2355_vm5, %v1245_v51, 0.0  ;;  %vm2356_vm8 = vmmov %vm2352_vm1 }
 0x63f   : > { %1210 = vadd.xlane.f32.xlu0 %v1209_v33  ;;  %1199 = vadd.xlane.f32.xlu1 %v1198_v6  ;;  %v1238_v54 = vsel %vm2356_vm8, %v1236_v52, 0.0  ;;  %vm2359_vm0 = vmmov %vm2352_vm1  ;;  %vm2365_vm1 = vcmask 39936   ;;  %vm2369_vm8 = vcmask 56320  }
 0x640   : > { %v1190_v56 = vsel %vm2359_vm0, %v1188_v2, 0.0  ;;  %vm2360_vm4 = vmmov %vm2359_vm0 }
 0x641   : > { %v1246_v38 = vsel %vm2360_vm4, %v1244_v4, 0.0  ;;  %vm2362_vm9 = vmmov %vm2361_vm2  ;;  %vm2374_vm4 = vcmask 261120  }
 0x642   : > { %vm2364_vm15 = vmmov %vm2363_vm3 }
 0x643   : > { %1218 = vadd.xlane.f32.xlu0 %v1217_v40  ;;  %1207 = vadd.xlane.f32.xlu1 %v1206_v41  ;;  %vm2366_vm7 = vmmov %vm2365_vm1 }
 0x644   : > { %vm2368_vm5 = vmmov %vm2367_vm13 }
 0x645   : > { %vm2373_vm6 = vmmov %vm2359_vm0  ;;  %vm1448_vm0 = vcmask 523264  }
 0x647   : > { %1226 = vadd.xlane.f32.xlu0 %v1225_v42  ;;  %1215 = vadd.xlane.f32.xlu1 %v1214_v31  ;;  %v879_v31 = vadd.f32 %v2105_v0, %v2107_v1 }
 0x64b   : > { %1234 = vadd.xlane.f32.xlu0 %v1233_v46  ;;  %1223 = vadd.xlane.f32.xlu1 %v1222_v47 }
 0x64f   : > { %1242 = vadd.xlane.f32.xlu0 %v1241_v49  ;;  %1231 = vadd.xlane.f32.xlu1 %v1230_v50 }
 0x653   : > { %1250 = vadd.xlane.f32.xlu0 %v1249_v53  ;;  %1239 = vadd.xlane.f32.xlu1 %v1238_v54 }
 0x657   : > { %1191 = vadd.xlane.f32.xlu0 %v1190_v56  ;;  %1247 = vadd.xlane.f32.xlu1 %v1246_v38 }
 0x668   : > { %1353 = vrot.lane.b32.xlu1 %v1976_v59, %s1757_s15 }
 0x66d   : > { %1351 = vrot.lane.b32.xlu0 %v1981_v60, %s1757_s15 }
 0x6c0   : > { %v1195_v57 = vpop.xlane.xlu0 %1194  ;;  %v1187_v3 = vpop.xlane.xlu1 %1186 }
 0x6c1   : > { %v1253_v43 = vsel %vm2362_vm9, %v1187_v3, %v1195_v57 }
 0x6c4   : > { %v1203_v15 = vpop.xlane.xlu0 %1202  ;;  %v1184_v17 = vpop.xlane.xlu1 %1183 }
 0x6c5   : > { %v1255_v11 = vsel %vm2364_vm15, %v1253_v43, %v1203_v15 }
 0x6c8   : > { %v1211_v5 = vpop.xlane.xlu0 %1210  ;;  %v1200_v19 = vpop.xlane.xlu1 %1199 }
 0x6c9   : > { %v1257_v13 = vsel %vm697_vm12, %v1255_v11, %v1211_v5 }
 0x6cc   : > { %v1219_v36 = vpop.xlane.xlu0 %1218  ;;  %v1208_v58 = vpop.xlane.xlu1 %1207 }
 0x6cd   : > { %v1259_v7 = vsel %vm700_vm11, %v1257_v13, %v1219_v36 }
 0x6d0   : > { %v1227_v61 = vpop.xlane.xlu0 %1226  ;;  %v1216_v62 = vpop.xlane.xlu1 %1215 }
 0x6d1   : > { %v1261_v27 = vsel %vm2366_vm7, %v1259_v7, %v1227_v61 }
 0x6d4   : > { %v1235_v18 = vpop.xlane.xlu0 %1234  ;;  %v1224_v30 = vpop.xlane.xlu1 %1223 }
 0x6d5   : > { %v1263_v29 = vsel %vm2368_vm5, %v1261_v27, %v1235_v18 }
 0x6d8   : > { %v1243_v14 = vpop.xlane.xlu0 %1242  ;;  %v1232_v63 = vpop.xlane.xlu1 %1231 }
 0x6dc   : > { %v1251_v9 = vpop.xlane.xlu0 %1250  ;;  %v1240_v20 = vpop.xlane.xlu1 %1239 }
 0x6e0   : > { %v1192_v59 = vpop.xlane.xlu0 %1191  ;;  %v1248_v21 = vpop.xlane.xlu1 %1247 }
 0x6e1   : > { %v1252_v60 = vsel %vm2361_vm2, %v1184_v17, %v1192_v59 }
 0x6e2   : > { %v1254_v8 = vsel %vm2363_vm3, %v1252_v60, %v1200_v19 }
 0x6e3   : > { %v1256_v12 = vsel %vm697_vm12, %v1254_v8, %v1208_v58  ;;  %vm2370_vm12 = vmmov %vm2369_vm8 }
 0x6e4   : > { %v1258_v22 = vsel %vm700_vm11, %v1256_v12, %v1216_v62  ;;  %v1354_v24 = vpop.permute.xlu1 %1353  ;;  %v1352_v25 = vpop.permute.xlu0 %1351  ;;  %v1265_v32 = vsel %vm2370_vm12, %v1263_v29, %v1243_v14  ;;  %vm2372_vm11 = vmmov %vm2371_vm10 }
 0x6e5   : > { %v1260_v26 = vsel %vm2365_vm1, %v1258_v22, %v1224_v30  ;;  %1659 = vmatprep.subr.mxu1 %v1354_v24  ;;  %v1267_v6 = vsel %vm2372_vm11, %v1265_v32, %v1251_v9 }
 0x6e6   : > { %v1262_v28 = vsel %vm2367_vm13, %v1260_v26, %v1232_v63  ;;  %1660 = vmatpush3.msra.mxu1 %v1354_v24 }
 0x6e7   : > { %v1264_v10 = vsel %vm2369_vm8, %v1262_v28, %v1240_v20  ;;  %1661 = vmatprep.subr.mxu1 %v1352_v25 }
 0x6e8   : > { %v1266_v33 = vsel %vm2371_vm10, %v1264_v10, %v1248_v21  ;;  %1662 = vmatpush3.msra.mxu1 %v1352_v25 }
 0x6e9   : > { %1656 = vmatprep.mubr.msk.f32.mxu0 %vm715_vm14, %v1266_v33  ;;  %1664 = vmatmul.mubr.msk.f32.vlgmr.msra.gmra.mxu1 %vm2373_vm6, %v2172_v16 }
 0x6ea   : > { %1657 = vmatmul.mubr.msk.f32.vlgmr.msra.gmra.mxu0 %vm715_vm14, %v1267_v6  ;;  %vm2375_vm14 = vmmov %vm2374_vm4 }
 0x7a9   : > { %v1665_v37 = vpop.f32.mrf.mxu1 }
 0x7aa   : > { %v1658_v39 = vpop.f32.mrf.mxu0 }
 0x7ab   : > { %v1429_v40 = vpop.f32.mrf.mxu1  ;;  %v1435_v23 = vadd.f32 %v1665_v37, %v1658_v39 }
 0x7ac   : > { %v1340_v41 = vpop.f32.mrf.mxu0 }
 0x7ad   : > { %v1430_v35 = vadd.f32 %v1429_v40, %v1340_v41 }
 0x7af   : > { %1440 = vrot.lane.b32.xlu1 %v1430_v35, %s1758_s22 }
 0x7b3   : > { %1442 = vrot.lane.b32.xlu1 %v1435_v23, %s1758_s22 }
 0x821   : > { %v1441_v42 = vpop.permute.xlu1 %1440 }
 0x822   : > { %v1446_v16 = vsel %vm2374_vm4, %v2109_v55, %v1441_v42 }
 0x823   : > { %1449 = vst.msk [vmem:[%s258_s25] sm:$0xff] %vm1448_vm0, %v1446_v16 }
 0x825   : > { %v1443_v44 = vpop.permute.xlu1 %1442 }
 0x826   : > { %v1447_v45 = vsel %vm2375_vm14, %v879_v31, %v1443_v44 }
 0x827   : > { %1450 = vst.msk [vmem:[%s258_s25 + $0x8] sm:$0xff] %vm1448_vm0, %v1447_v45 }
 0x828 PF: > { %s15_s18 = sadd.s32 1, %s1745_s18  }
 0x829   : > { %p12_p4 = scmp.ge.s32.totalorder %s15_s18, 4  }
 0x82b   :  { %14 = sbr.rel (!%p12_p4) target bundleno = 1 (0x1), region = 76 }

// kernel: text_encoder_forward.15
= control target key start
LH: loop header
LB: loop body
LE: loop exit
PB: predicated region body
PF: predicated region fallthrough
CT: control target
= control target key end

     0   :  { %s1073_s24 = smov 0   ;;  %s1289_s0 = inlined_call_operand.vmem [shape: f32[2,16,128], index: 0, kind: input, shape index: {}]   ;;  %s1290_s1 = inlined_call_operand.vmem [shape: f32[2,16,1], index: 1, kind: input, shape index: {}]   ;;  %s1291_s2 = inlined_call_operand.vmem [shape: f32[3,128,64], index: 2, kind: input, shape index: {}]   ;;  %s1292_s3 = inlined_call_operand.vmem [shape: f32[1,64], index: 3, kind: input, shape index: {}]   ;;  %s1293_s4 = inlined_call_operand.vmem [shape: f32[2,16,64], index: 4, kind: input, shape index: {}]   ;;  %s1294_s5 = inlined_call_operand.vmem [shape: f32[1,64], index: 5, kind: input, shape index: {}]   ;;  %s1295_s6 = inlined_call_operand.vmem [shape: f32[1,64], index: 6, kind: input, shape index: {}]   ;;  %s1296_s7 = inlined_call_operand.vmem [shape: f32[2,16,64], index: 7, kind: output, shape index: {}]  }
   0x1 LB: > { %s795_s25 = sadd.s32 4294967295, %s1030_s24   ;;  %p799_p0 = scmp.ge.s32.totalorder %s1030_s24, 1  ;;  %s1030_s24 = sphi %s1073_s24, %s17_s24  }
   0x2   : > { %p257_p1 = scmp.lt.s32.totalorder %s1030_s24, 3 }
   0x4   : > { %p258_p2 = pnand %p799_p0, %p257_p1 }
   0x5   : > { %p299_p3 = scmp.lt.s32.totalorder (!%p258_p2), %s795_s25, 1 }
   0x6   : > { %261 = sbr.rel (%p258_p2) target bundleno = 696 (0x2b8), region = 48 }
   0xb   : > { %v823_v0 = vld [vmem:[%s1291_s2 + $0xf8] sm:$0xff]  ;;  %v822_v1 = vld [vmem:[%s1291_s2 + $0xf0] sm:$0xff]  ;;  %v1032_v2 = vmov 0   ;;  %s1298_s25 = smov (!%p299_p3, %s795_s25), 1  ;;  %v821_v5 = vld [vmem:[%s1291_s2 + $0xe8] sm:$0xff]  ;;  %v335_v36 = vlaneseq  ;;  %vm668_vm4 = vcmask 523264  }
   0xc   : > { %1019 = vset.pattern.permute.xlu0 %v1032_v2  ;;  %905 = vmatprep.subr.mxu0 %v823_v0  ;;  %v372_v3 = vld [vmem:[%s1291_s2 + $0x78] sm:$0xff]  ;;  %v371_v4 = vld [vmem:[%s1291_s2 + $0x70] sm:$0xff]  ;;  %v370_v6 = vld [vmem:[%s1291_s2 + $0x68] sm:$0xff]  ;;  %s1099_s15 = sshll.u32 %s1298_s25, 4 }
   0xd   : > { %906 = vmatpush3.msra.mxu0 %v823_v0  ;;  %940 = vmatprep.subr.mxu1 %v372_v3  ;;  %v820_v7 = vld [vmem:[%s1291_s2 + $0xe0] sm:$0xff]  ;;  %s308_s20 = scalar_lea.vmem %s1290_s1, %s1099_s15  ;;  %v819_v9 = vld [vmem:[%s1291_s2 + $0xd8] sm:$0xff]  ;;  %v818_v12 = vld [vmem:[%s1291_s2 + $0xd0] sm:$0xff]  ;;  %s303_s11 = scalar_lea.vmem %s1289_s0, %s1099_s15  ;;  %v1190_v38 = vshrl.u32 %v335_v36, 7 }
   0xe   : > { %907 = vmatprep.subr.mxu0 %v822_v1  ;;  %941 = vmatpush3.msra.mxu1 %v372_v3  ;;  %v321_v8 = vld [vmem:[%s308_s20] sm:$0xff]  ;;  %v322_v11 = vld [vmem:[%s308_s20 + $0x8] sm:$0xff]  ;;  %v368_v13 = vld [vmem:[%s1291_s2 + $0x58] sm:$0xff]  ;;  %s313_s27 = scalar_lea.vmem %s1293_s4, %s1099_s15 }
   0xf   : > { %908 = vmatpush3.msra.mxu0 %v822_v1  ;;  %942 = vmatprep.subr.mxu1 %v371_v4  ;;  %v369_v10 = vld [vmem:[%s1291_s2 + $0x60] sm:$0xff]  ;;  %v817_v14 = vld [vmem:[%s1291_s2 + $0xc8] sm:$0xff]  ;;  %v367_v15 = vld [vmem:[%s1291_s2 + $0x50] sm:$0xff]  ;;  %v343_v42 = vadd.s32 4294967295, %v1190_v38  ;;  %vm340_vm0 = vcmp.lt.s32.totalorder %v1190_v38, 1  ;;  %vm542_vm2 = vcmp.lt.s32.totalorder %v1190_v38, 7 }
  0x10   : > { %909 = vmatprep.subr.mxu0 %v821_v5  ;;  %943 = vmatpush3.msra.mxu1 %v371_v4  ;;  %v816_v16 = vld [vmem:[%s1291_s2 + $0xc0] sm:$0xff]  ;;  %v366_v17 = vld [vmem:[%s1291_s2 + $0x48] sm:$0xff]  ;;  %v815_v18 = vld [vmem:[%s1291_s2 + $0xb8] sm:$0xff]  ;;  %v337_v0 = vadd.s32 8, %v1190_v38 }
  0x11   : > { %910 = vmatpush3.msra.mxu0 %v821_v5  ;;  %944 = vmatprep.subr.mxu1 %v370_v6  ;;  %v365_v19 = vld [vmem:[%s1291_s2 + $0x40] sm:$0xff]  ;;  %v814_v20 = vld [vmem:[%s1291_s2 + $0xb0] sm:$0xff]  ;;  %v364_v21 = vld [vmem:[%s1291_s2 + $0x38] sm:$0xff]  ;;  %vm345_vm1 = vcmp.ge.s32.totalorder %v343_v42, 0 }
  0x12   : > { %325 = vperm.xlu0 %1019, %v321_v8   ;;  %911 = vmatprep.subr.mxu0 %v820_v7  ;;  %v813_v22 = vld [vmem:[%s1291_s2 + $0xa8] sm:$0xff]  ;;  %v363_v23 = vld [vmem:[%s1291_s2 + $0x30] sm:$0xff]  ;;  %v812_v24 = vld [vmem:[%s1291_s2 + $0xa0] sm:$0xff]  ;;  %v546_v3 = vadd.s32 1, %v337_v0 }
  0x13   : > { %912 = vmatpush3.msra.mxu0 %v820_v7  ;;  %945 = vmatpush3.msra.mxu1 %v370_v6  ;;  %v362_v25 = vld [vmem:[%s1291_s2 + $0x28] sm:$0xff]  ;;  %v811_v26 = vld [vmem:[%s1291_s2 + $0x98] sm:$0xff]  ;;  %v361_v27 = vld [vmem:[%s1291_s2 + $0x20] sm:$0xff] }
  0x14   : > { %913 = vmatprep.subr.mxu0 %v819_v9  ;;  %946 = vmatprep.subr.mxu1 %v369_v10  ;;  %v810_v28 = vld [vmem:[%s1291_s2 + $0x90] sm:$0xff]  ;;  %v360_v29 = vld [vmem:[%s1291_s2 + $0x18] sm:$0xff]  ;;  %v809_v30 = vld [vmem:[%s1291_s2 + $0x88] sm:$0xff]  ;;  %vm550_vm3 = vcmp.lt.s32.totalorder %v546_v3, 16 }
  0x15   : > { %914 = vmatpush3.msra.mxu0 %v819_v9  ;;  %947 = vmatpush3.msra.mxu1 %v369_v10  ;;  %v359_v31 = vld [vmem:[%s1291_s2 + $0x10] sm:$0xff]  ;;  %v808_v32 = vld [vmem:[%s1291_s2 + $0x80] sm:$0xff]  ;;  %v358_v33 = vld [vmem:[%s1291_s2 + $0x8] sm:$0xff] }
  0x16   : > { %330 = vperm.xlu0 %1019, %v322_v11   ;;  %915 = vmatprep.subr.mxu0 %v818_v12  ;;  %v840_v34 = vld [vmem:[%s1291_s2 + $0x178] sm:$0xff]  ;;  %v357_v35 = vld [vmem:[%s1291_s2] sm:$0xff]  ;;  %v320_v41 = vld [vmem:[%s303_s11 + $0x8] sm:$0xff] }
  0x17   : > { %916 = vmatpush3.msra.mxu0 %v818_v12  ;;  %948 = vmatprep.subr.mxu1 %v368_v13  ;;  %v319_v37 = vld [vmem:[%s303_s11] sm:$0xff]  ;;  %v839_v45 = vld [vmem:[%s1291_s2 + $0x170] sm:$0xff]  ;;  %v838_v50 = vld [vmem:[%s1291_s2 + $0x168] sm:$0xff]  ;;  %s318_s11 = scalar_lea.vmem %s1296_s7, %s1099_s15 }
  0x18   : > { %917 = vmatprep.subr.mxu0 %v817_v14  ;;  %949 = vmatpush3.msra.mxu1 %v368_v13  ;;  %v837_v54 = vld [vmem:[%s1291_s2 + $0x160] sm:$0xff]  ;;  %v836_v55 = vld [vmem:[%s1291_s2 + $0x158] sm:$0xff]  ;;  %v835_v56 = vld [vmem:[%s1291_s2 + $0x150] sm:$0xff] }
  0x19   : > { %918 = vmatpush3.msra.mxu0 %v817_v14  ;;  %950 = vmatprep.subr.mxu1 %v367_v15  ;;  %v834_v57 = vld [vmem:[%s1291_s2 + $0x148] sm:$0xff]  ;;  %v833_v58 = vld [vmem:[%s1291_s2 + $0x140] sm:$0xff]  ;;  %v832_v59 = vld [vmem:[%s1291_s2 + $0x138] sm:$0xff] }
  0x1a   : > { %919 = vmatprep.subr.mxu0 %v816_v16  ;;  %951 = vmatpush3.msra.mxu1 %v367_v15  ;;  %v831_v60 = vld [vmem:[%s1291_s2 + $0x130] sm:$0xff]  ;;  %v830_v61 = vld [vmem:[%s1291_s2 + $0x128] sm:$0xff]  ;;  %v829_v62 = vld [vmem:[%s1291_s2 + $0x120] sm:$0xff] }
  0x1b   : > { %920 = vmatpush3.msra.mxu0 %v816_v16  ;;  %952 = vmatprep.subr.mxu1 %v366_v17  ;;  %v828_v63 = vld [vmem:[%s1291_s2 + $0x118] sm:$0xff]  ;;  %v827_v1 = vld [vmem:[%s1291_s2 + $0x110] sm:$0xff]  ;;  %v826_v2 = vld [vmem:[%s1291_s2 + $0x108] sm:$0xff] }
  0x1c   : > { %921 = vmatprep.subr.mxu0 %v815_v18  ;;  %953 = vmatpush3.msra.mxu1 %v366_v17  ;;  %v825_v4 = vld [vmem:[%s1291_s2 + $0x100] sm:$0xff] }
  0x1d   : > { %922 = vmatpush3.msra.mxu0 %v815_v18  ;;  %954 = vmatprep.subr.mxu1 %v365_v19  ;;  %v842_v12 = vld [vmem:[%s1292_s3] ss:$0 sm:$0xff] }
  0x1e   : > { %923 = vmatprep.subr.mxu0 %v814_v20  ;;  %955 = vmatpush3.msra.mxu1 %v365_v19  ;;  %v664_v19 = vld [vmem:[%s313_s27] sm:$0xff] }
  0x1f   : > { %924 = vmatpush3.msra.mxu0 %v814_v20  ;;  %956 = vmatprep.subr.mxu1 %v364_v21 }
  0x20   : > { %925 = vmatprep.subr.mxu0 %v813_v22  ;;  %957 = vmatpush3.msra.mxu1 %v364_v21 }
  0x21   : > { %926 = vmatpush3.msra.mxu0 %v813_v22  ;;  %958 = vmatprep.subr.mxu1 %v363_v23  ;;  %v665_v22 = vld [vmem:[%s313_s27 + $0x8] sm:$0xff] }
  0x22   : > { %927 = vmatprep.subr.mxu0 %v812_v24  ;;  %959 = vmatpush3.msra.mxu1 %v363_v23 }
  0x23   : > { %928 = vmatpush3.msra.mxu0 %v812_v24  ;;  %960 = vmatprep.subr.mxu1 %v362_v25 }
  0x24   : > { %929 = vmatprep.subr.mxu0 %v811_v26  ;;  %961 = vmatpush3.msra.mxu1 %v362_v25 }
  0x25   : > { %930 = vmatpush3.msra.mxu0 %v811_v26  ;;  %962 = vmatprep.subr.mxu1 %v361_v27 }
  0x26   : > { %931 = vmatprep.subr.mxu0 %v810_v28  ;;  %963 = vmatpush3.msra.mxu1 %v361_v27 }
  0x27   : > { %932 = vmatpush3.msra.mxu0 %v810_v28  ;;  %964 = vmatprep.subr.mxu1 %v360_v29 }
  0x28   : > { %933 = vmatprep.subr.mxu0 %v809_v30  ;;  %965 = vmatpush3.msra.mxu1 %v360_v29 }
  0x29   : > { %934 = vmatpush3.msra.mxu0 %v809_v30  ;;  %966 = vmatprep.subr.mxu1 %v359_v31 }
  0x2a   : > { %935 = vmatprep.subr.mxu0 %v808_v32  ;;  %967 = vmatpush3.msra.mxu1 %v359_v31 }
  0x2b   : > { %936 = vmatpush3.msra.mxu0 %v808_v32  ;;  %968 = vmatprep.subr.mxu1 %v358_v33 }
  0x2c   : > { %975 = vmatprep.subr.mxu0 %v840_v34  ;;  %969 = vmatpush3.msra.mxu1 %v358_v33 }
  0x2d   : > { %970 = vmatprep.subr.mxu1 %v357_v35 }
  0x2e   : > { %971 = vmatpush3.msra.mxu1 %v357_v35 }
  0x8d   : > { %v1192_v39 = vpop.permute.xlu0 %325 }
  0x8e   : > { %v1195_v40 = vmul.f32 %v1192_v39, %v319_v37 }
  0x90   : > { %937 = vmatprep.mubr.f32.mxu0 %v1195_v40  ;;  %v338_v46 = vrot.slane %v1195_v40, 7  ;;  %v540_v48 = vrot.slane %v1195_v40, 1 }
  0x91   : > { %v1199_v43 = vpop.permute.xlu0 %330 }
  0x92   : > { %v1202_v44 = vmul.f32 %v1199_v43, %v320_v41 }
  0x94   : > { %938 = vmatmul.mubr.f32.vlgmr.msra.gmra.mxu0 %v1202_v44  ;;  %v339_v47 = vrot.slane %v1202_v44, 7  ;;  %v541_v49 = vrot.slane %v1202_v44, 1  ;;  %v843_v44 = vld [vmem:[%s1294_s5] ss:$0 sm:$0xff] }
  0x95   : > { %976 = vmatpush3.msra.mxu0 %v840_v34 }
  0x96   : > { %977 = vmatprep.subr.mxu0 %v839_v45  ;;  %v342_v51 = vsel %vm340_vm0, %v339_v47, %v338_v46  ;;  %v543_v52 = vsel %vm542_vm2, %v540_v48, %v541_v49  ;;  %v341_v53 = vsel %vm340_vm0, %v338_v46, %v339_v47  ;;  %v544_v5 = vsel %vm542_vm2, %v541_v49, %v540_v48  ;;  %v844_v46 = vld [vmem:[%s1295_s6] ss:$0 sm:$0xff] }
  0x97   : > { %978 = vmatpush3.msra.mxu0 %v839_v45  ;;  %972 = vmatprep.mubr.msk.f32.mxu1 %vm345_vm1, %v342_v51 }
  0x98   : > { %979 = vmatprep.subr.mxu0 %v838_v50  ;;  %1007 = vmatprep.mubr.f32.mxu0 %v543_v52 }
  0x99   : > { %973 = vmatmul.mubr.f32.vlgmr.msra.gmra.mxu1 %v341_v53  ;;  %980 = vmatpush3.msra.mxu0 %v838_v50 }
  0x9a   : > { %981 = vmatprep.subr.mxu0 %v837_v54 }
  0x9b   : > { %982 = vmatpush3.msra.mxu0 %v837_v54 }
  0x9c   : > { %983 = vmatprep.subr.mxu0 %v836_v55 }
  0x9d   : > { %984 = vmatpush3.msra.mxu0 %v836_v55 }
  0x9e   : > { %985 = vmatprep.subr.mxu0 %v835_v56 }
  0x9f   : > { %986 = vmatpush3.msra.mxu0 %v835_v56 }
  0xa0   : > { %987 = vmatprep.subr.mxu0 %v834_v57 }
  0xa1   : > { %988 = vmatpush3.msra.mxu0 %v834_v57 }
  0xa2   : > { %989 = vmatprep.subr.mxu0 %v833_v58 }
  0xa3   : > { %990 = vmatpush3.msra.mxu0 %v833_v58 }
  0xa4   : > { %991 = vmatprep.subr.mxu0 %v832_v59 }
  0xa5   : > { %992 = vmatpush3.msra.mxu0 %v832_v59 }
  0xa6   : > { %993 = vmatprep.subr.mxu0 %v831_v60 }
  0xa7   : > { %994 = vmatpush3.msra.mxu0 %v831_v60 }
  0xa8   : > { %995 = vmatprep.subr.mxu0 %v830_v61 }
  0xa9   : > { %996 = vmatpush3.msra.mxu0 %v830_v61 }
  0xaa   : > { %997 = vmatprep.subr.mxu0 %v829_v62 }
  0xab   : > { %998 = vmatpush3.msra.mxu0 %v829_v62 }
  0xac   : > { %999 = vmatprep.subr.mxu0 %v828_v63 }
  0xad   : > { %1000 = vmatpush3.msra.mxu0 %v828_v63 }
  0xae   : > { %1001 = vmatprep.subr.mxu0 %v827_v1 }
  0xaf   : > { %1002 = vmatpush3.msra.mxu0 %v827_v1 }
  0xb0   : > { %1003 = vmatprep.subr.mxu0 %v826_v2 }
  0xb1   : > { %1004 = vmatpush3.msra.mxu0 %v826_v2 }
  0xb2   : > { %1005 = vmatprep.subr.mxu0 %v825_v4 }
  0xb3   : > { %1006 = vmatpush3.msra.mxu0 %v825_v4 }
  0xb4   : > { %1008 = vmatmul.mubr.msk.f32.vlgmr.msra.gmra.mxu0 %vm550_vm3, %v544_v5 }
 0x154   : > { %v939_v6 = vpop.f32.mrf.mxu0 }
 0x156   : > { %v456_v8 = vpop.f32.mrf.mxu0 }
 0x159   : > { %v974_v7 = vpop.f32.mrf.mxu1 }
 0x15a   : > { %v537_v10 = vadd.f32 %v974_v7, %v939_v6 }
 0x15b   : > { %v531_v9 = vpop.f32.mrf.mxu1 }
 0x15c   : > { %v532_v13 = vadd.f32 %v531_v9, %v456_v8 }
 0x174   : > { %v1009_v11 = vpop.f32.mrf.mxu0 }
 0x175   : > { %v652_v14 = vadd.f32 %v1009_v11, %v537_v10 }
 0x176   : > { %v642_v15 = vpop.f32.mrf.mxu0 }
 0x177   : > { %v661_v16 = vadd.f32 %v842_v12, %v652_v14  ;;  %v651_v17 = vadd.f32 %v642_v15, %v532_v13 }
 0x179   : > { %v660_v18 = vadd.f32 %v842_v12, %v651_v17  ;;  %v663_v21 = vmul.f32 %v661_v16, %v1199_v43 }
 0x17b   : > { %v662_v20 = vmul.f32 %v660_v18, %v1192_v39  ;;  %v667_v25 = vadd.f32 %v665_v22, %v663_v21 }
 0x17d   : > { %v666_v23 = vadd.f32 %v664_v19, %v662_v20  ;;  %v672_v26 = vsel %vm668_vm4, %v667_v25, 0.0 }
 0x17f   : > { %v669_v24 = vsel %vm668_vm4, %v666_v23, 0.0 }
 0x180   : > { %670 = vadd.xlane.f32.xlu1 %v669_v24 }
 0x184   : > { %673 = vadd.xlane.f32.xlu1 %v672_v26 }
 0x209   : > { %v671_v27 = vpop.xlane.xlu1 %670 }
 0x20a   : > { %v676_v28 = vmul.f32 0.015625, %v671_v27 }
 0x20c   : > { %v678_v29 = vsub.f32 %v666_v23, %v676_v28 }
 0x20d   : > { %v674_v30 = vpop.xlane.xlu1 %673 }
 0x20e   : > { %v677_v31 = vmul.f32 0.015625, %v674_v30  ;;  %v680_v32 = vmul.f32 %v678_v29, %v678_v29 }
 0x210   : > { %v679_v33 = vsub.f32 %v667_v25, %v677_v31  ;;  %v682_v34 = vsel %vm668_vm4, %v680_v32, 0.0 }
 0x211   : > { %683 = vadd.xlane.f32.xlu0 %v682_v34 }
 0x212   : > { %v681_v35 = vmul.f32 %v679_v33, %v679_v33 }
 0x214   : > { %v685_v36 = vsel %vm668_vm4, %v681_v35, 0.0 }
 0x215   : > { %686 = vadd.xlane.f32.xlu1 %v685_v36 }
 0x29a   : > { %v684_v37 = vpop.xlane.xlu0 %683 }
 0x29b   : > { %v688_v38 = vmul.f32 0.015625, %v684_v37 }
 0x29d   : > { %v690_v39 = vadd.f32 1e-05, %v688_v38 }
 0x29e   : > { %v687_v40 = vpop.xlane.xlu1 %686 }
 0x29f   : > { %1020 = vrsqrt.f32 %v690_v39  ;;  %v689_v41 = vmul.f32 0.015625, %v687_v40 }
 0x2a1   : > { %v691_v42 = vadd.f32 1e-05, %v689_v41 }
 0x2a3   : > { %1022 = vrsqrt.f32 %v691_v42 }
 0x2ac   : > { %v1021_v43 = vpop.eup %1020 }
 0x2ad   : > { %v694_v45 = vmul.f32 %v1021_v43, %v678_v29 }
 0x2af   : > { %v703_v47 = vmul.f32 %v843_v44, %v694_v45 }
 0x2b0   : > { %v1023_v48 = vpop.eup %1022 }
 0x2b1   : > { %v712_v49 = vadd.f32 %v844_v46, %v703_v47  ;;  %v695_v50 = vmul.f32 %v1023_v48, %v679_v33 }
 0x2b3   : > { %714 = vst.msk [vmem:[%s318_s11] sm:$0xff] %vm668_vm4, %v712_v49  ;;  %v704_v51 = vmul.f32 %v843_v44, %v695_v50 }
 0x2b5   : > { %v713_v52 = vadd.f32 %v844_v46, %v704_v51 }
 0x2b7   : > { %715 = vst.msk [vmem:[%s318_s11 + $0x8] sm:$0xff] %vm668_vm4, %v713_v52 }
 0x2b8 PF: > { %s17_s24 = sadd.s32 1, %s1030_s24  }
 0x2b9   : > { %p14_p4 = scmp.ge.s32.totalorder %s17_s24, 4  }
 0x2bb   :  { %16 = sbr.rel (!%p14_p4) target bundleno = 1 (0x1), region = 86 }

</bundles_post_ra>
